<compile_context>
chip_gen: v7x
topology: tpu7x:2x2x1
jax: 0.10.0
libtpu: 0.0.40
codegen_flags: <defaults>
</compile_context>

<pallas_src>
import numpy as np
import jax
import jax.numpy as jnp
from jax import lax
from jax.experimental import pallas as pl
from jax.experimental.pallas import tpu as pltpu

CP = 128          # channel padding (TPU lane width)
TARGET_M = 256    # target GEMM M rows per grid step


def _pick_rows(ho, wo, target_m=TARGET_M):
    """Smallest divisor R of `ho` with R*wo >= target_m, else ho."""
    for r in range(1, ho + 1):
        if ho % r == 0 and r * wo >= target_m:
            return r
    return ho


# ----------------------------------------------------------------------------
# Pallas kernels
# ----------------------------------------------------------------------------
def _conv3x3_s2_kernel(x_ref, w_ref, b_ref, o_ref, lhs_ref):
    """3x3 stride-2 conv + bias + SiLU for one output-row block of one image.

    x_ref  : [1, Hq, Wq, 4*CP] bf16  phase-folded padded input (whole image,
                                     resident across the row-block grid axis)
    w_ref  : [9*CP, CP]        bf16  tap-major packed weights (K = 9*CP)
    b_ref  : [1, CP]           f32
    o_ref  : [1, R, Wo, CP]    bf16  output row block
    lhs_ref: [R*Wo, 9*CP]      bf16  VMEM scratch (fused-tap GEMM LHS)
    """
    R, Wo = o_ref.shape[1], o_ref.shape[2]
    r0 = pl.program_id(1) * R
    # Assemble the fused-tap LHS: 9 lane-aligned 128-wide writes per row block.
    for kh in range(3):
        for kw in range(3):
            t = kh * 3 + kw
            p = (kh % 2) * 2 + (kw % 2)              # phase of (row, col) parity
            tap = x_ref[0, pl.ds(r0 + kh // 2, R),
                        pl.ds(kw // 2, Wo),
                        p * CP:(p + 1) * CP]         # [R, Wo, CP]
            lhs_ref[:, t * CP:(t + 1) * CP] = tap.reshape(R * Wo, CP)
    # One big-M, big-K MXU matmul with f32 accumulation.
    acc = jnp.dot(lhs_ref[...], w_ref[...], preferred_element_type=jnp.float32)
    acc = acc + b_ref[...].astype(jnp.float32)
    y = acc * jax.nn.sigmoid(acc)                    # SiLU (f32 epilogue)
    o_ref[0, :, :, :] = y.astype(o_ref.dtype).reshape(R, Wo, CP)


def _bottleneck_kernel(x_ref, w2_ref, b2_ref, w3_ref, b3_ref, o_ref,
                       y1_ref, lhs_ref):
    """Fused (1x1 conv + SiLU) -> (3x3 s1 p1 conv + SiLU) + residual, row block.

    x_ref  : [1, Hp, Wp, CP]   bf16  spatially padded input (whole image,
                                     resident; interior is also the residual)
    w2_ref : [CP, CP]          bf16
    b2_ref : [1, CP]           f32
    w3_ref : [9*CP, CP]        bf16  tap-major
    b3_ref : [1, CP]           f32
    o_ref  : [1, R, W, CP]     bf16  output row block
    y1_ref : [R+2, Wp, CP]     bf16  VMEM scratch (1x1 activation + 1px halo)
    lhs_ref: [R*W, 9*CP]       bf16  VMEM scratch (fused-tap GEMM LHS)
    """
    R, W = o_ref.shape[1], o_ref.shape[2]
    Wp = x_ref.shape[2]
    rb = pl.program_id(1)
    r0 = rb * R

    # ---- stage 1: 1x1 conv + SiLU over the R+2 rows the 3x3 stage needs ----
    xin = x_ref[0, pl.ds(r0, R + 2), 1:1 + W, :].reshape((R + 2) * W, CP)
    a1 = jnp.dot(xin, w2_ref[...], preferred_element_type=jnp.float32)
    a1 = a1 + b2_ref[...].astype(jnp.float32)
    y1 = a1 * jax.nn.sigmoid(a1)
    # zero only the 1-pixel halo columns, then write the interior
    zc = jnp.zeros((R + 2, 1, CP), y1_ref.dtype)
    y1_ref[:, 0:1, :] = zc
    y1_ref[:, Wp - 1:Wp, :] = zc
    y1_ref[:, 1:1 + W, :] = y1.astype(y1_ref.dtype).reshape(R + 2, W, CP)

    # halo rows outside the image must be zero (3x3 zero padding of the 1x1 out)
    @pl.when(rb == 0)
    def _():
        y1_ref[0:1, :, :] = jnp.zeros((1, Wp, CP), y1_ref.dtype)

    @pl.when(rb == pl.num_programs(1) - 1)
    def _():
        y1_ref[R + 1:R + 2, :, :] = jnp.zeros((1, Wp, CP), y1_ref.dtype)

    # ---- stage 2: 3x3 conv (taps fused along K) + SiLU + residual ----
    for kh in range(3):
        for kw in range(3):
            t = kh * 3 + kw
            tap = y1_ref[kh:kh + R, kw:kw + W, :]    # [R, W, CP]
            lhs_ref[:, t * CP:(t + 1) * CP] = tap.reshape(R * W, CP)
    a3 = jnp.dot(lhs_ref[...], w3_ref[...], preferred_element_type=jnp.float32)
    a3 = a3 + b3_ref[...].astype(jnp.float32)
    y3 = a3 * jax.nn.sigmoid(a3)
    res = x_ref[0, pl.ds(r0 + 1, R), 1:1 + W, :].astype(jnp.float32)
    out = y3 + res.reshape(R * W, CP)
    o_ref[0, :, :, :] = out.astype(o_ref.dtype).reshape(R, W, CP)


# ----------------------------------------------------------------------------
# Wrappers
# ----------------------------------------------------------------------------
def _space_to_depth2(xp):
    """[N, Hp, Wp, C] (Hp, Wp even) -> [N, Hp//2, Wp//2, 4*C], phase-major lanes."""
    N, Hp, Wp, C = xp.shape
    assert Hp % 2 == 0 and Wp % 2 == 0
    x = xp.reshape(N, Hp // 2, 2, Wp // 2, 2, C)
    x = jnp.transpose(x, (0, 1, 3, 2, 4, 5))         # [N, Hq, Wq, ph, pw, C]
    return x.reshape(N, Hp // 2, Wp // 2, 4 * C)


def conv3x3_s2_silu(x_nhwc, w_packed, b_packed):
    """x_nhwc [N,H,W,CP] bf16 -> [N,Ho,Wo,CP] bf16; 3x3 conv, stride 2, pad 1."""
    N, H, W, _ = x_nhwc.shape
    Ho, Wo = (H + 2 - 3) // 2 + 1, (W + 2 - 3) // 2 + 1
    xp = jnp.pad(x_nhwc, ((0, 0), (1, 1), (1, 1), (0, 0)))
    xs = _space_to_depth2(xp)                        # [N, Hq, Wq, 4*CP]
    Hq, Wq = xs.shape[1], xs.shape[2]
    R = _pick_rows(Ho, Wo)
    return pl.pallas_call(
        _conv3x3_s2_kernel,
        out_shape=jax.ShapeDtypeStruct((N, Ho, Wo, CP), jnp.bfloat16),
        grid=(N, Ho // R),
        in_specs=[
            pl.BlockSpec((1, Hq, Wq, 4 * CP), lambda n, r: (n, 0, 0, 0)),
            pl.BlockSpec((9 * CP, CP), lambda n, r: (0, 0)),
            pl.BlockSpec((1, CP), lambda n, r: (0, 0)),
        ],
        out_specs=pl.BlockSpec((1, R, Wo, CP), lambda n, r: (n, r, 0, 0)),
        scratch_shapes=[pltpu.VMEM((R * Wo, 9 * CP), jnp.bfloat16)],
        compiler_params=pltpu.CompilerParams(
            dimension_semantics=("parallel", "arbitrary"),
            vmem_limit_bytes=64 * 1024 * 1024),
    )(xs, w_packed, b_packed)


def bottleneck_silu(x_nhwc, w2, b2, w3, b3):
    """Fused 1x1+SiLU -> 3x3(s1,p1)+SiLU -> +residual.  bf16 in, bf16 out."""
    N, H, W, _ = x_nhwc.shape
    xp = jnp.pad(x_nhwc, ((0, 0), (1, 1), (1, 1), (0, 0)))
    Hp, Wp = H + 2, W + 2
    R = _pick_rows(H, W)
    return pl.pallas_call(
        _bottleneck_kernel,
        out_shape=jax.ShapeDtypeStruct((N, H, W, CP), jnp.bfloat16),
        grid=(N, H // R),
        in_specs=[
            pl.BlockSpec((1, Hp, Wp, CP), lambda n, r: (n, 0, 0, 0)),
            pl.BlockSpec((CP, CP), lambda n, r: (0, 0)),
            pl.BlockSpec((1, CP), lambda n, r: (0, 0)),
            pl.BlockSpec((9 * CP, CP), lambda n, r: (0, 0)),
            pl.BlockSpec((1, CP), lambda n, r: (0, 0)),
        ],
        out_specs=pl.BlockSpec((1, R, W, CP), lambda n, r: (n, r, 0, 0)),
        scratch_shapes=[pltpu.VMEM((R + 2, Wp, CP), jnp.bfloat16),
                        pltpu.VMEM((R * W, 9 * CP), jnp.bfloat16)],
        compiler_params=pltpu.CompilerParams(
            dimension_semantics=("parallel", "arbitrary"),
            vmem_limit_bytes=64 * 1024 * 1024),
    )(xp, w2, b2, w3, b3)


# ----------------------------------------------------------------------------
# Parameters: synthetic init + hoisted one-time weight repack
# ----------------------------------------------------------------------------
def init_params(key, c_in=4, c1=8, c2=16):
    ks = jax.random.split(key, 8)
    scale = 0.1
    return {
        "w0": scale * jax.random.normal(ks[0], (c1, c_in, 3, 3), jnp.float32),
        "b0": scale * jax.random.normal(ks[1], (c1,), jnp.float32),
        "w1": scale * jax.random.normal(ks[2], (c2, c1, 3, 3), jnp.float32),
        "b1": scale * jax.random.normal(ks[3], (c2,), jnp.float32),
        "w2": scale * jax.random.normal(ks[4], (c2, c2, 1, 1), jnp.float32),
        "b2": scale * jax.random.normal(ks[5], (c2,), jnp.float32),
        "w3": scale * jax.random.normal(ks[6], (c2, c2, 3, 3), jnp.float32),
        "b3": scale * jax.random.normal(ks[7], (c2,), jnp.float32),
    }


def pack_params(raw):
    """One-time repack: OIHW -> tap-major [9*CP, CP] bf16 + padded f32 bias."""
    def pack3(w_oihw, b):
        co, ci, kh, kw = w_oihw.shape
        w = jnp.transpose(w_oihw, (2, 3, 1, 0))              # [kh,kw,ci,co]
        w = jnp.pad(w, ((0, 0), (0, 0), (0, CP - ci), (0, CP - co)))
        w = w.reshape(kh * kw * CP, CP).astype(jnp.bfloat16)  # K = 9*CP
        bp = jnp.pad(b, (0, CP - co)).reshape(1, CP).astype(jnp.float32)
        return w, bp

    def pack1(w_oihw, b):
        co, ci = w_oihw.shape[0], w_oihw.shape[1]
        w = jnp.transpose(w_oihw[:, :, 0, 0], (1, 0))         # [ci, co]
        w = jnp.pad(w, ((0, CP - ci), (0, CP - co))).astype(jnp.bfloat16)
        bp = jnp.pad(b, (0, CP - co)).reshape(1, CP).astype(jnp.float32)
        return w, bp

    packed = {}
    packed["w0"], packed["b0"] = pack3(raw["w0"], raw["b0"])
    packed["w1"], packed["b1"] = pack3(raw["w1"], raw["b1"])
    packed["w2"], packed["b2"] = pack1(raw["w2"], raw["b2"])
    packed["w3"], packed["b3"] = pack3(raw["w3"], raw["b3"])
    return packed


# ----------------------------------------------------------------------------
# Forward pass (external interface NCHW, like the PyTorch module)
# ----------------------------------------------------------------------------
def yolo_feature_extractor(x_nchw, packed, c_out):
    N, C, H, W = x_nchw.shape
    x = jnp.transpose(x_nchw, (0, 2, 3, 1))                    # -> NHWC
    x = jnp.pad(x, ((0, 0), (0, 0), (0, 0), (0, CP - C))).astype(jnp.bfloat16)
    x = conv3x3_s2_silu(x, packed["w0"], packed["b0"])          # /2
    x = conv3x3_s2_silu(x, packed["w1"], packed["b1"])          # /4
    y = bottleneck_silu(x, packed["w2"], packed["b2"],
                        packed["w3"], packed["b3"])             # fused, bf16
    y = y[:, :, :, :c_out].astype(jnp.float32)
    return jnp.transpose(y, (0, 3, 1, 2))                       # -> NCHW


# ----------------------------------------------------------------------------
# Pure-JAX reference (lax.conv) mimicking the bf16 operand rounding
# ----------------------------------------------------------------------------
def _q(x):  # bf16 round-trip, matches kernel operand precision
    return x.astype(jnp.bfloat16).astype(jnp.float32)


def _ref_conv_silu(x_nhwc, w_oihw, b, stride, pad):
    w_hwio = jnp.transpose(_q(w_oihw), (2, 3, 1, 0))
    y = lax.conv_general_dilated(
        _q(x_nhwc), w_hwio, (stride, stride), [(pad, pad), (pad, pad)],
        dimension_numbers=("NHWC", "HWIO", "NHWC"),
        preferred_element_type=jnp.float32)
    y = y + b.reshape(1, 1, 1, -1)
    return y * jax.nn.sigmoid(y)


def yolo_feature_extractor_ref(x_nchw, p):
    x = jnp.transpose(x_nchw, (0, 2, 3, 1)).astype(jnp.float32)
    x = _q(_ref_conv_silu(x, p["w0"], p["b0"], 2, 1))
    x = _q(_ref_conv_silu(x, p["w1"], p["b1"], 2, 1))
    y = _q(_ref_conv_silu(x, p["w2"], p["b2"], 1, 0))
    y = _ref_conv_silu(y, p["w3"], p["b3"], 1, 1) + x
    return jnp.transpose(y, (0, 3, 1, 2))


# ----------------------------------------------------------------------------
if __name__ == "__main__":
    key = jax.random.PRNGKey(0)
    k_x, k_p = jax.random.split(key)

    N, C, H, W = 2, 4, 16, 16
    x = jax.random.normal(k_x, (N, C, H, W), jnp.float32)
    raw = init_params(k_p, c_in=C, c1=8, c2=16)
    packed = pack_params(raw)

    fwd = jax.jit(yolo_feature_extractor, static_argnums=(2,))
    out = jax.block_until_ready(fwd(x, packed, 16))

    ref = jax.block_until_ready(yolo_feature_extractor_ref(x, raw))
    assert out.shape == (N, 16, H // 4, W // 4), out.shape
    np.testing.assert_allclose(np.asarray(out), np.asarray(ref),
                               rtol=1e-2, atol=1e-2)

    print("KERNEL_OK")
</pallas_src>

<mosaic_0001>
module attributes {stable_mosaic.version = 11 : i64} {
  func.func @_conv3x3_s2_kernel(%arg0: i32, %arg1: i32, %arg2: memref<1x9x9x512xbf16, #tpu.memory_space<vmem>>, %arg3: memref<1152x128xbf16, #tpu.memory_space<vmem>>, %arg4: memref<1x128xf32, #tpu.memory_space<vmem>>, %arg5: memref<1x8x8x128xbf16, #tpu.memory_space<vmem>>, %arg6: memref<64x1152xbf16, #tpu.memory_space<vmem>>) attributes {dimension_semantics = [#tpu.dimension_semantics<parallel>, #tpu.dimension_semantics<arbitrary>], iteration_bounds = array<i64: 2, 1>, scalar_prefetch = 0 : i64, scratch_operands = 1 : i64, tpu.core_type = #tpu.core_type<tc>, window_params = [{transform_indices = @transform_0, window_bounds = array<i64: 1, 9, 9, 512>}, {pipeline_mode = #tpu.pipeline_mode<synchronous>, transform_indices = @transform_1, window_bounds = array<i64: 1152, 128>}, {pipeline_mode = #tpu.pipeline_mode<synchronous>, transform_indices = @transform_2, window_bounds = array<i64: 1, 128>}, {transform_indices = @transform_3, window_bounds = array<i64: 1, 8, 8, 128>}]} {
    %c8_i32 = arith.constant 8 : i32
    %0 = arith.muli %arg1, %c8_i32 : i32
    %c0_i32 = arith.constant 0 : i32
    %1 = arith.addi %0, %c0_i32 : i32
    %c0 = arith.constant 0 : index
    %2 = arith.index_cast %1 : i32 to index
    %c0_0 = arith.constant 0 : index
    %c0_1 = arith.constant 0 : index
    %3 = vector.load %arg2[%c0, %2, %c0_0, %c0_1] : memref<1x9x9x512xbf16, #tpu.memory_space<vmem>>, vector<1x8x8x128xbf16>
    %4 = vector.shape_cast %3 : vector<1x8x8x128xbf16> to vector<8x8x128xbf16>
    %5 = vector.shape_cast %4 : vector<8x8x128xbf16> to vector<64x128xbf16>
    %c0_2 = arith.constant 0 : index
    %c0_3 = arith.constant 0 : index
    %6 = vector.load %arg6[%c0_2, %c0_3] : memref<64x1152xbf16, #tpu.memory_space<vmem>>, vector<64x128xbf16>
    tpu.vector_store %arg6[%c0_2, %c0_3], %5 {strides = array<i32>} : memref<64x1152xbf16, #tpu.memory_space<vmem>>, vector<64x128xbf16>,
    %c0_i32_4 = arith.constant 0 : i32
    %7 = arith.addi %0, %c0_i32_4 : i32
    %c0_5 = arith.constant 0 : index
    %8 = arith.index_cast %7 : i32 to index
    %c0_6 = arith.constant 0 : index
    %c128 = arith.constant 128 : index
    %9 = vector.load %arg2[%c0_5, %8, %c0_6, %c128] : memref<1x9x9x512xbf16, #tpu.memory_space<vmem>>, vector<1x8x8x128xbf16>
    %10 = vector.shape_cast %9 : vector<1x8x8x128xbf16> to vector<8x8x128xbf16>
    %11 = vector.shape_cast %10 : vector<8x8x128xbf16> to vector<64x128xbf16>
    %c0_7 = arith.constant 0 : index
    %c128_8 = arith.constant 128 : index
    %12 = vector.load %arg6[%c0_7, %c128_8] : memref<64x1152xbf16, #tpu.memory_space<vmem>>, vector<64x128xbf16>
    tpu.vector_store %arg6[%c0_7, %c128_8], %11 {strides = array<i32>} : memref<64x1152xbf16, #tpu.memory_space<vmem>>, vector<64x128xbf16>,
    %c0_i32_9 = arith.constant 0 : i32
    %13 = arith.addi %0, %c0_i32_9 : i32
    %c0_10 = arith.constant 0 : index
    %14 = arith.index_cast %13 : i32 to index
    %c1 = arith.constant 1 : index
    %c0_11 = arith.constant 0 : index
    %15 = vector.load %arg2[%c0_10, %14, %c1, %c0_11] : memref<1x9x9x512xbf16, #tpu.memory_space<vmem>>, vector<1x8x8x128xbf16>
    %16 = vector.shape_cast %15 : vector<1x8x8x128xbf16> to vector<8x8x128xbf16>
    %17 = vector.shape_cast %16 : vector<8x8x128xbf16> to vector<64x128xbf16>
    %c0_12 = arith.constant 0 : index
    %c256 = arith.constant 256 : index
    %18 = vector.load %arg6[%c0_12, %c256] : memref<64x1152xbf16, #tpu.memory_space<vmem>>, vector<64x128xbf16>
    tpu.vector_store %arg6[%c0_12, %c256], %17 {strides = array<i32>} : memref<64x1152xbf16, #tpu.memory_space<vmem>>, vector<64x128xbf16>,
    %c0_i32_13 = arith.constant 0 : i32
    %19 = arith.addi %0, %c0_i32_13 : i32
    %c0_14 = arith.constant 0 : index
    %20 = arith.index_cast %19 : i32 to index
    %c0_15 = arith.constant 0 : index
    %c256_16 = arith.constant 256 : index
    %21 = vector.load %arg2[%c0_14, %20, %c0_15, %c256_16] : memref<1x9x9x512xbf16, #tpu.memory_space<vmem>>, vector<1x8x8x128xbf16>
    %22 = vector.shape_cast %21 : vector<1x8x8x128xbf16> to vector<8x8x128xbf16>
    %23 = vector.shape_cast %22 : vector<8x8x128xbf16> to vector<64x128xbf16>
    %c0_17 = arith.constant 0 : index
    %c384 = arith.constant 384 : index
    %24 = vector.load %arg6[%c0_17, %c384] : memref<64x1152xbf16, #tpu.memory_space<vmem>>, vector<64x128xbf16>
    tpu.vector_store %arg6[%c0_17, %c384], %23 {strides = array<i32>} : memref<64x1152xbf16, #tpu.memory_space<vmem>>, vector<64x128xbf16>,
    %c0_i32_18 = arith.constant 0 : i32
    %25 = arith.addi %0, %c0_i32_18 : i32
    %c0_19 = arith.constant 0 : index
    %26 = arith.index_cast %25 : i32 to index
    %c0_20 = arith.constant 0 : index
    %c384_21 = arith.constant 384 : index
    %27 = vector.load %arg2[%c0_19, %26, %c0_20, %c384_21] : memref<1x9x9x512xbf16, #tpu.memory_space<vmem>>, vector<1x8x8x128xbf16>
    %28 = vector.shape_cast %27 : vector<1x8x8x128xbf16> to vector<8x8x128xbf16>
    %29 = vector.shape_cast %28 : vector<8x8x128xbf16> to vector<64x128xbf16>
    %c0_22 = arith.constant 0 : index
    %c512 = arith.constant 512 : index
    %30 = vector.load %arg6[%c0_22, %c512] : memref<64x1152xbf16, #tpu.memory_space<vmem>>, vector<64x128xbf16>
    tpu.vector_store %arg6[%c0_22, %c512], %29 {strides = array<i32>} : memref<64x1152xbf16, #tpu.memory_space<vmem>>, vector<64x128xbf16>,
    %c0_i32_23 = arith.constant 0 : i32
    %31 = arith.addi %0, %c0_i32_23 : i32
    %c0_24 = arith.constant 0 : index
    %32 = arith.index_cast %31 : i32 to index
    %c1_25 = arith.constant 1 : index
    %c256_26 = arith.constant 256 : index
    %33 = vector.load %arg2[%c0_24, %32, %c1_25, %c256_26] : memref<1x9x9x512xbf16, #tpu.memory_space<vmem>>, vector<1x8x8x128xbf16>
    %34 = vector.shape_cast %33 : vector<1x8x8x128xbf16> to vector<8x8x128xbf16>
    %35 = vector.shape_cast %34 : vector<8x8x128xbf16> to vector<64x128xbf16>
    %c0_27 = arith.constant 0 : index
    %c640 = arith.constant 640 : index
    %36 = vector.load %arg6[%c0_27, %c640] : memref<64x1152xbf16, #tpu.memory_space<vmem>>, vector<64x128xbf16>
    tpu.vector_store %arg6[%c0_27, %c640], %35 {strides = array<i32>} : memref<64x1152xbf16, #tpu.memory_space<vmem>>, vector<64x128xbf16>,
    %c1_i32 = arith.constant 1 : i32
    %37 = arith.addi %0, %c1_i32 : i32
    %c0_28 = arith.constant 0 : index
    %38 = arith.index_cast %37 : i32 to index
    %c0_29 = arith.constant 0 : index
    %c0_30 = arith.constant 0 : index
    %39 = vector.load %arg2[%c0_28, %38, %c0_29, %c0_30] : memref<1x9x9x512xbf16, #tpu.memory_space<vmem>>, vector<1x8x8x128xbf16>
    %40 = vector.shape_cast %39 : vector<1x8x8x128xbf16> to vector<8x8x128xbf16>
    %41 = vector.shape_cast %40 : vector<8x8x128xbf16> to vector<64x128xbf16>
    %c0_31 = arith.constant 0 : index
    %c768 = arith.constant 768 : index
    %42 = vector.load %arg6[%c0_31, %c768] : memref<64x1152xbf16, #tpu.memory_space<vmem>>, vector<64x128xbf16>
    tpu.vector_store %arg6[%c0_31, %c768], %41 {strides = array<i32>} : memref<64x1152xbf16, #tpu.memory_space<vmem>>, vector<64x128xbf16>,
    %c1_i32_32 = arith.constant 1 : i32
    %43 = arith.addi %0, %c1_i32_32 : i32
    %c0_33 = arith.constant 0 : index
    %44 = arith.index_cast %43 : i32 to index
    %c0_34 = arith.constant 0 : index
    %c128_35 = arith.constant 128 : index
    %45 = vector.load %arg2[%c0_33, %44, %c0_34, %c128_35] : memref<1x9x9x512xbf16, #tpu.memory_space<vmem>>, vector<1x8x8x128xbf16>
    %46 = vector.shape_cast %45 : vector<1x8x8x128xbf16> to vector<8x8x128xbf16>
    %47 = vector.shape_cast %46 : vector<8x8x128xbf16> to vector<64x128xbf16>
    %c0_36 = arith.constant 0 : index
    %c896 = arith.constant 896 : index
    %48 = vector.load %arg6[%c0_36, %c896] : memref<64x1152xbf16, #tpu.memory_space<vmem>>, vector<64x128xbf16>
    tpu.vector_store %arg6[%c0_36, %c896], %47 {strides = array<i32>} : memref<64x1152xbf16, #tpu.memory_space<vmem>>, vector<64x128xbf16>,
    %c1_i32_37 = arith.constant 1 : i32
    %49 = arith.addi %0, %c1_i32_37 : i32
    %c0_38 = arith.constant 0 : index
    %50 = arith.index_cast %49 : i32 to index
    %c1_39 = arith.constant 1 : index
    %c0_40 = arith.constant 0 : index
    %51 = vector.load %arg2[%c0_38, %50, %c1_39, %c0_40] : memref<1x9x9x512xbf16, #tpu.memory_space<vmem>>, vector<1x8x8x128xbf16>
    %52 = vector.shape_cast %51 : vector<1x8x8x128xbf16> to vector<8x8x128xbf16>
    %53 = vector.shape_cast %52 : vector<8x8x128xbf16> to vector<64x128xbf16>
    %c0_41 = arith.constant 0 : index
    %c1024 = arith.constant 1024 : index
    %54 = vector.load %arg6[%c0_41, %c1024] : memref<64x1152xbf16, #tpu.memory_space<vmem>>, vector<64x128xbf16>
    tpu.vector_store %arg6[%c0_41, %c1024], %53 {strides = array<i32>} : memref<64x1152xbf16, #tpu.memory_space<vmem>>, vector<64x128xbf16>,
    %c0_42 = arith.constant 0 : index
    %c0_43 = arith.constant 0 : index
    %55 = vector.load %arg6[%c0_42, %c0_43] : memref<64x1152xbf16, #tpu.memory_space<vmem>>, vector<64x1152xbf16>
    %c0_44 = arith.constant 0 : index
    %c0_45 = arith.constant 0 : index
    %56 = vector.load %arg3[%c0_44, %c0_45] : memref<1152x128xbf16, #tpu.memory_space<vmem>>, vector<1152x128xbf16>
    %cst = arith.constant dense<0.000000e+00> : vector<64x128xf32>
    %57 = tpu.matmul %55, %56, %cst {dimension_numbers = #tpu.dot_dimension_numbers<[1], [0], [0], [1], [0, 0, 1, 1], [], []>} : vector<64x1152xbf16>, vector<1152x128xbf16>, vector<64x128xf32> -> vector<64x128xf32>
    %c0_46 = arith.constant 0 : index
    %c0_47 = arith.constant 0 : index
    %58 = vector.load %arg4[%c0_46, %c0_47] : memref<1x128xf32, #tpu.memory_space<vmem>>, vector<1x128xf32>
    %59 = vector.broadcast %58 : vector<1x128xf32> to vector<64x128xf32>
    %60 = arith.addf %57, %59 : vector<64x128xf32>
    %61 = arith.negf %60 : vector<64x128xf32>
    %62 = math.exp %61 : vector<64x128xf32>
    %cst_48 = arith.constant 1.000000e+00 : f32
    %63 = vector.broadcast %cst_48 : f32 to vector<64x128xf32>
    %64 = arith.addf %63, %62 : vector<64x128xf32>
    %65 = arith.divf %63, %64 : vector<64x128xf32>
    %66 = arith.mulf %60, %65 : vector<64x128xf32>
    %67 = arith.truncf %66 : vector<64x128xf32> to vector<64x128xbf16>
    %68 = vector.shape_cast %67 : vector<64x128xbf16> to vector<8x8x128xbf16>
    %c0_49 = arith.constant 0 : index
    %c0_50 = arith.constant 0 : index
    %c0_51 = arith.constant 0 : index
    %c0_52 = arith.constant 0 : index
    %69 = vector.load %arg5[%c0_49, %c0_50, %c0_51, %c0_52] : memref<1x8x8x128xbf16, #tpu.memory_space<vmem>>, vector<1x8x8x128xbf16>
    %70 = vector.shape_cast %69 : vector<1x8x8x128xbf16> to vector<8x8x128xbf16>
    %71 = vector.shape_cast %68 : vector<8x8x128xbf16> to vector<1x8x8x128xbf16>
    tpu.vector_store %arg5[%c0_49, %c0_50, %c0_51, %c0_52], %71 {strides = array<i32>} : memref<1x8x8x128xbf16, #tpu.memory_space<vmem>>, vector<1x8x8x128xbf16>,
    return
  }
  func.func @transform_0(%arg0: i32, %arg1: i32) -> (i32, i32, i32, i32) {
    %c0_i32 = arith.constant 0 : i32
    %c0_i32_0 = arith.constant 0 : i32
    %c0_i32_1 = arith.constant 0 : i32
    %c0_i32_2 = arith.constant 0 : i32
    return %arg0, %c0_i32, %c0_i32_0, %c0_i32_1 : i32, i32, i32, i32
  }
  func.func @transform_1(%arg0: i32, %arg1: i32) -> (i32, i32) {
    %c0_i32 = arith.constant 0 : i32
    %c0_i32_0 = arith.constant 0 : i32
    %c0_i32_1 = arith.constant 0 : i32
    return %c0_i32, %c0_i32_0 : i32, i32
  }
  func.func @transform_2(%arg0: i32, %arg1: i32) -> (i32, i32) {
    %c0_i32 = arith.constant 0 : i32
    %c0_i32_0 = arith.constant 0 : i32
    %c0_i32_1 = arith.constant 0 : i32
    return %c0_i32, %c0_i32_0 : i32, i32
  }
  func.func @transform_3(%arg0: i32, %arg1: i32) -> (i32, i32, i32, i32) {
    %c0_i32 = arith.constant 0 : i32
    %c0_i32_0 = arith.constant 0 : i32
    %c0_i32_1 = arith.constant 0 : i32
    return %arg0, %arg1, %c0_i32, %c0_i32_0 : i32, i32, i32, i32
  }
}

module attributes {stable_mosaic.version = 11 : i64} {
  func.func @_conv3x3_s2_kernel(%arg0: i32, %arg1: i32, %arg2: memref<1x5x5x512xbf16, #tpu.memory_space<vmem>>, %arg3: memref<1152x128xbf16, #tpu.memory_space<vmem>>, %arg4: memref<1x128xf32, #tpu.memory_space<vmem>>, %arg5: memref<1x4x4x128xbf16, #tpu.memory_space<vmem>>, %arg6: memref<16x1152xbf16, #tpu.memory_space<vmem>>) attributes {dimension_semantics = [#tpu.dimension_semantics<parallel>, #tpu.dimension_semantics<arbitrary>], iteration_bounds = array<i64: 2, 1>, scalar_prefetch = 0 : i64, scratch_operands = 1 : i64, tpu.core_type = #tpu.core_type<tc>, window_params = [{transform_indices = @transform_0, window_bounds = array<i64: 1, 5, 5, 512>}, {pipeline_mode = #tpu.pipeline_mode<synchronous>, transform_indices = @transform_1, window_bounds = array<i64: 1152, 128>}, {pipeline_mode = #tpu.pipeline_mode<synchronous>, transform_indices = @transform_2, window_bounds = array<i64: 1, 128>}, {transform_indices = @transform_3, window_bounds = array<i64: 1, 4, 4, 128>}]} {
    %c4_i32 = arith.constant 4 : i32
    %0 = arith.muli %arg1, %c4_i32 : i32
    %c0_i32 = arith.constant 0 : i32
    %1 = arith.addi %0, %c0_i32 : i32
    %c0 = arith.constant 0 : index
    %2 = arith.index_cast %1 : i32 to index
    %c0_0 = arith.constant 0 : index
    %c0_1 = arith.constant 0 : index
    %3 = vector.load %arg2[%c0, %2, %c0_0, %c0_1] : memref<1x5x5x512xbf16, #tpu.memory_space<vmem>>, vector<1x4x4x128xbf16>
    %4 = vector.shape_cast %3 : vector<1x4x4x128xbf16> to vector<4x4x128xbf16>
    %5 = vector.shape_cast %4 : vector<4x4x128xbf16> to vector<16x128xbf16>
    %c0_2 = arith.constant 0 : index
    %c0_3 = arith.constant 0 : index
    %6 = vector.load %arg6[%c0_2, %c0_3] : memref<16x1152xbf16, #tpu.memory_space<vmem>>, vector<16x128xbf16>
    tpu.vector_store %arg6[%c0_2, %c0_3], %5 {strides = array<i32>} : memref<16x1152xbf16, #tpu.memory_space<vmem>>, vector<16x128xbf16>,
    %c0_i32_4 = arith.constant 0 : i32
    %7 = arith.addi %0, %c0_i32_4 : i32
    %c0_5 = arith.constant 0 : index
    %8 = arith.index_cast %7 : i32 to index
    %c0_6 = arith.constant 0 : index
    %c128 = arith.constant 128 : index
    %9 = vector.load %arg2[%c0_5, %8, %c0_6, %c128] : memref<1x5x5x512xbf16, #tpu.memory_space<vmem>>, vector<1x4x4x128xbf16>
    %10 = vector.shape_cast %9 : vector<1x4x4x128xbf16> to vector<4x4x128xbf16>
    %11 = vector.shape_cast %10 : vector<4x4x128xbf16> to vector<16x128xbf16>
    %c0_7 = arith.constant 0 : index
    %c128_8 = arith.constant 128 : index
    %12 = vector.load %arg6[%c0_7, %c128_8] : memref<16x1152xbf16, #tpu.memory_space<vmem>>, vector<16x128xbf16>
    tpu.vector_store %arg6[%c0_7, %c128_8], %11 {strides = array<i32>} : memref<16x1152xbf16, #tpu.memory_space<vmem>>, vector<16x128xbf16>,
    %c0_i32_9 = arith.constant 0 : i32
    %13 = arith.addi %0, %c0_i32_9 : i32
    %c0_10 = arith.constant 0 : index
    %14 = arith.index_cast %13 : i32 to index
    %c1 = arith.constant 1 : index
    %c0_11 = arith.constant 0 : index
    %15 = vector.load %arg2[%c0_10, %14, %c1, %c0_11] : memref<1x5x5x512xbf16, #tpu.memory_space<vmem>>, vector<1x4x4x128xbf16>
    %16 = vector.shape_cast %15 : vector<1x4x4x128xbf16> to vector<4x4x128xbf16>
    %17 = vector.shape_cast %16 : vector<4x4x128xbf16> to vector<16x128xbf16>
    %c0_12 = arith.constant 0 : index
    %c256 = arith.constant 256 : index
    %18 = vector.load %arg6[%c0_12, %c256] : memref<16x1152xbf16, #tpu.memory_space<vmem>>, vector<16x128xbf16>
    tpu.vector_store %arg6[%c0_12, %c256], %17 {strides = array<i32>} : memref<16x1152xbf16, #tpu.memory_space<vmem>>, vector<16x128xbf16>,
    %c0_i32_13 = arith.constant 0 : i32
    %19 = arith.addi %0, %c0_i32_13 : i32
    %c0_14 = arith.constant 0 : index
    %20 = arith.index_cast %19 : i32 to index
    %c0_15 = arith.constant 0 : index
    %c256_16 = arith.constant 256 : index
    %21 = vector.load %arg2[%c0_14, %20, %c0_15, %c256_16] : memref<1x5x5x512xbf16, #tpu.memory_space<vmem>>, vector<1x4x4x128xbf16>
    %22 = vector.shape_cast %21 : vector<1x4x4x128xbf16> to vector<4x4x128xbf16>
    %23 = vector.shape_cast %22 : vector<4x4x128xbf16> to vector<16x128xbf16>
    %c0_17 = arith.constant 0 : index
    %c384 = arith.constant 384 : index
    %24 = vector.load %arg6[%c0_17, %c384] : memref<16x1152xbf16, #tpu.memory_space<vmem>>, vector<16x128xbf16>
    tpu.vector_store %arg6[%c0_17, %c384], %23 {strides = array<i32>} : memref<16x1152xbf16, #tpu.memory_space<vmem>>, vector<16x128xbf16>,
    %c0_i32_18 = arith.constant 0 : i32
    %25 = arith.addi %0, %c0_i32_18 : i32
    %c0_19 = arith.constant 0 : index
    %26 = arith.index_cast %25 : i32 to index
    %c0_20 = arith.constant 0 : index
    %c384_21 = arith.constant 384 : index
    %27 = vector.load %arg2[%c0_19, %26, %c0_20, %c384_21] : memref<1x5x5x512xbf16, #tpu.memory_space<vmem>>, vector<1x4x4x128xbf16>
    %28 = vector.shape_cast %27 : vector<1x4x4x128xbf16> to vector<4x4x128xbf16>
    %29 = vector.shape_cast %28 : vector<4x4x128xbf16> to vector<16x128xbf16>
    %c0_22 = arith.constant 0 : index
    %c512 = arith.constant 512 : index
    %30 = vector.load %arg6[%c0_22, %c512] : memref<16x1152xbf16, #tpu.memory_space<vmem>>, vector<16x128xbf16>
    tpu.vector_store %arg6[%c0_22, %c512], %29 {strides = array<i32>} : memref<16x1152xbf16, #tpu.memory_space<vmem>>, vector<16x128xbf16>,
    %c0_i32_23 = arith.constant 0 : i32
    %31 = arith.addi %0, %c0_i32_23 : i32
    %c0_24 = arith.constant 0 : index
    %32 = arith.index_cast %31 : i32 to index
    %c1_25 = arith.constant 1 : index
    %c256_26 = arith.constant 256 : index
    %33 = vector.load %arg2[%c0_24, %32, %c1_25, %c256_26] : memref<1x5x5x512xbf16, #tpu.memory_space<vmem>>, vector<1x4x4x128xbf16>
    %34 = vector.shape_cast %33 : vector<1x4x4x128xbf16> to vector<4x4x128xbf16>
    %35 = vector.shape_cast %34 : vector<4x4x128xbf16> to vector<16x128xbf16>
    %c0_27 = arith.constant 0 : index
    %c640 = arith.constant 640 : index
    %36 = vector.load %arg6[%c0_27, %c640] : memref<16x1152xbf16, #tpu.memory_space<vmem>>, vector<16x128xbf16>
    tpu.vector_store %arg6[%c0_27, %c640], %35 {strides = array<i32>} : memref<16x1152xbf16, #tpu.memory_space<vmem>>, vector<16x128xbf16>,
    %c1_i32 = arith.constant 1 : i32
    %37 = arith.addi %0, %c1_i32 : i32
    %c0_28 = arith.constant 0 : index
    %38 = arith.index_cast %37 : i32 to index
    %c0_29 = arith.constant 0 : index
    %c0_30 = arith.constant 0 : index
    %39 = vector.load %arg2[%c0_28, %38, %c0_29, %c0_30] : memref<1x5x5x512xbf16, #tpu.memory_space<vmem>>, vector<1x4x4x128xbf16>
    %40 = vector.shape_cast %39 : vector<1x4x4x128xbf16> to vector<4x4x128xbf16>
    %41 = vector.shape_cast %40 : vector<4x4x128xbf16> to vector<16x128xbf16>
    %c0_31 = arith.constant 0 : index
    %c768 = arith.constant 768 : index
    %42 = vector.load %arg6[%c0_31, %c768] : memref<16x1152xbf16, #tpu.memory_space<vmem>>, vector<16x128xbf16>
    tpu.vector_store %arg6[%c0_31, %c768], %41 {strides = array<i32>} : memref<16x1152xbf16, #tpu.memory_space<vmem>>, vector<16x128xbf16>,
    %c1_i32_32 = arith.constant 1 : i32
    %43 = arith.addi %0, %c1_i32_32 : i32
    %c0_33 = arith.constant 0 : index
    %44 = arith.index_cast %43 : i32 to index
    %c0_34 = arith.constant 0 : index
    %c128_35 = arith.constant 128 : index
    %45 = vector.load %arg2[%c0_33, %44, %c0_34, %c128_35] : memref<1x5x5x512xbf16, #tpu.memory_space<vmem>>, vector<1x4x4x128xbf16>
    %46 = vector.shape_cast %45 : vector<1x4x4x128xbf16> to vector<4x4x128xbf16>
    %47 = vector.shape_cast %46 : vector<4x4x128xbf16> to vector<16x128xbf16>
    %c0_36 = arith.constant 0 : index
    %c896 = arith.constant 896 : index
    %48 = vector.load %arg6[%c0_36, %c896] : memref<16x1152xbf16, #tpu.memory_space<vmem>>, vector<16x128xbf16>
    tpu.vector_store %arg6[%c0_36, %c896], %47 {strides = array<i32>} : memref<16x1152xbf16, #tpu.memory_space<vmem>>, vector<16x128xbf16>,
    %c1_i32_37 = arith.constant 1 : i32
    %49 = arith.addi %0, %c1_i32_37 : i32
    %c0_38 = arith.constant 0 : index
    %50 = arith.index_cast %49 : i32 to index
    %c1_39 = arith.constant 1 : index
    %c0_40 = arith.constant 0 : index
    %51 = vector.load %arg2[%c0_38, %50, %c1_39, %c0_40] : memref<1x5x5x512xbf16, #tpu.memory_space<vmem>>, vector<1x4x4x128xbf16>
    %52 = vector.shape_cast %51 : vector<1x4x4x128xbf16> to vector<4x4x128xbf16>
    %53 = vector.shape_cast %52 : vector<4x4x128xbf16> to vector<16x128xbf16>
    %c0_41 = arith.constant 0 : index
    %c1024 = arith.constant 1024 : index
    %54 = vector.load %arg6[%c0_41, %c1024] : memref<16x1152xbf16, #tpu.memory_space<vmem>>, vector<16x128xbf16>
    tpu.vector_store %arg6[%c0_41, %c1024], %53 {strides = array<i32>} : memref<16x1152xbf16, #tpu.memory_space<vmem>>, vector<16x128xbf16>,
    %c0_42 = arith.constant 0 : index
    %c0_43 = arith.constant 0 : index
    %55 = vector.load %arg6[%c0_42, %c0_43] : memref<16x1152xbf16, #tpu.memory_space<vmem>>, vector<16x1152xbf16>
    %c0_44 = arith.constant 0 : index
    %c0_45 = arith.constant 0 : index
    %56 = vector.load %arg3[%c0_44, %c0_45] : memref<1152x128xbf16, #tpu.memory_space<vmem>>, vector<1152x128xbf16>
    %cst = arith.constant dense<0.000000e+00> : vector<16x128xf32>
    %57 = tpu.matmul %55, %56, %cst {dimension_numbers = #tpu.dot_dimension_numbers<[1], [0], [0], [1], [0, 0, 1, 1], [], []>} : vector<16x1152xbf16>, vector<1152x128xbf16>, vector<16x128xf32> -> vector<16x128xf32>
    %c0_46 = arith.constant 0 : index
    %c0_47 = arith.constant 0 : index
    %58 = vector.load %arg4[%c0_46, %c0_47] : memref<1x128xf32, #tpu.memory_space<vmem>>, vector<1x128xf32>
    %59 = vector.broadcast %58 : vector<1x128xf32> to vector<16x128xf32>
    %60 = arith.addf %57, %59 : vector<16x128xf32>
    %61 = arith.negf %60 : vector<16x128xf32>
    %62 = math.exp %61 : vector<16x128xf32>
    %cst_48 = arith.constant 1.000000e+00 : f32
    %63 = vector.broadcast %cst_48 : f32 to vector<16x128xf32>
    %64 = arith.addf %63, %62 : vector<16x128xf32>
    %65 = arith.divf %63, %64 : vector<16x128xf32>
    %66 = arith.mulf %60, %65 : vector<16x128xf32>
    %67 = arith.truncf %66 : vector<16x128xf32> to vector<16x128xbf16>
    %68 = vector.shape_cast %67 : vector<16x128xbf16> to vector<4x4x128xbf16>
    %c0_49 = arith.constant 0 : index
    %c0_50 = arith.constant 0 : index
    %c0_51 = arith.constant 0 : index
    %c0_52 = arith.constant 0 : index
    %69 = vector.load %arg5[%c0_49, %c0_50, %c0_51, %c0_52] : memref<1x4x4x128xbf16, #tpu.memory_space<vmem>>, vector<1x4x4x128xbf16>
    %70 = vector.shape_cast %69 : vector<1x4x4x128xbf16> to vector<4x4x128xbf16>
    %71 = vector.shape_cast %68 : vector<4x4x128xbf16> to vector<1x4x4x128xbf16>
    tpu.vector_store %arg5[%c0_49, %c0_50, %c0_51, %c0_52], %71 {strides = array<i32>} : memref<1x4x4x128xbf16, #tpu.memory_space<vmem>>, vector<1x4x4x128xbf16>,
    return
  }
  func.func @transform_0(%arg0: i32, %arg1: i32) -> (i32, i32, i32, i32) {
    %c0_i32 = arith.constant 0 : i32
    %c0_i32_0 = arith.constant 0 : i32
    %c0_i32_1 = arith.constant 0 : i32
    %c0_i32_2 = arith.constant 0 : i32
    return %arg0, %c0_i32, %c0_i32_0, %c0_i32_1 : i32, i32, i32, i32
  }
  func.func @transform_1(%arg0: i32, %arg1: i32) -> (i32, i32) {
    %c0_i32 = arith.constant 0 : i32
    %c0_i32_0 = arith.constant 0 : i32
    %c0_i32_1 = arith.constant 0 : i32
    return %c0_i32, %c0_i32_0 : i32, i32
  }
  func.func @transform_2(%arg0: i32, %arg1: i32) -> (i32, i32) {
    %c0_i32 = arith.constant 0 : i32
    %c0_i32_0 = arith.constant 0 : i32
    %c0_i32_1 = arith.constant 0 : i32
    return %c0_i32, %c0_i32_0 : i32, i32
  }
  func.func @transform_3(%arg0: i32, %arg1: i32) -> (i32, i32, i32, i32) {
    %c0_i32 = arith.constant 0 : i32
    %c0_i32_0 = arith.constant 0 : i32
    %c0_i32_1 = arith.constant 0 : i32
    return %arg0, %arg1, %c0_i32, %c0_i32_0 : i32, i32, i32, i32
  }
}

module attributes {stable_mosaic.version = 11 : i64} {
  func.func @_bottleneck_kernel(%arg0: i32, %arg1: i32, %arg2: memref<1x6x6x128xbf16, #tpu.memory_space<vmem>>, %arg3: memref<128x128xbf16, #tpu.memory_space<vmem>>, %arg4: memref<1x128xf32, #tpu.memory_space<vmem>>, %arg5: memref<1152x128xbf16, #tpu.memory_space<vmem>>, %arg6: memref<1x128xf32, #tpu.memory_space<vmem>>, %arg7: memref<1x4x4x128xbf16, #tpu.memory_space<vmem>>, %arg8: memref<6x6x128xbf16, #tpu.memory_space<vmem>>, %arg9: memref<16x1152xbf16, #tpu.memory_space<vmem>>) attributes {dimension_semantics = [#tpu.dimension_semantics<parallel>, #tpu.dimension_semantics<arbitrary>], iteration_bounds = array<i64: 2, 1>, scalar_prefetch = 0 : i64, scratch_operands = 2 : i64, tpu.core_type = #tpu.core_type<tc>, window_params = [{transform_indices = @transform_0, window_bounds = array<i64: 1, 6, 6, 128>}, {pipeline_mode = #tpu.pipeline_mode<synchronous>, transform_indices = @transform_1, window_bounds = array<i64: 128, 128>}, {pipeline_mode = #tpu.pipeline_mode<synchronous>, transform_indices = @transform_2, window_bounds = array<i64: 1, 128>}, {pipeline_mode = #tpu.pipeline_mode<synchronous>, transform_indices = @transform_3, window_bounds = array<i64: 1152, 128>}, {pipeline_mode = #tpu.pipeline_mode<synchronous>, transform_indices = @transform_4, window_bounds = array<i64: 1, 128>}, {transform_indices = @transform_5, window_bounds = array<i64: 1, 4, 4, 128>}]} {
    %c4_i32 = arith.constant 4 : i32
    %0 = arith.muli %arg1, %c4_i32 : i32
    %c0 = arith.constant 0 : index
    %1 = arith.index_cast %0 : i32 to index
    %c1 = arith.constant 1 : index
    %c0_0 = arith.constant 0 : index
    %2 = vector.load %arg2[%c0, %1, %c1, %c0_0] : memref<1x6x6x128xbf16, #tpu.memory_space<vmem>>, vector<1x6x4x128xbf16>
    %3 = vector.shape_cast %2 : vector<1x6x4x128xbf16> to vector<6x4x128xbf16>
    %4 = vector.shape_cast %3 : vector<6x4x128xbf16> to vector<24x128xbf16>
    %c0_1 = arith.constant 0 : index
    %c0_2 = arith.constant 0 : index
    %5 = vector.load %arg3[%c0_1, %c0_2] : memref<128x128xbf16, #tpu.memory_space<vmem>>, vector<128x128xbf16>
    %cst = arith.constant dense<0.000000e+00> : vector<24x128xf32>
    %6 = tpu.matmul %4, %5, %cst {dimension_numbers = #tpu.dot_dimension_numbers<[1], [0], [0], [1], [0, 0, 1, 1], [], []>} : vector<24x128xbf16>, vector<128x128xbf16>, vector<24x128xf32> -> vector<24x128xf32>
    %c0_3 = arith.constant 0 : index
    %c0_4 = arith.constant 0 : index
    %7 = vector.load %arg4[%c0_3, %c0_4] : memref<1x128xf32, #tpu.memory_space<vmem>>, vector<1x128xf32>
    %8 = vector.broadcast %7 : vector<1x128xf32> to vector<24x128xf32>
    %9 = arith.addf %6, %8 : vector<24x128xf32>
    %10 = arith.negf %9 : vector<24x128xf32>
    %11 = math.exp %10 : vector<24x128xf32>
    %cst_5 = arith.constant 1.000000e+00 : f32
    %12 = vector.broadcast %cst_5 : f32 to vector<24x128xf32>
    %13 = arith.addf %12, %11 : vector<24x128xf32>
    %14 = arith.divf %12, %13 : vector<24x128xf32>
    %15 = arith.mulf %9, %14 : vector<24x128xf32>
    %cst_6 = arith.constant 0.000000e+00 : bf16
    %16 = vector.broadcast %cst_6 : bf16 to vector<6x1x128xbf16>
    %c0_7 = arith.constant 0 : index
    %c0_8 = arith.constant 0 : index
    %c0_9 = arith.constant 0 : index
    %17 = vector.load %arg8[%c0_7, %c0_8, %c0_9] : memref<6x6x128xbf16, #tpu.memory_space<vmem>>, vector<6x1x128xbf16>
    tpu.vector_store %arg8[%c0_7, %c0_8, %c0_9], %16 {strides = array<i32>} : memref<6x6x128xbf16, #tpu.memory_space<vmem>>, vector<6x1x128xbf16>,
    %c0_10 = arith.constant 0 : index
    %c5 = arith.constant 5 : index
    %c0_11 = arith.constant 0 : index
    %18 = vector.load %arg8[%c0_10, %c5, %c0_11] : memref<6x6x128xbf16, #tpu.memory_space<vmem>>, vector<6x1x128xbf16>
    tpu.vector_store %arg8[%c0_10, %c5, %c0_11], %16 {strides = array<i32>} : memref<6x6x128xbf16, #tpu.memory_space<vmem>>, vector<6x1x128xbf16>,
    %19 = arith.truncf %15 : vector<24x128xf32> to vector<24x128xbf16>
    %20 = vector.shape_cast %19 : vector<24x128xbf16> to vector<6x4x128xbf16>
    %c0_12 = arith.constant 0 : index
    %c1_13 = arith.constant 1 : index
    %c0_14 = arith.constant 0 : index
    %21 = vector.load %arg8[%c0_12, %c1_13, %c0_14] : memref<6x6x128xbf16, #tpu.memory_space<vmem>>, vector<6x4x128xbf16>
    tpu.vector_store %arg8[%c0_12, %c1_13, %c0_14], %20 {strides = array<i32>} : memref<6x6x128xbf16, #tpu.memory_space<vmem>>, vector<6x4x128xbf16>,
    %c0_i32 = arith.constant 0 : i32
    %22 = arith.cmpi eq, %arg1, %c0_i32 : i32
    %23 = arith.extui %22 : i1 to i32
    %c0_i32_15 = arith.constant 0 : i32
    %24 = arith.cmpi ne, %23, %c0_i32_15 : i32
    scf.if %24 {
      %cst_69 = arith.constant 0.000000e+00 : bf16
      %79 = vector.broadcast %cst_69 : bf16 to vector<1x6x128xbf16>
      %c0_70 = arith.constant 0 : index
      %c0_71 = arith.constant 0 : index
      %c0_72 = arith.constant 0 : index
      %80 = vector.load %arg8[%c0_70, %c0_71, %c0_72] : memref<6x6x128xbf16, #tpu.memory_space<vmem>>, vector<1x6x128xbf16>
      tpu.vector_store %arg8[%c0_70, %c0_71, %c0_72], %79 {strides = array<i32>} : memref<6x6x128xbf16, #tpu.memory_space<vmem>>, vector<1x6x128xbf16>,
    } else {
    }
    %c0_i32_16 = arith.constant 0 : i32
    %25 = arith.cmpi eq, %arg1, %c0_i32_16 : i32
    %26 = arith.extui %25 : i1 to i32
    %c0_i32_17 = arith.constant 0 : i32
    %27 = arith.cmpi ne, %26, %c0_i32_17 : i32
    scf.if %27 {
      %cst_69 = arith.constant 0.000000e+00 : bf16
      %79 = vector.broadcast %cst_69 : bf16 to vector<1x6x128xbf16>
      %c5_70 = arith.constant 5 : index
      %c0_71 = arith.constant 0 : index
      %c0_72 = arith.constant 0 : index
      %80 = vector.load %arg8[%c5_70, %c0_71, %c0_72] : memref<6x6x128xbf16, #tpu.memory_space<vmem>>, vector<1x6x128xbf16>
      tpu.vector_store %arg8[%c5_70, %c0_71, %c0_72], %79 {strides = array<i32>} : memref<6x6x128xbf16, #tpu.memory_space<vmem>>, vector<1x6x128xbf16>,
    } else {
    }
    %c0_18 = arith.constant 0 : index
    %c0_19 = arith.constant 0 : index
    %c0_20 = arith.constant 0 : index
    %28 = vector.load %arg8[%c0_18, %c0_19, %c0_20] : memref<6x6x128xbf16, #tpu.memory_space<vmem>>, vector<4x4x128xbf16>
    %29 = vector.shape_cast %28 : vector<4x4x128xbf16> to vector<16x128xbf16>
    %c0_21 = arith.constant 0 : index
    %c0_22 = arith.constant 0 : index
    %30 = vector.load %arg9[%c0_21, %c0_22] : memref<16x1152xbf16, #tpu.memory_space<vmem>>, vector<16x128xbf16>
    tpu.vector_store %arg9[%c0_21, %c0_22], %29 {strides = array<i32>} : memref<16x1152xbf16, #tpu.memory_space<vmem>>, vector<16x128xbf16>,
    %c0_23 = arith.constant 0 : index
    %c1_24 = arith.constant 1 : index
    %c0_25 = arith.constant 0 : index
    %31 = vector.load %arg8[%c0_23, %c1_24, %c0_25] : memref<6x6x128xbf16, #tpu.memory_space<vmem>>, vector<4x4x128xbf16>
    %32 = vector.shape_cast %31 : vector<4x4x128xbf16> to vector<16x128xbf16>
    %c0_26 = arith.constant 0 : index
    %c128 = arith.constant 128 : index
    %33 = vector.load %arg9[%c0_26, %c128] : memref<16x1152xbf16, #tpu.memory_space<vmem>>, vector<16x128xbf16>
    tpu.vector_store %arg9[%c0_26, %c128], %32 {strides = array<i32>} : memref<16x1152xbf16, #tpu.memory_space<vmem>>, vector<16x128xbf16>,
    %c0_27 = arith.constant 0 : index
    %c2 = arith.constant 2 : index
    %c0_28 = arith.constant 0 : index
    %34 = vector.load %arg8[%c0_27, %c2, %c0_28] : memref<6x6x128xbf16, #tpu.memory_space<vmem>>, vector<4x4x128xbf16>
    %35 = vector.shape_cast %34 : vector<4x4x128xbf16> to vector<16x128xbf16>
    %c0_29 = arith.constant 0 : index
    %c256 = arith.constant 256 : index
    %36 = vector.load %arg9[%c0_29, %c256] : memref<16x1152xbf16, #tpu.memory_space<vmem>>, vector<16x128xbf16>
    tpu.vector_store %arg9[%c0_29, %c256], %35 {strides = array<i32>} : memref<16x1152xbf16, #tpu.memory_space<vmem>>, vector<16x128xbf16>,
    %c1_30 = arith.constant 1 : index
    %c0_31 = arith.constant 0 : index
    %c0_32 = arith.constant 0 : index
    %37 = vector.load %arg8[%c1_30, %c0_31, %c0_32] : memref<6x6x128xbf16, #tpu.memory_space<vmem>>, vector<4x4x128xbf16>
    %38 = vector.shape_cast %37 : vector<4x4x128xbf16> to vector<16x128xbf16>
    %c0_33 = arith.constant 0 : index
    %c384 = arith.constant 384 : index
    %39 = vector.load %arg9[%c0_33, %c384] : memref<16x1152xbf16, #tpu.memory_space<vmem>>, vector<16x128xbf16>
    tpu.vector_store %arg9[%c0_33, %c384], %38 {strides = array<i32>} : memref<16x1152xbf16, #tpu.memory_space<vmem>>, vector<16x128xbf16>,
    %c1_34 = arith.constant 1 : index
    %c1_35 = arith.constant 1 : index
    %c0_36 = arith.constant 0 : index
    %40 = vector.load %arg8[%c1_34, %c1_35, %c0_36] : memref<6x6x128xbf16, #tpu.memory_space<vmem>>, vector<4x4x128xbf16>
    %41 = vector.shape_cast %40 : vector<4x4x128xbf16> to vector<16x128xbf16>
    %c0_37 = arith.constant 0 : index
    %c512 = arith.constant 512 : index
    %42 = vector.load %arg9[%c0_37, %c512] : memref<16x1152xbf16, #tpu.memory_space<vmem>>, vector<16x128xbf16>
    tpu.vector_store %arg9[%c0_37, %c512], %41 {strides = array<i32>} : memref<16x1152xbf16, #tpu.memory_space<vmem>>, vector<16x128xbf16>,
    %c1_38 = arith.constant 1 : index
    %c2_39 = arith.constant 2 : index
    %c0_40 = arith.constant 0 : index
    %43 = vector.load %arg8[%c1_38, %c2_39, %c0_40] : memref<6x6x128xbf16, #tpu.memory_space<vmem>>, vector<4x4x128xbf16>
    %44 = vector.shape_cast %43 : vector<4x4x128xbf16> to vector<16x128xbf16>
    %c0_41 = arith.constant 0 : index
    %c640 = arith.constant 640 : index
    %45 = vector.load %arg9[%c0_41, %c640] : memref<16x1152xbf16, #tpu.memory_space<vmem>>, vector<16x128xbf16>
    tpu.vector_store %arg9[%c0_41, %c640], %44 {strides = array<i32>} : memref<16x1152xbf16, #tpu.memory_space<vmem>>, vector<16x128xbf16>,
    %c2_42 = arith.constant 2 : index
    %c0_43 = arith.constant 0 : index
    %c0_44 = arith.constant 0 : index
    %46 = vector.load %arg8[%c2_42, %c0_43, %c0_44] : memref<6x6x128xbf16, #tpu.memory_space<vmem>>, vector<4x4x128xbf16>
    %47 = vector.shape_cast %46 : vector<4x4x128xbf16> to vector<16x128xbf16>
    %c0_45 = arith.constant 0 : index
    %c768 = arith.constant 768 : index
    %48 = vector.load %arg9[%c0_45, %c768] : memref<16x1152xbf16, #tpu.memory_space<vmem>>, vector<16x128xbf16>
    tpu.vector_store %arg9[%c0_45, %c768], %47 {strides = array<i32>} : memref<16x1152xbf16, #tpu.memory_space<vmem>>, vector<16x128xbf16>,
    %c2_46 = arith.constant 2 : index
    %c1_47 = arith.constant 1 : index
    %c0_48 = arith.constant 0 : index
    %49 = vector.load %arg8[%c2_46, %c1_47, %c0_48] : memref<6x6x128xbf16, #tpu.memory_space<vmem>>, vector<4x4x128xbf16>
    %50 = vector.shape_cast %49 : vector<4x4x128xbf16> to vector<16x128xbf16>
    %c0_49 = arith.constant 0 : index
    %c896 = arith.constant 896 : index
    %51 = vector.load %arg9[%c0_49, %c896] : memref<16x1152xbf16, #tpu.memory_space<vmem>>, vector<16x128xbf16>
    tpu.vector_store %arg9[%c0_49, %c896], %50 {strides = array<i32>} : memref<16x1152xbf16, #tpu.memory_space<vmem>>, vector<16x128xbf16>,
    %c2_50 = arith.constant 2 : index
    %c2_51 = arith.constant 2 : index
    %c0_52 = arith.constant 0 : index
    %52 = vector.load %arg8[%c2_50, %c2_51, %c0_52] : memref<6x6x128xbf16, #tpu.memory_space<vmem>>, vector<4x4x128xbf16>
    %53 = vector.shape_cast %52 : vector<4x4x128xbf16> to vector<16x128xbf16>
    %c0_53 = arith.constant 0 : index
    %c1024 = arith.constant 1024 : index
    %54 = vector.load %arg9[%c0_53, %c1024] : memref<16x1152xbf16, #tpu.memory_space<vmem>>, vector<16x128xbf16>
    tpu.vector_store %arg9[%c0_53, %c1024], %53 {strides = array<i32>} : memref<16x1152xbf16, #tpu.memory_space<vmem>>, vector<16x128xbf16>,
    %c0_54 = arith.constant 0 : index
    %c0_55 = arith.constant 0 : index
    %55 = vector.load %arg9[%c0_54, %c0_55] : memref<16x1152xbf16, #tpu.memory_space<vmem>>, vector<16x1152xbf16>
    %c0_56 = arith.constant 0 : index
    %c0_57 = arith.constant 0 : index
    %56 = vector.load %arg5[%c0_56, %c0_57] : memref<1152x128xbf16, #tpu.memory_space<vmem>>, vector<1152x128xbf16>
    %cst_58 = arith.constant dense<0.000000e+00> : vector<16x128xf32>
    %57 = tpu.matmul %55, %56, %cst_58 {dimension_numbers = #tpu.dot_dimension_numbers<[1], [0], [0], [1], [0, 0, 1, 1], [], []>} : vector<16x1152xbf16>, vector<1152x128xbf16>, vector<16x128xf32> -> vector<16x128xf32>
    %c0_59 = arith.constant 0 : index
    %c0_60 = arith.constant 0 : index
    %58 = vector.load %arg6[%c0_59, %c0_60] : memref<1x128xf32, #tpu.memory_space<vmem>>, vector<1x128xf32>
    %59 = vector.broadcast %58 : vector<1x128xf32> to vector<16x128xf32>
    %60 = arith.addf %57, %59 : vector<16x128xf32>
    %61 = arith.negf %60 : vector<16x128xf32>
    %62 = math.exp %61 : vector<16x128xf32>
    %cst_61 = arith.constant 1.000000e+00 : f32
    %63 = vector.broadcast %cst_61 : f32 to vector<16x128xf32>
    %64 = arith.addf %63, %62 : vector<16x128xf32>
    %65 = arith.divf %63, %64 : vector<16x128xf32>
    %66 = arith.mulf %60, %65 : vector<16x128xf32>
    %c1_i32 = arith.constant 1 : i32
    %67 = arith.addi %0, %c1_i32 : i32
    %c0_62 = arith.constant 0 : index
    %68 = arith.index_cast %67 : i32 to index
    %c1_63 = arith.constant 1 : index
    %c0_64 = arith.constant 0 : index
    %69 = vector.load %arg2[%c0_62, %68, %c1_63, %c0_64] : memref<1x6x6x128xbf16, #tpu.memory_space<vmem>>, vector<1x4x4x128xbf16>
    %70 = vector.shape_cast %69 : vector<1x4x4x128xbf16> to vector<4x4x128xbf16>
    %71 = arith.extf %70 : vector<4x4x128xbf16> to vector<4x4x128xf32>
    %72 = vector.shape_cast %71 : vector<4x4x128xf32> to vector<16x128xf32>
    %73 = arith.addf %66, %72 : vector<16x128xf32>
    %74 = arith.truncf %73 : vector<16x128xf32> to vector<16x128xbf16>
    %75 = vector.shape_cast %74 : vector<16x128xbf16> to vector<4x4x128xbf16>
    %c0_65 = arith.constant 0 : index
    %c0_66 = arith.constant 0 : index
    %c0_67 = arith.constant 0 : index
    %c0_68 = arith.constant 0 : index
    %76 = vector.load %arg7[%c0_65, %c0_66, %c0_67, %c0_68] : memref<1x4x4x128xbf16, #tpu.memory_space<vmem>>, vector<1x4x4x128xbf16>
    %77 = vector.shape_cast %76 : vector<1x4x4x128xbf16> to vector<4x4x128xbf16>
    %78 = vector.shape_cast %75 : vector<4x4x128xbf16> to vector<1x4x4x128xbf16>
    tpu.vector_store %arg7[%c0_65, %c0_66, %c0_67, %c0_68], %78 {strides = array<i32>} : memref<1x4x4x128xbf16, #tpu.memory_space<vmem>>, vector<1x4x4x128xbf16>,
    return
  }
  func.func @transform_0(%arg0: i32, %arg1: i32) -> (i32, i32, i32, i32) {
    %c0_i32 = arith.constant 0 : i32
    %c0_i32_0 = arith.constant 0 : i32
    %c0_i32_1 = arith.constant 0 : i32
    %c0_i32_2 = arith.constant 0 : i32
    return %arg0, %c0_i32, %c0_i32_0, %c0_i32_1 : i32, i32, i32, i32
  }
  func.func @transform_1(%arg0: i32, %arg1: i32) -> (i32, i32) {
    %c0_i32 = arith.constant 0 : i32
    %c0_i32_0 = arith.constant 0 : i32
    %c0_i32_1 = arith.constant 0 : i32
    return %c0_i32, %c0_i32_0 : i32, i32
  }
  func.func @transform_2(%arg0: i32, %arg1: i32) -> (i32, i32) {
    %c0_i32 = arith.constant 0 : i32
    %c0_i32_0 = arith.constant 0 : i32
    %c0_i32_1 = arith.constant 0 : i32
    return %c0_i32, %c0_i32_0 : i32, i32
  }
  func.func @transform_3(%arg0: i32, %arg1: i32) -> (i32, i32) {
    %c0_i32 = arith.constant 0 : i32
    %c0_i32_0 = arith.constant 0 : i32
    %c0_i32_1 = arith.constant 0 : i32
    return %c0_i32, %c0_i32_0 : i32, i32
  }
  func.func @transform_4(%arg0: i32, %arg1: i32) -> (i32, i32) {
    %c0_i32 = arith.constant 0 : i32
    %c0_i32_0 = arith.constant 0 : i32
    %c0_i32_1 = arith.constant 0 : i32
    return %c0_i32, %c0_i32_0 : i32, i32
  }
  func.func @transform_5(%arg0: i32, %arg1: i32) -> (i32, i32, i32, i32) {
    %c0_i32 = arith.constant 0 : i32
    %c0_i32_0 = arith.constant 0 : i32
    %c0_i32_1 = arith.constant 0 : i32
    return %arg0, %arg1, %c0_i32, %c0_i32_0 : i32, i32, i32, i32
  }
}

</mosaic_0001>

<bundles_post_ra>
// kernel: yolo_feature_extractor.4
= control target key start
LH: loop header
LB: loop body
LE: loop exit
PB: predicated region body
PF: predicated region fallthrough
CT: control target
= control target key end

     0   :  { %8 = vsyncpa [#allocation4], 0  ;;  %s2709_s0 = inlined_call_operand.hbm [shape: bf16[2,5,5,512], index: 0, kind: input, shape index: {}]   ;;  %s2710_s1 = inlined_call_operand.hbm [shape: bf16[1152,128], index: 1, kind: input, shape index: {}]   ;;  %s2711_s2 = inlined_call_operand.hbm [shape: f32[1,128], index: 2, kind: input, shape index: {}]   ;;  %s2712_s3 = inlined_call_operand.hbm [shape: bf16[2,4,4,128], index: 3, kind: output, shape index: {}]  }
   0x1   :  { %10 = vsyncpa [#allocation4 + $0x1], 0 }
   0x2   :  { %11 = vsyncpa [#allocation7], 0 }
   0x3   :  { %12 = vsyncpa [#allocation5], 0 }
   0x4   :  { %14 = vsyncpa [#allocation5 + $0x1], 0  ;;  %s2347_s12 = smov 0   ;;  %s2349_s13 = smov 0  }
   0x5   :  { %s2351_s14 = smov 0   ;;  %s2353_s15 = smov 0  }
   0x6   :  { %s2355_s16 = smov 0   ;;  %s2357_s17 = smov 0  }
   0x7 LB: > { %s1717_s18 = sadd.s32 4294967295, %s2312_s17   ;;  %s1718_s19 = sadd.s32 4294967294, %s2312_s17   ;;  %s2312_s17 = sphi %s2357_s17, %s20_s17   ;;  %s2308_s16 = sphi %s2355_s16, %s2740_s16   ;;  %s2304_s15 = sphi %s2353_s15, %s2739_s15   ;;  %s2300_s14 = sphi %s2351_s14, %s2738_s14   ;;  %s2296_s13 = sphi %s2349_s13, %s2737_s13   ;;  %s2292_s12 = sphi %s2347_s12, %s2736_s12  }
   0x8   : > { %p52_p0 = scmp.ne.s32.totalorder %s2296_s13, %s2292_s12  ;;  %p2381_p1 = scmp.eq.s32.totalorder %s1717_s18, 0 }
   0x9   : > { %p2385_p2 = scmp.eq.s32.totalorder %s1717_s18, 1  ;;  %p126_p3 = scmp.eq.s32.totalorder %s1718_s19, 1 }
   0xa   : > { %s2717_s20 = scalar_select %p2381_p1, 1, 0 }
   0xb   : > { %p2391_p4 = por %p2381_p1, %p52_p0  ;;  %p1719_p5 = scmp.ge.s32.totalorder %s2312_s17, 1 }
   0xc   : > { %p2396_p6 = por %p126_p3, %p52_p0  ;;  %p133_p7 = scmp.lt.s32.totalorder %s2312_s17, 3 }
   0xd   : > { %s2719_s22 = scalar_select %p2391_p4, 1, 0 }
   0xe   : > { %s2720_s23 = scalar_select %p2396_p6, 1, 0 }
   0xf   : > { %p2401_p8 = pnand %p1719_p5, %p133_p7  ;;  %s2314_s25 = smov [#allocation6]  }
  0x10   : > { %s145_s26 = sshll.u32 %s2314_s25, 4  ;;  %s2315_s28 = smov [#allocation8]   ;;  %s2405_s26 = int_to_ptr.vmem [resolvable:$true] %s145_s26 }
  0x11   : > { %p1968_p9 = pneg %p2401_p8  ;;  %s159_s29 = sshll.u32 %s2315_s28, 4  ;;  %s2416_s29 = int_to_ptr.vmem [resolvable:$true] %s159_s29 }
  0x12   : > { %s2140_s5 = scalar_lea.hbm %s2710_s1, 9216 }
  0x13   : > { %p2412_p11 = pnand %p1968_p9, %p2381_p1  ;;  %p2141_p12 = scmp.ne.s32.totalorder %s2710_s1, %s2140_s5 }
  0x14   : > { %p2147_p5 = scmp.lt.u32.totalorder %s2140_s5, %s2710_s1 }
  0x15   : > { %p2142_p13 = pneg %p2412_p11 }
  0x17   : > { %p2143_p0 = pnand %p2142_p13, %p2141_p12 }
  0x19   : > { %p2144_p3 = pneg %p2143_p0 }
  0x1b   : > { %p2149_p7 = pnand %p2147_p5, %p2144_p3 }
  0x1d   : > { %2152 = shalt.err (!%p2149_p7)
}
  0x1e   : > { %s2153_s10 = scalar_lea.vmem %s2405_s26, 9216  ;;  %p2161_p1 = scmp.lt.s32.totalorder %s2405_s26, %s2405_s26 }
  0x1f   : > { %p2154_p9 = scmp.ne.s32.totalorder %s2405_s26, %s2153_s10  ;;  %p2162_p12 = scmp.lt.s32.totalorder %s2153_s10, %s2153_s10 }
  0x21   : > { %p2156_p10 = pnand %p2154_p9, %p2142_p13  ;;  %p2163_p0 = por %p2162_p12, %p2161_p1 }
  0x23   : > { %p2157_p6 = pneg %p2156_p10 }
  0x25   : > { %p2164_p4 = pnand %p2163_p0, %p2157_p6 }
  0x27   : > { %2167 = shalt.err (!%p2164_p4)
}
  0x28   : > { %s2316_s11 = smov 64   ;;  %s2317_s18 = smov 4  }
  0x29   : > { %1971 = dma.hbm_to_vmem [thread:$0]  (!%p2412_p11), %s2710_s1, 9216, %s2405_s26, [#allocation7], %s2316_s11, %s2316_s11, %s2317_s18  }
  0x2a   : > { %s2168_s4 = scalar_lea.hbm %s2711_s2, 16 }
  0x2b   : > { %p2169_p1 = scmp.ne.s32.totalorder %s2711_s2, %s2168_s4  ;;  %p2175_p10 = scmp.lt.u32.totalorder %s2168_s4, %s2711_s2 }
  0x2d   : > { %p2171_p4 = pnand %p2169_p1, %p2142_p13 }
  0x2f   : > { %p2172_p6 = pneg %p2171_p4 }
  0x31   : > { %p2177_p3 = pnand %p2175_p10, %p2172_p6 }
  0x33   : > { %2180 = shalt.err (!%p2177_p3)
}
  0x34   : > { %s2181_s26 = scalar_lea.vmem %s2416_s29, 16  ;;  %s2188_s9 = scalar_lea.vmem %s2416_s29, 32 }
  0x35   : > { %p2182_p5 = scmp.ne.s32.totalorder %s2416_s29, %s2181_s26  ;;  %p2189_p12 = scmp.lt.s32.totalorder %s2416_s29, %s2416_s29 }
  0x36   : > { %p2190_p0 = scmp.lt.s32.totalorder %s2188_s9, %s2181_s26 }
  0x37   : > { %p2184_p7 = pnand %p2182_p5, %p2142_p13 }
  0x38   : > { %p2191_p1 = por %p2190_p0, %p2189_p12 }
  0x39   : > { %p2185_p9 = pneg %p2184_p7 }
  0x3b   : > { %p2192_p4 = pnand %p2191_p1, %p2185_p9 }
  0x3d   : > { %2195 = shalt.err (!%p2192_p4)
}
  0x3e   : > { %1974 = dma.hbm_to_vmem [thread:$0]  (!%p2412_p11), %s2711_s2, 16, %s2416_s29, [#allocation7]  }
  0x3f   : > { %s32_s18 = sadd.s32 1, %s2308_s16  ;;  %s39_s19 = sadd.s32 1, %s2300_s14 }
  0x40   : > { %p34_p13 = scmp.ge.s32.totalorder %s32_s18, 2  ;;  %p46_p6 = scmp.ne.s32.totalorder %s2300_s14, %s2296_s13 }
  0x41   : > { %p47_p10 = scmp.eq.s32.totalorder %s2312_s17, 0  ;;  %p1985_p3 = scmp.lt.s32.totalorder %s2312_s17, 2 }
  0x42   : > { %s2742_s18 = smov (%p34_p13, %s32_s18), 0  ;;  %p2481_p7 = por %p2385_p2, %p46_p6 }
  0x43   : > { %p48_p5 = por %p47_p10, %p46_p6  ;;  %s36_s25 = ssub.s32 %s2308_s16, %s2742_s18 }
  0x44   : > { %s2723_s27 = scalar_select %p2481_p7, 1, 0 }
  0x45   : > { %s170_s28 = sand.u32 1, %s2300_s14   ;;  %p37_p9 = scmp.eq.s32.totalorder %s36_s25, 0 }
  0x46   : > { %s1953_s29 = smul.u32 80, %s170_s28  ;;  %p2488_p11 = pnand %p1985_p3, %p48_p5 }
  0x47   : > { %s2493_s4 = scalar_select %p37_p9, %s2300_s14, %s39_s19  }
  0x48   : > { %s1954_s5 = smul.u32 1280, %s2308_s16  ;;  %s174_s6 = scalar_lea.vmem [#allocation3], %s1953_s29 }
  0x49   : > { %s181_s7 = sshll.u32 %s174_s6, 4  ;;  %s2503_s9 = scalar_lea.sflag [#allocation4], %s170_s28  ;;  %s2501_s7 = int_to_ptr.vmem [resolvable:$true] %s181_s7 }
  0x4a   : > { %s2499_s26 = scalar_lea.hbm %s2709_s0, %s1954_s5  ;;  %p2198_p12 = pneg %p2488_p11 }
  0x4b   : > { %s2196_s10 = scalar_lea.hbm %s2499_s26, 1280  ;;  %s2201_s25 = scalar_lea.hbm %s2709_s0, 2560 }
  0x4c   : > { %p2197_p2 = scmp.ne.s32.totalorder %s2499_s26, %s2196_s10  ;;  %p2202_p4 = scmp.lt.u32.totalorder %s2499_s26, %s2709_s0 }
  0x4d   : > { %p2203_p13 = scmp.lt.u32.totalorder %s2201_s25, %s2196_s10  ;;  %p2205_p10 = scmp.lt.u32.totalorder %s2196_s10, %s2499_s26 }
  0x4e   : > { %p2199_p0 = pnand %p2198_p12, %p2197_p2 }
  0x4f   : > { %p2204_p6 = por %p2203_p13, %p2202_p4 }
  0x50   : > { %p2200_p1 = pneg %p2199_p0 }
  0x51   : > { %p2206_p3 = por %p2205_p10, %p2204_p6 }
  0x53   : > { %p2207_p5 = pnand %p2206_p3, %p2200_p1 }
  0x55   : > { %2210 = shalt.err (!%p2207_p5)
}
  0x56   : > { %s2211_s28 = scalar_lea.vmem %s2501_s7, 1280  ;;  %s2318_s6 = smov [#allocation3]  }
  0x57   : > { %p2212_p9 = scmp.ne.s32.totalorder %s2501_s7, %s2211_s28  ;;  %s2216_s21 = sshll.u32 %s2318_s6, 4  ;;  %s2217_s21 = int_to_ptr.vmem [resolvable:$false] %s2216_s21 }
  0x58   : > { %s2218_s8 = scalar_lea.vmem %s2217_s21, 2560  ;;  %p2219_p7 = scmp.lt.s32.totalorder %s2501_s7, %s2217_s21 }
  0x59   : > { %p2214_p2 = pnand %p2212_p9, %p2198_p12  ;;  %p2220_p4 = scmp.lt.s32.totalorder %s2218_s8, %s2211_s28 }
  0x5b   : > { %p2215_p0 = pneg %p2214_p2  ;;  %p2221_p13 = por %p2220_p4, %p2219_p7 }
  0x5d   : > { %p2222_p6 = pnand %p2221_p13, %p2215_p0 }
  0x5f   : > { %2225 = shalt.err (!%p2222_p6)
}
  0x60   : > { %s2319_s10 = smov 256   ;;  %s2320_s11 = smov 16  }
  0x61   : > { %1978 = dma.hbm_to_vmem [thread:$0]  (!%p2488_p11), %s2499_s26, 1280, %s2501_s7, %s2503_s9, %s2319_s10, %s2319_s10, %s2320_s11  }
  0x62   : > { %193 = sbr.rel (%p2401_p8) target bundleno = 473 (0x1d9), region = 32  ;;  %s2534_s19 = sand.u32 (!%p2401_p8), 1, %s2296_s13  }
  0x63   : > { %s1955_s25 = smul.u32 (!%p2401_p8), 80, %s2534_s19  ;;  %s196_s29 = scalar_lea.sflag (!%p2401_p8), [#allocation4], %s2534_s19 }
  0x64   : > { %p2725_p7 = scmp.ne.s32.totalorder (!%p2401_p8), %s2719_s22, 0 }
  0x65   : > { %s2538_s5 = scalar_lea.vmem (!%p2401_p8), [#allocation3], %s1955_s25 }
  0x69   : > { %2279 = dma.done.wait (%p2725_p7), %s196_s29, 1280  }
  0x6a   : > { %2281 = vsyncadd (%p2725_p7), %s196_s29, 4294966016  ;;  %p2726_p11 = scmp.ne.s32.totalorder %s2717_s20, 0 }
  0x6c   : > { %2283 = dma.done.wait (%p2726_p11), [#allocation7], 9232  }
  0x6d   : > { %2285 = vsyncadd (%p2726_p11), [#allocation7], 4294958064  ;;  %v2048_v0 = vld [vmem:[#allocation6 + $0x40] sm:$0xff]   ;;  %v2052_v4 = vld [vmem:[#allocation6 + $0x48] sm:$0xff]   ;;  %v2321_v23 = vmov 1983009808   ;;  %v249_v25 = vlaneseq }
  0x6e   : > { %v2049_v1 = vld [vmem:[#allocation6] sm:$0xff]   ;;  %1836 = vmatprep.subr.bf16.mxu0 %v2048_v0  ;;  %v2053_v5 = vld [vmem:[#allocation6 + $0x8] sm:$0xff]   ;;  %v2056_v8 = vld [vmem:[#allocation6 + $0x50] sm:$0xff]   ;;  %v247_v24 = vunpack.c.l.s4 %v2321_v23  ;;  %vm330_vm0 = vsmask.f32 1280  ;;  %vm2323_vm7 = vmmov 0  }
  0x6f   : > { %v2050_v2 = vld [vmem:[#allocation6 + $0xc0] sm:$0xff]   ;;  %1837 = vmatpush3.bf16.msra.mxu0 %v2049_v1  ;;  %v2054_v6 = vld [vmem:[#allocation6 + $0xc8] sm:$0xff]   ;;  %v2057_v9 = vld [vmem:[#allocation6 + $0x10] sm:$0xff]   ;;  %v250_v31 = vshrl.u32 %v249_v25, 7  ;;  %vm331_vm1 = vsmask.f32 3336 }
  0x70   : > { %v2051_v3 = vld [vmem:[#allocation6 + $0x80] sm:$0xff]   ;;  %1858 = vmatprep.subr.bf16.mxu1 %v2050_v2  ;;  %1838 = vmatprep.subr.bf16.mxu0 %v2052_v4  ;;  %v2055_v7 = vld [vmem:[#allocation6 + $0x88] sm:$0xff]   ;;  %v2058_v10 = vld [vmem:[#allocation6 + $0xd0] sm:$0xff]   ;;  %v248_v30 = vunpack.c.0.s8 %v247_v24  ;;  %vm333_vm2 = vsmask.f32 5392  ;;  %s1727_s20 = sshll.u32 %s2534_s19, 3 }
  0x71   : > { %1859 = vmatpush3.bf16.msra.mxu1 %v2051_v3  ;;  %v2059_v11 = vld [vmem:[#allocation6 + $0x90] sm:$0xff]   ;;  %v2060_v12 = vld [vmem:[#allocation6 + $0x58] sm:$0xff]   ;;  %v2064_v16 = vld [vmem:[#allocation6 + $0x60] sm:$0xff]   ;;  %vm335_vm3 = vsmask.f32 7448  ;;  %s229_s22 = scalar_lea.vmem [#allocation9], %s1727_s20 }
  0x72   : > { %1860 = vmatprep.subr.bf16.mxu1 %v2054_v6  ;;  %v2061_v13 = vld [vmem:[#allocation6 + $0x18] sm:$0xff]   ;;  %v2065_v17 = vld [vmem:[#allocation6 + $0x20] sm:$0xff]   ;;  %v2068_v20 = vld [vmem:[#allocation6 + $0x68] sm:$0xff]   ;;  %v2548_v36 = vsub.s32 %v248_v30, %v250_v31  ;;  %s1608_s24 = sshll.u32 %s229_s22, 4  ;;  %s1835_s30 = sshll.u32 %s2304_s15, 7  ;;  %s2655_s24 = int_to_ptr.vmem [resolvable:$true] %s1608_s24 }
  0x73   : > { %1839 = vmatpush3.bf16.msra.mxu0 %v2053_v5  ;;  %v2062_v14 = vld [vmem:[#allocation6 + $0xd8] sm:$0xff]   ;;  %v2066_v18 = vld [vmem:[#allocation6 + $0xe0] sm:$0xff]   ;;  %v2069_v21 = vld [vmem:[#allocation6 + $0x28] sm:$0xff]   ;;  %s2660_s9 = scalar_lea.hbm %s2712_s3, %s1835_s30  ;;  %s1593_s15 = scalar_lea.sflag [#allocation5], %s2534_s19 }
  0x74   : > { %1840 = vmatprep.subr.bf16.mxu0 %v2056_v8  ;;  %v2063_v15 = vld [vmem:[#allocation6 + $0x98] sm:$0xff]   ;;  %v2067_v19 = vld [vmem:[#allocation6 + $0xa0] sm:$0xff]   ;;  %v2070_v22 = vld [vmem:[#allocation6 + $0xe8] sm:$0xff]   ;;  %s2226_s28 = scalar_lea.vmem %s2655_s24, 128  ;;  %p2733_p12 = scmp.ne.s32.totalorder %s2723_s27, 0 }
  0x75   : > { %1861 = vmatpush3.bf16.msra.mxu1 %v2055_v7  ;;  %v2071_v26 = vld [vmem:[#allocation6 + $0xa8] sm:$0xff]   ;;  %v2072_v27 = vld [vmem:[#allocation6 + $0x70] sm:$0xff]   ;;  %v2076_v33 = vld [vmem:[#allocation6 + $0x78] sm:$0xff]   ;;  %p2227_p8 = scmp.ne.s32.totalorder %s2655_s24, %s2226_s28  ;;  %s2324_s6 = smov [#allocation9]  }
  0x76   : > { %1862 = vmatprep.subr.bf16.mxu1 %v2058_v10  ;;  %v2073_v28 = vld [vmem:[#allocation6 + $0x30] sm:$0xff]   ;;  %v2077_v34 = vld [vmem:[#allocation6 + $0x38] sm:$0xff]   ;;  %v2084_v40 = vld [vmem:[#allocation6 + $0x140] sm:$0xff]   ;;  %s2230_s21 = sshll.u32 %s2324_s6, 4  ;;  %s2231_s21 = int_to_ptr.vmem [resolvable:$false] %s2230_s21 }
  0x77   : > { %1841 = vmatpush3.bf16.msra.mxu0 %v2057_v9  ;;  %v2074_v29 = vld [vmem:[#allocation6 + $0xf0] sm:$0xff]   ;;  %v2078_v35 = vld [vmem:[#allocation6 + $0xf8] sm:$0xff]   ;;  %v2087_v51 = vld [vmem:[#allocation6 + $0x100] sm:$0xff]   ;;  %p2228_p1 = pnand %p2227_p8, %p2733_p12  ;;  %s2232_s8 = scalar_lea.vmem %s2231_s21, 256 }
  0x78   : > { %1842 = vmatprep.subr.bf16.mxu0 %v2060_v12  ;;  %v2075_v32 = vld [vmem:[#allocation6 + $0xb0] sm:$0xff]   ;;  %v2081_v38 = vld [vmem:[#allocation6 + $0xb8] sm:$0xff]   ;;  %vm2566_vm4 = vmor %vm330_vm0, %vm331_vm1  ;;  %p2233_p3 = scmp.lt.s32.totalorder %s2655_s24, %s2231_s21  ;;  %p2234_p5 = scmp.lt.s32.totalorder %s2232_s8, %s2226_s28 }
  0x79   : > { %1863 = vmatpush3.bf16.msra.mxu1 %v2059_v11  ;;  %v2079_v37 = vld [vmem:[%s2538_s5 + $0x4] ss:$16 sps:$4 sm:$0x33]   ;;  %v2082_v43 = vld [vmem:[%s2538_s5] ss:$16 sps:$4 sm:$0x33]   ;;  %vm2575_vm5 = vmor %vm2566_vm4, %vm333_vm2  ;;  %p2229_p10 = pneg %p2228_p1 }
  0x7a   : > { %1864 = vmatprep.subr.bf16.mxu1 %v2062_v14  ;;  %v2080_v39 = vld [vmem:[%s2538_s5 + $0x24] ss:$16 sps:$4 sm:$0x33]   ;;  %v279_v41 = vrot.slane %v2079_v37, %v2548_v36  ;;  %v2083_v44 = vld [vmem:[%s2538_s5 + $0x20] ss:$16 sps:$4 sm:$0x33]   ;;  %v252_v46 = vrot.slane %v2082_v43, %v2548_v36  ;;  %vm2582_vm6 = vmor %vm2575_vm5, %vm335_vm3  ;;  %p2235_p9 = por %p2234_p5, %p2233_p3 }
  0x7b   : > { %1843 = vmatpush3.bf16.msra.mxu0 %v2061_v13  ;;  %v286_v42 = vrot.slane %v2080_v39, %v2548_v36  ;;  %v259_v47 = vrot.slane %v2083_v44, %v2548_v36  ;;  %v2085_v48 = vld [vmem:[%s2538_s5 + $0x8] ss:$16 sps:$4 sm:$0x33]   ;;  %v2088_v10 = vld [vmem:[#allocation6 + $0x1c0] sm:$0xff]   ;;  %v2096_v57 = vld [vmem:[#allocation6 + $0x1d0] sm:$0xff]  }
  0x7c   : > { %1844 = vmatprep.subr.bf16.mxu0 %v2064_v16  ;;  %v2086_v49 = vld [vmem:[%s2538_s5 + $0x28] ss:$16 sps:$4 sm:$0x33]   ;;  %v428_v52 = vrot.slane %v2085_v48, %v2548_v36  ;;  %p2236_p2 = pnand %p2235_p9, %p2229_p10 }
  0x7d   : > { %1865 = vmatpush3.bf16.msra.mxu1 %v2063_v15  ;;  %v287_v45 = vcombine.low %v279_v41, %v286_v42  ;;  %v260_v50 = vcombine.low %v252_v46, %v259_v47  ;;  %v435_v53 = vrot.slane %v2086_v49, %v2548_v36  ;;  %v1728_v54 = vld.sshfl [vmem:[%s2538_s5] sm:$0x13 pattern:$0x76325410]  ;;  %v2091_v31 = vld [vmem:[#allocation6 + $0x108] sm:$0xff]   ;;  %v2098_v46 = vld [vmem:[#allocation6 + $0x158] sm:$0xff]  }
  0x7e   : > { %1866 = vmatprep.subr.bf16.mxu1 %v2066_v18  ;;  %v1729_v55 = vld.sshfl [vmem:[%s2538_s5 + $0x10] sm:$0x13 pattern:$0x76325410]  ;;  %v305_v56 = vcombine.high %v1728_v54, %v1728_v54  ;;  %v338_v58 = vshrl.u32 %v1728_v54, 16  ;;  %v341_v59 = vshll.u32 %v1728_v54, 16 }
  0x7f   : > { %1845 = vmatpush3.bf16.msra.mxu0 %v2065_v17  ;;  %1378 = vmatprep.mubr.bf16.mxu0 %v287_v45  ;;  %v436_v60 = vcombine.low %v428_v52, %v435_v53  ;;  %v1730_v61 = vld.sshfl [vmem:[%s2538_s5 + $0x20] sm:$0x13 pattern:$0x76325410]  ;;  %v313_v62 = vcombine.high %v1729_v55, %v1729_v55  ;;  %v352_v63 = vshrl.u32 %v1729_v55, 16  ;;  %v355_v0 = vshll.u32 %v1729_v55, 16 }
  0x80   : > { %1846 = vmatprep.subr.bf16.mxu0 %v2068_v20  ;;  %v1731_v1 = vld.sshfl [vmem:[%s2538_s5 + $0x30] sm:$0x13 pattern:$0x76325410]  ;;  %v321_v2 = vcombine.high %v1730_v61, %v1730_v61  ;;  %v340_v3 = vrot.slane %v338_v58, 6  ;;  %v343_v4 = vrot.slane %v341_v59, 7 }
  0x81   : > { %1867 = vmatpush3.bf16.msra.mxu1 %v2067_v19  ;;  %1419 = vmatprep.mubr.bf16.mxu1 %v436_v60  ;;  %v329_v5 = vcombine.high %v1731_v1, %v1731_v1  ;;  %v347_v7 = vshll.u32 %v305_v56, 16  ;;  %v354_v8 = vrot.slane %v352_v63, 6  ;;  %v357_v9 = vrot.slane %v355_v0, 7  ;;  %v2090_v19 = vld [vmem:[#allocation6 + $0x148] sm:$0xff]   ;;  %v2095_v42 = vld [vmem:[#allocation6 + $0x110] sm:$0xff]   ;;  %v2099_v49 = vld [vmem:[#allocation6 + $0x118] sm:$0xff]  }
  0x82   : > { %1868 = vmatprep.subr.bf16.mxu1 %v2070_v22  ;;  %v344_v11 = vor.u32 %v343_v4, %v340_v3  ;;  %v361_v12 = vshll.u32 %v313_v62, 16  ;;  %v366_v13 = vshrl.u32 %v1730_v61, 16  ;;  %v369_v14 = vshll.u32 %v1730_v61, 16  ;;  %v2092_v52 = vld [vmem:[#allocation6 + $0x1c8] sm:$0xff]   ;;  %v2102_v53 = vld [vmem:[#allocation6 + $0x160] sm:$0xff]   ;;  %v2097_v60 = vld [vmem:[#allocation6 + $0x190] sm:$0xff]  }
  0x83   : > { %1847 = vmatpush3.bf16.msra.mxu0 %v2069_v21  ;;  %v349_v15 = vrot.slane %v347_v7, 7  ;;  %v358_v16 = vor.u32 %v357_v9, %v354_v8  ;;  %v375_v17 = vshll.u32 %v321_v2, 16  ;;  %v380_v18 = vshrl.u32 %v1731_v1, 16  ;;  %v2103_v55 = vld [vmem:[#allocation6 + $0x120] sm:$0xff]   ;;  %v2093_v56 = vld [vmem:[#allocation6 + $0x188] sm:$0xff]   ;;  %v2100_v61 = vld [vmem:[#allocation6 + $0x1d8] sm:$0xff]  }
  0x84   : > { %1848 = vmatprep.subr.bf16.mxu0 %v2072_v27  ;;  %v345_v21 = vrot.slane %v344_v11, 2  ;;  %v363_v22 = vrot.slane %v361_v12, 7  ;;  %v368_v23 = vrot.slane %v366_v13, 6  ;;  %v371_v24 = vrot.slane %v369_v14, 7  ;;  %v2106_v58 = vld [vmem:[#allocation6 + $0x168] sm:$0xff]   ;;  %v2110_v62 = vld [vmem:[#allocation6 + $0x170] sm:$0xff]  }
  0x85   : > { %1869 = vmatpush3.bf16.msra.mxu1 %v2071_v26  ;;  %v359_v25 = vrot.slane %v358_v16, 2  ;;  %v377_v26 = vrot.slane %v375_v17, 7  ;;  %v382_v27 = vrot.slane %v380_v18, 6  ;;  %v389_v30 = vshll.u32 %v329_v5, 16  ;;  %v2107_v59 = vld [vmem:[#allocation6 + $0x128] sm:$0xff]   ;;  %v2111_v63 = vld [vmem:[#allocation6 + $0x130] sm:$0xff]  }
  0x86   : > { %1870 = vmatprep.subr.bf16.mxu1 %v2074_v29  ;;  %v372_v29 = vor.u32 %v371_v24, %v368_v23  ;;  %v2101_v0 = vld [vmem:[#allocation6 + $0x198] sm:$0xff]   ;;  %v2105_v4 = vld [vmem:[#allocation6 + $0x1a0] sm:$0xff]   ;;  %v2108_v5 = vld [vmem:[#allocation6 + $0x1e8] sm:$0xff]   ;;  %v2322_v11 = vmov 0.0  }
  0x87   : > { %1849 = vmatpush3.bf16.msra.mxu0 %v2073_v28  ;;  %v383_v28 = vshll.u32 %v1731_v1, 16  ;;  %v391_v37 = vrot.slane %v389_v30, 7  ;;  %v2104_v1 = vld [vmem:[#allocation6 + $0x1e0] sm:$0xff]   ;;  %v2114_v2 = vld [vmem:[#allocation6 + $0x178] sm:$0xff]   ;;  %v2112_v30 = vld [vmem:[#allocation6 + $0x1f0] sm:$0xff]  }
  0x88   : > { %1850 = vmatprep.subr.bf16.mxu0 %v2076_v33  ;;  %v2590_v33 = vsel %vm2582_vm6, %v359_v25, %v363_v22  ;;  %v2115_v3 = vld [vmem:[#allocation6 + $0x138] sm:$0xff]   ;;  %v2109_v25 = vld [vmem:[#allocation6 + $0x1a8] sm:$0xff]  }
  0x89   : > { %1871 = vmatpush3.bf16.msra.mxu1 %v2075_v32  ;;  %v350_v32 = vsel %vm2582_vm6, %v345_v21, %v349_v15  ;;  %v1732_v6 = vld.sshfl [vmem:[%s2538_s5 + $0x8] sm:$0x13 pattern:$0x76325410] }
  0x8a   : > { %1872 = vmatprep.subr.bf16.mxu1 %v2078_v35  ;;  %v373_v35 = vrot.slane %v372_v29, 2  ;;  %v393_v41 = vcombine.low %v350_v32, %v2590_v33  ;;  %v1733_v7 = vld.sshfl [vmem:[%s2538_s5 + $0x18] sm:$0x13 pattern:$0x76325410]  ;;  %v481_v8 = vcombine.high %v1732_v6, %v1732_v6  ;;  %v507_v9 = vshrl.u32 %v1732_v6, 16 }
  0x8b   : > { %1851 = vmatpush3.bf16.msra.mxu0 %v2077_v34  ;;  %v385_v34 = vrot.slane %v383_v28, 7  ;;  %v1734_v12 = vld.sshfl [vmem:[%s2538_s5 + $0x28] sm:$0x13 pattern:$0x76325410]  ;;  %v489_v13 = vcombine.high %v1733_v7, %v1733_v7  ;;  %v521_v14 = vshrl.u32 %v1733_v7, 16 }
  0x8c   : > { %1880 = vmatprep.subr.bf16.mxu0 %v2084_v40  ;;  %v2594_v40 = vsel %vm2582_vm6, %v373_v35, %v377_v26  ;;  %v401_v48 = vrot.slane %v393_v41, %v2548_v36  ;;  %v524_v15 = vshll.u32 %v1733_v7, 16  ;;  %v1735_v16 = vld.sshfl [vmem:[%s2538_s5 + $0x38] sm:$0x13 pattern:$0x76325410]  ;;  %v497_v17 = vcombine.high %v1734_v12, %v1734_v12 }
  0x8d   : > { %1873 = vmatpush3.bf16.msra.mxu1 %v2081_v38  ;;  %v2094_v38 = vld [vmem:[#allocation6 + $0x150] sm:$0xff]   ;;  %v386_v39 = vor.u32 %v385_v34, %v382_v27  ;;  %v735_v44 = vcombine.low %v2590_v33, %v2594_v40  ;;  %v509_v18 = vrot.slane %v507_v9, 6  ;;  %v505_v21 = vcombine.high %v1735_v16, %v1735_v16  ;;  %v2129_v20 = vld [vmem:[#allocation6 + $0x228] sm:$0xff]   ;;  %v2131_v33 = vld [vmem:[#allocation6 + $0x238] sm:$0xff]  }
  0x8e   : > { %1379 = vmatmul.mubr.bf16.vlgmr.msra.gmra.mrb[0].mxu0 %v260_v50  ;;  %1902 = vmatprep.subr.bf16.mxu1 %v2088_v10  ;;  %v2089_v50 = vld [vmem:[#allocation6 + $0x180] sm:$0xff]   ;;  %v510_v10 = vshll.u32 %v1732_v6, 16  ;;  %v516_v22 = vshll.u32 %v481_v8, 16  ;;  %v523_v23 = vrot.slane %v521_v14, 6  ;;  %v526_v24 = vrot.slane %v524_v15, 7 }
  0x8f   : > { %1881 = vmatpush3.bf16.msra.mxu0 %v2087_v51  ;;  %v387_v43 = vrot.slane %v386_v39, 2  ;;  %v530_v27 = vshll.u32 %v489_v13, 16  ;;  %v535_v28 = vshrl.u32 %v1734_v12, 16  ;;  %v538_v29 = vshll.u32 %v1734_v12, 16 }
  0x90   : > { %1882 = vmatprep.subr.bf16.mxu0 %v2090_v19  ;;  %v512_v19 = vrot.slane %v510_v10, 7  ;;  %v527_v32 = vor.u32 %v526_v24, %v523_v23  ;;  %v544_v34 = vshll.u32 %v497_v17, 16  ;;  %v549_v35 = vshrl.u32 %v1735_v16, 16 }
  0x91   : > { %v2601_v45 = vsel %vm2582_vm6, %v387_v43, %v391_v37  ;;  %v537_v39 = vrot.slane %v535_v28, 6  ;;  %v540_v41 = vrot.slane %v538_v29, 7 }
  0x92   : > { %v394_v47 = vcombine.low %v2594_v40, %v2601_v45  ;;  %v513_v26 = vor.u32 %v512_v19, %v509_v18  ;;  %v551_v43 = vrot.slane %v549_v35, 6  ;;  %v2122_v19 = vld [vmem:[#allocation6 + $0x200] sm:$0xff]  }
  0x93   : > { %1883 = vmatpush3.bf16.msra.mxu0 %v2091_v31  ;;  %v518_v31 = vrot.slane %v516_v22, 7 }
  0x94   : > { %1884 = vmatprep.subr.bf16.mxu0 %v2094_v38  ;;  %v408_v51 = vrot.slane %v394_v47, %v2548_v36  ;;  %v514_v37 = vrot.slane %v513_v26, 2  ;;  %v532_v38 = vrot.slane %v530_v27, 7  ;;  %v2113_v47 = vld [vmem:[#allocation6 + $0x1b0] sm:$0xff]  }
  0x96   : > { %v409_v54 = vcombine.low %v401_v48, %v408_v51  ;;  %v2116_v48 = vld [vmem:[#allocation6 + $0x1f8] sm:$0xff]   ;;  %v558_v51 = vshll.u32 %v505_v21, 16  ;;  %v1751_v21 = vld.sshfl [vmem:[%s2538_s5 + $0x40] sm:$0x13 pattern:$0x76325410] }
  0x97   : > { %1885 = vmatpush3.bf16.msra.mxu0 %v2095_v42  ;;  %v528_v42 = vrot.slane %v527_v32, 2  ;;  %v678_v22 = vcombine.high %v1751_v21, %v1751_v21  ;;  %v722_v23 = vshrl.u32 %v1751_v21, 16  ;;  %v725_v24 = vshll.u32 %v1751_v21, 16 }
  0x98   : > { %1886 = vmatprep.subr.bf16.mxu0 %v2098_v46  ;;  %1420 = vmatmul.mubr.bf16.vlgmr.msra.gmra.mrb[0].mxu1 %v409_v54  ;;  %v552_v46 = vshll.u32 %v1735_v16, 16 }
  0x99   : > { %1903 = vmatpush3.bf16.msra.mxu1 %v2089_v50  ;;  %v546_v50 = vrot.slane %v544_v34, 7  ;;  %v724_v26 = vrot.slane %v722_v23, 6  ;;  %v727_v27 = vrot.slane %v725_v24, 7  ;;  %v731_v28 = vshll.u32 %v678_v22, 16 }
  0x9a   : > { %1904 = vmatprep.subr.bf16.mxu1 %v2092_v52  ;;  %v519_v52 = vsel %vm2582_vm6, %v514_v37, %v518_v31  ;;  %v554_v54 = vrot.slane %v552_v46, 7  ;;  %v2126_v31 = vld [vmem:[#allocation6 + $0x210] sm:$0xff]   ;;  %v743_v37 = vrot.slane %v735_v44, %v2548_v36 }
  0x9b   : > { %1887 = vmatpush3.bf16.msra.mxu0 %v2099_v49  ;;  %v541_v49 = vor.u32 %v540_v41, %v537_v39  ;;  %v728_v29 = vor.u32 %v727_v27, %v724_v26 }
  0x9c   : > { %1888 = vmatprep.subr.bf16.mxu0 %v2102_v53  ;;  %v533_v53 = vsel %vm2582_vm6, %v528_v42, %v532_v38  ;;  %v2127_v38 = vld [vmem:[#allocation6 + $0x218] sm:$0xff]   ;;  %v2128_v42 = vld [vmem:[#allocation6 + $0x220] sm:$0xff]  }
  0x9d   : > { %1905 = vmatpush3.bf16.msra.mxu1 %v2093_v56  ;;  %v2119_v56 = vld [vmem:[%s2538_s5 + $0x2c] ss:$16 sps:$4 sm:$0x33]   ;;  %v729_v32 = vrot.slane %v728_v29, 2 }
  0x9e   : > { %1906 = vmatprep.subr.bf16.mxu1 %v2096_v57  ;;  %v542_v57 = vrot.slane %v541_v49, 2  ;;  %v462_v8 = vrot.slane %v2119_v56, %v2548_v36  ;;  %v1752_v49 = vld [vmem:[#allocation8] ss:$0 sm:$0xff] }
  0x9f   : > { %1889 = vmatpush3.bf16.msra.mxu0 %v2103_v55  ;;  %v2118_v55 = vld [vmem:[%s2538_s5 + $0xc] ss:$16 sps:$4 sm:$0x33]  }
  0xa0   : > { %1890 = vmatprep.subr.bf16.mxu0 %v2106_v58  ;;  %v560_v58 = vrot.slane %v558_v51, 7  ;;  %v455_v7 = vrot.slane %v2118_v55, %v2548_v36 }
  0xa1   : > { %1907 = vmatpush3.bf16.msra.mxu1 %v2097_v60  ;;  %v555_v60 = vor.u32 %v554_v54, %v551_v43 }
  0xa2   : > { %1908 = vmatprep.subr.bf16.mxu1 %v2100_v61  ;;  %v2120_v61 = vld [vmem:[%s2538_s5 + $0x14] ss:$16 sps:$4 sm:$0x33]   ;;  %v463_v17 = vcombine.low %v455_v7, %v462_v8 }
  0xa3   : > { %1891 = vmatpush3.bf16.msra.mxu0 %v2107_v59  ;;  %v2117_v59 = vld [vmem:[#allocation6 + $0x1b8] sm:$0xff]  }
  0xa4   : > { %1892 = vmatprep.subr.bf16.mxu0 %v2110_v62  ;;  %v2121_v62 = vld [vmem:[%s2538_s5 + $0x34] ss:$16 sps:$4 sm:$0x33]  }
  0xa5   : > { %1909 = vmatpush3.bf16.msra.mxu1 %v2101_v0  ;;  %v547_v0 = vsel %vm2582_vm6, %v542_v57, %v546_v50 }
  0xa6   : > { %1910 = vmatprep.subr.bf16.mxu1 %v2104_v1  ;;  %v556_v1 = vrot.slane %v555_v60, 2 }
  0xa7   : > { %1893 = vmatpush3.bf16.msra.mxu0 %v2111_v63  ;;  %v562_v63 = vcombine.low %v519_v52, %v533_v53 }
  0xa8   : > { %1894 = vmatprep.subr.bf16.mxu0 %v2114_v2  ;;  %v628_v2 = vrot.slane %v2120_v61, %v2548_v36  ;;  %v561_v6 = vsel %vm2582_vm6, %v556_v1, %v560_v58 }
  0xa9   : > { %1911 = vmatpush3.bf16.msra.mxu1 %v2105_v4  ;;  %v2123_v4 = vld [vmem:[%s2538_s5 + $0x10] ss:$16 sps:$4 sm:$0x33]   ;;  %v563_v10 = vcombine.low %v547_v0, %v561_v6  ;;  %v570_v12 = vrot.slane %v562_v63, %v2548_v36 }
  0xaa   : > { %1912 = vmatprep.subr.bf16.mxu1 %v2108_v5  ;;  %v2124_v5 = vld [vmem:[%s2538_s5 + $0x30] ss:$16 sps:$4 sm:$0x33]   ;;  %v601_v13 = vrot.slane %v2123_v4, %v2548_v36 }
  0xab   : > { %1895 = vmatpush3.bf16.msra.mxu0 %v2115_v3  ;;  %v635_v3 = vrot.slane %v2121_v62, %v2548_v36  ;;  %v608_v14 = vrot.slane %v2124_v5, %v2548_v36  ;;  %v577_v15 = vrot.slane %v563_v10, %v2548_v36 }
  0xac   : > { %1933 = vmatprep.subr.bf16.mxu0 %v2322_v11 }
  0xad   : > { %1913 = vmatpush3.bf16.msra.mxu1 %v2109_v25  ;;  %v636_v9 = vcombine.low %v628_v2, %v635_v3  ;;  %v609_v16 = vcombine.low %v601_v13, %v608_v14  ;;  %v578_v18 = vcombine.low %v570_v12, %v577_v15  ;;  %v2125_v25 = vld [vmem:[#allocation6 + $0x208] sm:$0xff]  }
  0xae   : > { %1914 = vmatprep.subr.bf16.mxu1 %v2112_v30  ;;  %v733_v30 = vrot.slane %v731_v28, 7 }
  0xaf   : > { %1501 = vmatprep.mubr.bf16.mxu1 %v636_v9  ;;  %1460 = vmatprep.mubr.bf16.mxu0 %v578_v18 }
  0xb0   : > { %1461 = vmatmul.mubr.bf16.vlgmr.msra.gmra.mrb[4].mxu0 %v463_v17  ;;  %v734_v34 = vsel %vm2582_vm6, %v729_v32, %v733_v30 }
  0xb1   : > { %1915 = vmatpush3.bf16.msra.mxu1 %v2113_v47  ;;  %1934 = vmatpush3.bf16.msra.mxu0 %v2122_v19  ;;  %v736_v35 = vcombine.low %v2601_v45, %v734_v34  ;;  %v2130_v45 = vld [vmem:[#allocation6 + $0x230] sm:$0xff]  }
  0xb2   : > { %1916 = vmatprep.subr.bf16.mxu1 %v2116_v48  ;;  %1949 = vmatprep.mubr.msk.bf16.mxu0 %vm2323_vm7, %v2322_v11 }
  0xb3   : > { %1935 = vmatprep.subr.bf16.mxu0 %v2322_v11  ;;  %v750_v39 = vrot.slane %v736_v35, %v2548_v36 }
  0xb5   : > { %1917 = vmatpush3.bf16.msra.mxu1 %v2117_v59  ;;  %1936 = vmatpush3.bf16.msra.mxu0 %v2125_v25  ;;  %v751_v41 = vcombine.low %v743_v37, %v750_v39 }
  0xb6   : > { %1937 = vmatprep.subr.bf16.mxu0 %v2322_v11 }
  0xb8   : > { %1502 = vmatmul.mubr.bf16.vlgmr.msra.gmra.mrb[4].mxu1 %v609_v16 }
  0xb9   : > { %1938 = vmatpush3.bf16.msra.mxu0 %v2126_v31 }
  0xba   : > { %1939 = vmatprep.subr.bf16.mxu0 %v2322_v11 }
  0xbd   : > { %1940 = vmatpush3.bf16.msra.mxu0 %v2127_v38 }
  0xbe   : > { %1941 = vmatprep.subr.bf16.mxu0 %v2322_v11 }
  0xc1   : > { %1942 = vmatpush3.bf16.msra.mxu0 %v2128_v42 }
  0xc2   : > { %1943 = vmatprep.subr.bf16.mxu0 %v2322_v11 }
  0xc5   : > { %1944 = vmatpush3.bf16.msra.mxu0 %v2129_v20 }
  0xc6   : > { %1945 = vmatprep.subr.bf16.mxu0 %v2322_v11 }
  0xc9   : > { %1946 = vmatpush3.bf16.msra.mxu0 %v2130_v45 }
  0xca   : > { %1947 = vmatprep.subr.bf16.mxu0 %v2322_v11 }
  0xcd   : > { %1948 = vmatpush3.bf16.msra.mxu0 %v2131_v33 }
  0xd0   : > { %1950 = vmatmul.mubr.bf16.vlgmr.msra.gmra.mrb[8].mxu0 %v751_v41 }
 0x161   : > { %v1852_v40 = vpop.f32.mrb[0].mxu0 }
 0x162   : > { %v1853_v44 = vpop.f32.mrb[1].mxu0 }
 0x163   : > { %v1854_v43 = vadd.f32 %v1853_v44, %v1852_v40  ;;  %v1855_v46 = vpop.f32.mrb[2].mxu0 }
 0x164   : > { %v1856_v47 = vpop.f32.mrb[3].mxu0 }
 0x165   : > { %v1857_v48 = vadd.f32 %v1856_v47, %v1855_v46  ;;  %v1381_v50 = vadd.f32 %v1854_v43, %v1752_v49 }
 0x167   : > { %v1384_v53 = vadd.f32 %v1857_v48, %v1752_v49 }
 0x16b   : > { %v1874_v51 = vpop.f32.mrb[0].mxu1 }
 0x16c   : > { %v1875_v52 = vpop.f32.mrb[1].mxu1 }
 0x16d   : > { %v1876_v54 = vadd.f32 %v1875_v52, %v1874_v51  ;;  %v1877_v55 = vpop.f32.mrb[2].mxu1 }
 0x16e   : > { %v1878_v56 = vpop.f32.mrb[3].mxu1 }
 0x16f   : > { %v1422_v57 = vadd.f32 %v1876_v54, %v1381_v50  ;;  %v1879_v58 = vadd.f32 %v1878_v56, %v1877_v55 }
 0x171   : > { %v1425_v59 = vadd.f32 %v1879_v58, %v1384_v53 }
 0x183   : > { %v1896_v63 = vpop.f32.mrb[4].mxu0 }
 0x184   : > { %v1897_v1 = vpop.f32.mrb[5].mxu0 }
 0x185   : > { %v1898_v3 = vadd.f32 %v1897_v1, %v1896_v63  ;;  %v1899_v4 = vpop.f32.mrb[6].mxu0 }
 0x186   : > { %v1900_v5 = vpop.f32.mrb[7].mxu0 }
 0x187   : > { %v1463_v6 = vadd.f32 %v1898_v3, %v1422_v57  ;;  %v1901_v7 = vadd.f32 %v1900_v5, %v1899_v4 }
 0x189   : > { %v1466_v8 = vadd.f32 %v1901_v7, %v1425_v59 }
 0x18b   : > { %v1918_v11 = vpop.f32.mrb[4].mxu1 }
 0x18c   : > { %v1919_v60 = vpop.f32.mrb[5].mxu1 }
 0x18d   : > { %v1920_v61 = vadd.f32 %v1919_v60, %v1918_v11  ;;  %v1921_v62 = vpop.f32.mrb[6].mxu1 }
 0x18e   : > { %v1922_v0 = vpop.f32.mrb[7].mxu1 }
 0x18f   : > { %v1923_v2 = vadd.f32 %v1922_v0, %v1921_v62  ;;  %v1504_v9 = vadd.f32 %v1920_v61, %v1463_v6 }
 0x191   : > { %v1507_v10 = vadd.f32 %v1923_v2, %v1466_v8 }
 0x1a3   : > { %v1544_v12 = vpop.f32.mrb[8].mxu0 }
 0x1a4   : > { %v1545_v13 = vadd.f32 %v1544_v12, %v1504_v9  ;;  %v1951_v14 = vpop.f32.mrb[9].mxu0 }
 0x1a5   : > { %v1547_v15 = vpop.f32.mrb[10].mxu0 }
 0x1a6   : > { %v1825_v16 = vmul.f32 -1.442695, %v1545_v13  ;;  %v1548_v17 = vadd.f32 %v1547_v15, %v1507_v10  ;;  %v1952_v18 = vpop.f32.mrb[11].mxu0 }
 0x1a8   : > { %2132 = vpow2.f32 %v1825_v16  ;;  %v1826_v19 = vmul.f32 -1.442695, %v1548_v17 }
 0x1aa   : > { %2134 = vpow2.f32 %v1826_v19 }
 0x1b2   : > { %v2133_v21 = vpop.eup %2132 }
 0x1b3   : > { %v1557_v22 = vadd.f32 1.0, %v2133_v21 }
 0x1b4   : > { %v2135_v23 = vpop.eup %2134 }
 0x1b5   : > { %2136 = vrcp.f32 %v1557_v22  ;;  %v1558_v24 = vadd.f32 1.0, %v2135_v23 }
 0x1b7   : > { %2138 = vrcp.f32 %v1558_v24 }
 0x1bf   : > { %v2137_v25 = vpop.eup %2136 }
 0x1c0   : > { %v1563_v27 = vmul.f32 %v2137_v25, %v1545_v13 }
 0x1c1   : > { %v2139_v26 = vpop.eup %2138 }
 0x1c2   : > { %v1564_v28 = vmul.f32 %v2139_v26, %v1548_v17 }
 0x1c4   : > { %v1565_v29 = vpack.c.bf16 %v1564_v28, %v1563_v27  ;;  %v1827_v30 = vpack.c.bf16 %v1564_v28, %v1564_v28 }
 0x1c6   : > { %v1574_v31 = vrot.slane %v1565_v29, %v2548_v36  ;;  %v1581_v32 = vrot.slane %v1827_v30, %v2548_v36  ;;  %1828 = vst.sshfl [vmem:[%s229_s22] sm:$0x3 pattern:$0x76325410] %v1565_v29 }
 0x1c7   : > { %1829 = vst.sshfl [vmem:[%s229_s22 + $0x4] sm:$0x3 pattern:$0x76325410] %v1827_v30 }
 0x1c8   : > { %v1582_v34 = vcombine.high %v1574_v31, %v1574_v31  ;;  %v1583_v35 = vcombine.high %v1581_v32, %v1581_v32 }
 0x1ca   : > { %1589 = vst [vmem:[%s229_s22 + $0x2] sm:$0x3] %v1582_v34  ;;  %1591 = vst [vmem:[%s229_s22 + $0x6] sm:$0x3] %v1583_v35 }
 0x1cb   : > { %2239 = shalt.err (!%p2236_p2)
}
 0x1cc   : > { %s2240_s10 = scalar_lea.hbm %s2660_s9, 128  ;;  %s2244_s29 = scalar_lea.hbm %s2712_s3, 256 }
 0x1cd   : > { %p2241_p0 = scmp.ne.s32.totalorder %s2660_s9, %s2240_s10  ;;  %p2245_p6 = scmp.lt.u32.totalorder %s2660_s9, %s2712_s3 }
 0x1ce   : > { %p2246_p7 = scmp.lt.u32.totalorder %s2244_s29, %s2240_s10  ;;  %p2248_p8 = scmp.lt.u32.totalorder %s2240_s10, %s2660_s9 }
 0x1cf   : > { %p2242_p4 = pnand %p2241_p0, %p2733_p12 }
 0x1d0   : > { %p2247_p11 = por %p2246_p7, %p2245_p6 }
 0x1d1   : > { %p2243_p13 = pneg %p2242_p4 }
 0x1d2   : > { %p2249_p1 = por %p2248_p8, %p2247_p11 }
 0x1d4   : > { %p2250_p10 = pnand %p2249_p1, %p2243_p13 }
 0x1d6   : > { %2253 = shalt.err (!%p2250_p10)
}
 0x1d7   : > { %s2325_s22 = smov 32   ;;  %s2326_s30 = smov 2  }
 0x1d8   : > { %1966 = dma.vmem_to_hbm [thread:$0]  (%p2733_p12), %s2655_s24, 128, %s2660_s9, %s1593_s15, %s2325_s22, %s2325_s22, %s2326_s30  }
 0x1d9 PF: > { %s1623_s7 = sand.u32 1, %s2292_s12   ;;  %p2734_p3 = scmp.ne.s32.totalorder %s2720_s23, 0 }
 0x1da   : > { %p2735_p5 = scmp.ge.s32.totalorder %s2312_s17, 2  ;;  %s1624_s26 = scalar_lea.sflag [#allocation5], %s1623_s7 }
 0x1dc   : > { %p1980_p9 = pnand %p2735_p5, %p2734_p3 }
 0x1de   : > { %2287 = dma.done.wait (!%p1980_p9), %s1624_s26, 128  }
 0x1df   : > { %2289 = vsyncadd (!%p1980_p9), %s1624_s26, 4294967168  ;;  %s20_s17 = sadd.s32 1, %s2312_s17   ;;  %s2736_s12 = smov %s2296_s13 }
 0x1e0   : > { %p17_p2 = scmp.ge.s32.totalorder %s20_s17, 4   ;;  %s2737_s13 = smov %s2300_s14 }
 0x1e1   : > { %s2738_s14 = smov %s2493_s4  ;;  %s2739_s15 = smov %s2308_s16 }
 0x1e2   : > { %s2740_s16 = smov %s2742_s18  ;;  %19 = sbr.rel (!%p17_p2) target bundleno = 7 (0x7), region = 87 }
 0x1e9   :  { %1629 = vsyncpa [#allocation4], 1 }
 0x1ea   :  { %1631 = vsyncpa [#allocation4 + $0x1], 1 }
 0x1eb   :  { %1632 = vsyncpa [#allocation7], 1 }
 0x1ec   :  { %1633 = vsyncpa [#allocation5], 1 }
 0x1ed   :  { %1635 = vsyncpa [#allocation5 + $0x1], 1 }

// kernel: yolo_feature_extractor.3
= control target key start
LH: loop header
LB: loop body
LE: loop exit
PB: predicated region body
PF: predicated region fallthrough
CT: control target
= control target key end

     0   :  { %8 = vsyncpa [#allocation4], 0  ;;  %s3316_s0 = inlined_call_operand.hbm [shape: bf16[2,9,9,512], index: 0, kind: input, shape index: {}]   ;;  %s3317_s1 = inlined_call_operand.hbm [shape: bf16[1152,128], index: 1, kind: input, shape index: {}]   ;;  %s3318_s2 = inlined_call_operand.hbm [shape: f32[1,128], index: 2, kind: input, shape index: {}]   ;;  %s3319_s3 = inlined_call_operand.hbm [shape: bf16[2,8,8,128], index: 3, kind: output, shape index: {}]  }
   0x1   :  { %10 = vsyncpa [#allocation4 + $0x1], 0 }
   0x2   :  { %11 = vsyncpa [#allocation7], 0 }
   0x3   :  { %12 = vsyncpa [#allocation5], 0 }
   0x4   :  { %14 = vsyncpa [#allocation5 + $0x1], 0  ;;  %s2885_s12 = smov 0   ;;  %s2887_s13 = smov 0  }
   0x5   :  { %s2889_s14 = smov 0   ;;  %s2891_s15 = smov 0  }
   0x6   :  { %s2893_s16 = smov 0   ;;  %s2895_s17 = smov 0  }
   0x7 LB: > { %s2068_s18 = sadd.s32 4294967295, %s2853_s17   ;;  %s2069_s19 = sadd.s32 4294967294, %s2853_s17   ;;  %s2853_s17 = sphi %s2895_s17, %s20_s17   ;;  %s2849_s16 = sphi %s2893_s16, %s3343_s16   ;;  %s2845_s15 = sphi %s2891_s15, %s3342_s15   ;;  %s2841_s14 = sphi %s2889_s14, %s3341_s14   ;;  %s2837_s13 = sphi %s2887_s13, %s3340_s13   ;;  %s2833_s12 = sphi %s2885_s12, %s3339_s12  }
   0x8   : > { %p52_p0 = scmp.ne.s32.totalorder %s2837_s13, %s2833_s12  ;;  %p2919_p1 = scmp.eq.s32.totalorder %s2068_s18, 0 }
   0x9   : > { %p2923_p2 = scmp.eq.s32.totalorder %s2068_s18, 1  ;;  %p126_p3 = scmp.eq.s32.totalorder %s2069_s19, 1 }
   0xa   : > { %s3324_s20 = scalar_select %p2919_p1, 1, 0 }
   0xb   : > { %p2929_p4 = por %p2919_p1, %p52_p0  ;;  %p2070_p5 = scmp.ge.s32.totalorder %s2853_s17, 1 }
   0xc   : > { %p2934_p6 = por %p126_p3, %p52_p0  ;;  %p133_p7 = scmp.lt.s32.totalorder %s2853_s17, 3 }
   0xd   : > { %s3326_s22 = scalar_select %p2929_p4, 1, 0 }
   0xe   : > { %s3327_s23 = scalar_select %p2934_p6, 1, 0 }
   0xf   : > { %p2939_p8 = pnand %p2070_p5, %p133_p7  ;;  %s2855_s25 = smov [#allocation6]  }
  0x10   : > { %s145_s26 = sshll.u32 %s2855_s25, 4  ;;  %s2856_s28 = smov [#allocation8]   ;;  %s2943_s26 = int_to_ptr.vmem [resolvable:$true] %s145_s26 }
  0x11   : > { %p2500_p9 = pneg %p2939_p8  ;;  %s159_s29 = sshll.u32 %s2856_s28, 4  ;;  %s2954_s29 = int_to_ptr.vmem [resolvable:$true] %s159_s29 }
  0x12   : > { %s2681_s5 = scalar_lea.hbm %s3317_s1, 9216 }
  0x13   : > { %p2950_p11 = pnand %p2500_p9, %p2919_p1  ;;  %p2682_p12 = scmp.ne.s32.totalorder %s3317_s1, %s2681_s5 }
  0x14   : > { %p2688_p5 = scmp.lt.u32.totalorder %s2681_s5, %s3317_s1 }
  0x15   : > { %p2683_p13 = pneg %p2950_p11 }
  0x17   : > { %p2684_p0 = pnand %p2683_p13, %p2682_p12 }
  0x19   : > { %p2685_p3 = pneg %p2684_p0 }
  0x1b   : > { %p2690_p7 = pnand %p2688_p5, %p2685_p3 }
  0x1d   : > { %2693 = shalt.err (!%p2690_p7)
}
  0x1e   : > { %s2694_s10 = scalar_lea.vmem %s2943_s26, 9216  ;;  %p2702_p1 = scmp.lt.s32.totalorder %s2943_s26, %s2943_s26 }
  0x1f   : > { %p2695_p9 = scmp.ne.s32.totalorder %s2943_s26, %s2694_s10  ;;  %p2703_p12 = scmp.lt.s32.totalorder %s2694_s10, %s2694_s10 }
  0x21   : > { %p2697_p10 = pnand %p2695_p9, %p2683_p13  ;;  %p2704_p0 = por %p2703_p12, %p2702_p1 }
  0x23   : > { %p2698_p6 = pneg %p2697_p10 }
  0x25   : > { %p2705_p4 = pnand %p2704_p0, %p2698_p6 }
  0x27   : > { %2708 = shalt.err (!%p2705_p4)
}
  0x28   : > { %s2857_s11 = smov 64   ;;  %s2858_s18 = smov 4  }
  0x29   : > { %2503 = dma.hbm_to_vmem [thread:$0]  (!%p2950_p11), %s3317_s1, 9216, %s2943_s26, [#allocation7], %s2857_s11, %s2857_s11, %s2858_s18  }
  0x2a   : > { %s2709_s4 = scalar_lea.hbm %s3318_s2, 16 }
  0x2b   : > { %p2710_p1 = scmp.ne.s32.totalorder %s3318_s2, %s2709_s4  ;;  %p2716_p10 = scmp.lt.u32.totalorder %s2709_s4, %s3318_s2 }
  0x2d   : > { %p2712_p4 = pnand %p2710_p1, %p2683_p13 }
  0x2f   : > { %p2713_p6 = pneg %p2712_p4 }
  0x31   : > { %p2718_p3 = pnand %p2716_p10, %p2713_p6 }
  0x33   : > { %2721 = shalt.err (!%p2718_p3)
}
  0x34   : > { %s2722_s26 = scalar_lea.vmem %s2954_s29, 16  ;;  %s2729_s9 = scalar_lea.vmem %s2954_s29, 32 }
  0x35   : > { %p2723_p5 = scmp.ne.s32.totalorder %s2954_s29, %s2722_s26  ;;  %p2730_p12 = scmp.lt.s32.totalorder %s2954_s29, %s2954_s29 }
  0x36   : > { %p2731_p0 = scmp.lt.s32.totalorder %s2729_s9, %s2722_s26 }
  0x37   : > { %p2725_p7 = pnand %p2723_p5, %p2683_p13 }
  0x38   : > { %p2732_p1 = por %p2731_p0, %p2730_p12 }
  0x39   : > { %p2726_p9 = pneg %p2725_p7 }
  0x3b   : > { %p2733_p4 = pnand %p2732_p1, %p2726_p9 }
  0x3d   : > { %2736 = shalt.err (!%p2733_p4)
}
  0x3e   : > { %2506 = dma.hbm_to_vmem [thread:$0]  (!%p2950_p11), %s3318_s2, 16, %s2954_s29, [#allocation7]  }
  0x3f   : > { %s32_s18 = sadd.s32 1, %s2849_s16  ;;  %s39_s19 = sadd.s32 1, %s2841_s14 }
  0x40   : > { %p34_p13 = scmp.ge.s32.totalorder %s32_s18, 2  ;;  %p46_p6 = scmp.ne.s32.totalorder %s2841_s14, %s2837_s13 }
  0x41   : > { %p47_p10 = scmp.eq.s32.totalorder %s2853_s17, 0  ;;  %p2517_p3 = scmp.lt.s32.totalorder %s2853_s17, 2 }
  0x42   : > { %s3345_s18 = smov (%p34_p13, %s32_s18), 0  ;;  %p3019_p7 = por %p2923_p2, %p46_p6 }
  0x43   : > { %p48_p5 = por %p47_p10, %p46_p6  ;;  %s36_s25 = ssub.s32 %s2849_s16, %s3345_s18 }
  0x44   : > { %s3330_s27 = scalar_select %p3019_p7, 1, 0 }
  0x45   : > { %s170_s28 = sand.u32 1, %s2841_s14   ;;  %p37_p9 = scmp.eq.s32.totalorder %s36_s25, 0 }
  0x46   : > { %s2485_s29 = smul.u32 288, %s170_s28  ;;  %p3026_p11 = pnand %p2517_p3, %p48_p5 }
  0x47   : > { %s3031_s4 = scalar_select %p37_p9, %s2841_s14, %s39_s19  }
  0x48   : > { %s2486_s5 = smul.u32 4608, %s2849_s16  ;;  %s174_s6 = scalar_lea.vmem [#allocation3], %s2485_s29 }
  0x49   : > { %s181_s7 = sshll.u32 %s174_s6, 4  ;;  %s3041_s9 = scalar_lea.sflag [#allocation4], %s170_s28  ;;  %s3039_s7 = int_to_ptr.vmem [resolvable:$true] %s181_s7 }
  0x4a   : > { %s3037_s26 = scalar_lea.hbm %s3316_s0, %s2486_s5  ;;  %p2739_p12 = pneg %p3026_p11 }
  0x4b   : > { %s2737_s10 = scalar_lea.hbm %s3037_s26, 4608  ;;  %s2742_s25 = scalar_lea.hbm %s3316_s0, 9216 }
  0x4c   : > { %p2738_p2 = scmp.ne.s32.totalorder %s3037_s26, %s2737_s10  ;;  %p2743_p4 = scmp.lt.u32.totalorder %s3037_s26, %s3316_s0 }
  0x4d   : > { %p2744_p13 = scmp.lt.u32.totalorder %s2742_s25, %s2737_s10  ;;  %p2746_p10 = scmp.lt.u32.totalorder %s2737_s10, %s3037_s26 }
  0x4e   : > { %p2740_p0 = pnand %p2739_p12, %p2738_p2 }
  0x4f   : > { %p2745_p6 = por %p2744_p13, %p2743_p4 }
  0x50   : > { %p2741_p1 = pneg %p2740_p0 }
  0x51   : > { %p2747_p3 = por %p2746_p10, %p2745_p6 }
  0x53   : > { %p2748_p5 = pnand %p2747_p3, %p2741_p1 }
  0x55   : > { %2751 = shalt.err (!%p2748_p5)
}
  0x56   : > { %s2752_s28 = scalar_lea.vmem %s3039_s7, 4608  ;;  %s2859_s6 = smov [#allocation3]  }
  0x57   : > { %p2753_p9 = scmp.ne.s32.totalorder %s3039_s7, %s2752_s28  ;;  %s2757_s21 = sshll.u32 %s2859_s6, 4  ;;  %s2758_s21 = int_to_ptr.vmem [resolvable:$false] %s2757_s21 }
  0x58   : > { %s2759_s8 = scalar_lea.vmem %s2758_s21, 9216  ;;  %p2760_p7 = scmp.lt.s32.totalorder %s3039_s7, %s2758_s21 }
  0x59   : > { %p2755_p2 = pnand %p2753_p9, %p2739_p12  ;;  %p2761_p4 = scmp.lt.s32.totalorder %s2759_s8, %s2752_s28 }
  0x5b   : > { %p2756_p0 = pneg %p2755_p2  ;;  %p2762_p13 = por %p2761_p4, %p2760_p7 }
  0x5d   : > { %p2763_p6 = pnand %p2762_p13, %p2756_p0 }
  0x5f   : > { %2766 = shalt.err (!%p2763_p6)
}
  0x60   : > { %s2860_s10 = smov 256   ;;  %s2861_s11 = smov 16  }
  0x61   : > { %2510 = dma.hbm_to_vmem [thread:$0]  (!%p3026_p11), %s3037_s26, 4608, %s3039_s7, %s3041_s9, %s2860_s10, %s2860_s10, %s2861_s11  }
  0x62   : > { %193 = sbr.rel (%p2939_p8) target bundleno = 476 (0x1dc), region = 32  ;;  %s3072_s19 = sand.u32 (!%p2939_p8), 1, %s2837_s13  }
  0x63   : > { %s2487_s25 = smul.u32 (!%p2939_p8), 288, %s3072_s19  ;;  %s196_s29 = scalar_lea.sflag (!%p2939_p8), [#allocation4], %s3072_s19 }
  0x64   : > { %p3332_p7 = scmp.ne.s32.totalorder (!%p2939_p8), %s3326_s22, 0 }
  0x65   : > { %s3076_s5 = scalar_lea.vmem (!%p2939_p8), [#allocation3], %s2487_s25 }
  0x69   : > { %2820 = dma.done.wait (%p3332_p7), %s196_s29, 4608  }
  0x6a   : > { %2822 = vsyncadd (%p3332_p7), %s196_s29, 4294962688  ;;  %p3333_p11 = scmp.ne.s32.totalorder %s3324_s20, 0 }
  0x6c   : > { %2824 = dma.done.wait (%p3333_p11), [#allocation7], 9232  }
  0x6d   : > { %2826 = vsyncadd (%p3333_p11), [#allocation7], 4294958064  ;;  %v2577_v0 = vld [vmem:[#allocation6 + $0x40] sm:$0xff]   ;;  %v2581_v4 = vld [vmem:[#allocation6 + $0x48] sm:$0xff]   ;;  %vm324_vm0 = vsmask.f32 3328 }
  0x6e   : > { %v2578_v1 = vld [vmem:[#allocation6 + $0xc0] sm:$0xff]   ;;  %2273 = vmatprep.subr.bf16.mxu0 %v2577_v0  ;;  %v2582_v5 = vld [vmem:[#allocation6 + $0xc8] sm:$0xff]   ;;  %v2585_v8 = vld [vmem:[#allocation6 + $0x50] sm:$0xff]   ;;  %vm325_vm1 = vsmask.f32 7440  ;;  %s2078_s20 = sshll.u32 %s3072_s19, 5 }
  0x6f   : > { %v2579_v2 = vld [vmem:[#allocation6] sm:$0xff]   ;;  %2313 = vmatprep.subr.bf16.mxu1 %v2578_v1  ;;  %v2583_v6 = vld [vmem:[#allocation6 + $0x8] sm:$0xff]   ;;  %v2586_v9 = vld [vmem:[#allocation6 + $0xd0] sm:$0xff]   ;;  %s229_s22 = scalar_lea.vmem [#allocation9], %s2078_s20  ;;  %s2249_s30 = sshll.u32 %s2845_s15, 9 }
  0x70   : > { %v2580_v3 = vld [vmem:[#allocation6 + $0x80] sm:$0xff]   ;;  %2274 = vmatpush3.bf16.msra.mxu0 %v2579_v2  ;;  %v2584_v7 = vld [vmem:[#allocation6 + $0x88] sm:$0xff]   ;;  %v2587_v10 = vld [vmem:[#allocation6 + $0x10] sm:$0xff]   ;;  %s1959_s24 = sshll.u32 %s229_s22, 4  ;;  %s3267_s9 = scalar_lea.hbm %s3319_s3, %s2249_s30  ;;  %s3262_s24 = int_to_ptr.vmem [resolvable:$true] %s1959_s24 }
  0x71   : > { %2314 = vmatpush3.bf16.msra.mxu1 %v2580_v3  ;;  %2275 = vmatprep.subr.bf16.mxu0 %v2581_v4  ;;  %v2588_v11 = vld [vmem:[#allocation6 + $0x90] sm:$0xff]   ;;  %v2589_v12 = vld [vmem:[#allocation6 + $0x58] sm:$0xff]   ;;  %v2593_v16 = vld [vmem:[#allocation6 + $0x60] sm:$0xff]   ;;  %s1944_s15 = scalar_lea.sflag [#allocation5], %s3072_s19  ;;  %s2767_s28 = scalar_lea.vmem %s3262_s24, 512 }
  0x72   : > { %2315 = vmatprep.subr.bf16.mxu1 %v2582_v5  ;;  %v2590_v13 = vld [vmem:[#allocation6 + $0xd8] sm:$0xff]   ;;  %v2594_v17 = vld [vmem:[#allocation6 + $0xe0] sm:$0xff]   ;;  %v2597_v20 = vld [vmem:[#allocation6 + $0x68] sm:$0xff]   ;;  %p2768_p8 = scmp.ne.s32.totalorder %s3262_s24, %s2767_s28  ;;  %p3336_p12 = scmp.ne.s32.totalorder %s3330_s27, 0 }
  0x73   : > { %v2591_v14 = vld [vmem:[#allocation6 + $0x18] sm:$0xff]   ;;  %v2595_v18 = vld [vmem:[#allocation6 + $0x20] sm:$0xff]   ;;  %v2598_v21 = vld [vmem:[#allocation6 + $0xe8] sm:$0xff]   ;;  %s2862_s6 = smov [#allocation9]  }
  0x74   : > { %2276 = vmatpush3.bf16.msra.mxu0 %v2583_v6  ;;  %v2592_v15 = vld [vmem:[#allocation6 + $0x98] sm:$0xff]   ;;  %v2596_v19 = vld [vmem:[#allocation6 + $0xa0] sm:$0xff]   ;;  %v2599_v22 = vld [vmem:[#allocation6 + $0x28] sm:$0xff]   ;;  %p2769_p1 = pnand %p2768_p8, %p3336_p12  ;;  %s2771_s21 = sshll.u32 %s2862_s6, 4  ;;  %s2772_s21 = int_to_ptr.vmem [resolvable:$false] %s2771_s21 }
  0x75   : > { %2316 = vmatpush3.bf16.msra.mxu1 %v2584_v7  ;;  %2277 = vmatprep.subr.bf16.mxu0 %v2585_v8  ;;  %v2600_v23 = vld [vmem:[#allocation6 + $0xa8] sm:$0xff]   ;;  %v2601_v24 = vld [vmem:[#allocation6 + $0x70] sm:$0xff]   ;;  %v2605_v28 = vld [vmem:[#allocation6 + $0x78] sm:$0xff]   ;;  %s2773_s8 = scalar_lea.vmem %s2772_s21, 1024  ;;  %p2774_p3 = scmp.lt.s32.totalorder %s3262_s24, %s2772_s21 }
  0x76   : > { %2317 = vmatprep.subr.bf16.mxu1 %v2586_v9  ;;  %v2602_v25 = vld [vmem:[#allocation6 + $0xf0] sm:$0xff]   ;;  %v2606_v29 = vld [vmem:[#allocation6 + $0xf8] sm:$0xff]   ;;  %v272_v32 = vld [vmem:[%s3076_s5 + $0x4] sm:$0xf]  ;;  %p2770_p10 = pneg %p2769_p1  ;;  %p2775_p5 = scmp.lt.s32.totalorder %s2773_s8, %s2767_s28 }
  0x77   : > { %v2603_v26 = vld [vmem:[#allocation6 + $0x30] sm:$0xff]   ;;  %v2607_v30 = vld [vmem:[#allocation6 + $0x38] sm:$0xff]   ;;  %v273_v33 = vld [vmem:[%s3076_s5 + $0x24] sm:$0xf] }
  0x78   : > { %2278 = vmatpush3.bf16.msra.mxu0 %v2587_v10  ;;  %v2604_v27 = vld [vmem:[#allocation6 + $0xb0] sm:$0xff]   ;;  %v2608_v31 = vld [vmem:[#allocation6 + $0xb8] sm:$0xff]   ;;  %v459_v34 = vld [vmem:[%s3076_s5 + $0x8] sm:$0xf]  ;;  %v2083_v35 = vcombine.low %v272_v32, %v273_v33  ;;  %p2776_p9 = por %p2775_p5, %p2774_p3 }
  0x79   : > { %2318 = vmatpush3.bf16.msra.mxu1 %v2588_v11  ;;  %2279 = vmatprep.subr.bf16.mxu0 %v2589_v12  ;;  %v460_v36 = vld [vmem:[%s3076_s5 + $0x28] sm:$0xf]  ;;  %v236_v37 = vld [vmem:[%s3076_s5] sm:$0xf]  ;;  %v309_v42 = vld [vmem:[%s3076_s5 + $0x10] sm:$0x1] }
  0x7a   : > { %2319 = vmatprep.subr.bf16.mxu1 %v2590_v13  ;;  %v237_v38 = vld [vmem:[%s3076_s5 + $0x20] sm:$0xf]  ;;  %v2091_v39 = vcombine.low %v459_v34, %v460_v36  ;;  %1554 = vmatprep.mubr.bf16.mxu0 %v2083_v35  ;;  %v311_v44 = vld [vmem:[%s3076_s5 + $0x30] sm:$0x1]  ;;  %v337_v47 = vshll.u32 %v309_v42, 16  ;;  %vm3098_vm2 = vmor %vm324_vm0, %vm325_vm1  ;;  %p2777_p2 = pnand %p2776_p9, %p2770_p10 }
  0x7b   : > { %v2079_v40 = vcombine.low %v236_v37, %v237_v38  ;;  %v308_v41 = vld [vmem:[%s3076_s5] sm:$0xf]  ;;  %v351_v50 = vshll.u32 %v311_v44, 16  ;;  %v2613_v0 = vld [vmem:[#allocation6 + $0x148] sm:$0xff]   ;;  %v274_v8 = vld [vmem:[%s3076_s5 + $0x44] sm:$0xf] }
  0x7c   : > { %2280 = vmatpush3.bf16.msra.mxu0 %v2591_v14  ;;  %v310_v43 = vld [vmem:[%s3076_s5 + $0x20] sm:$0xf]  ;;  %v328_v45 = vshrl.u32 %v308_v41, 16  ;;  %v331_v46 = vshll.u32 %v308_v41, 16  ;;  %1619 = vmatprep.mubr.bf16.mxu1 %v2091_v39  ;;  %v339_v58 = vrot.slane %v337_v47, 5  ;;  %v2615_v4 = vld [vmem:[#allocation6 + $0x108] sm:$0xff]  }
  0x7d   : > { %2320 = vmatpush3.bf16.msra.mxu1 %v2592_v15  ;;  %2281 = vmatprep.subr.bf16.mxu0 %v2593_v16  ;;  %v342_v48 = vshrl.u32 %v310_v43, 16  ;;  %v345_v49 = vshll.u32 %v310_v43, 16  ;;  %v2609_v54 = vld [vmem:[#allocation6 + $0x140] sm:$0xff]   ;;  %v353_v62 = vrot.slane %v351_v50, 5  ;;  %v2614_v6 = vld [vmem:[#allocation6 + $0x1c8] sm:$0xff]   ;;  %v2618_v32 = vld [vmem:[#allocation6 + $0x1d0] sm:$0xff]  }
  0x7e   : > { %2321 = vmatprep.subr.bf16.mxu1 %v2594_v17  ;;  %v330_v51 = vrot.slane %v328_v45, 4  ;;  %v333_v52 = vrot.slane %v331_v46, 5  ;;  %v2610_v55 = vld [vmem:[#allocation6 + $0x1c0] sm:$0xff]   ;;  %v461_v10 = vld [vmem:[%s3076_s5 + $0x48] sm:$0xf]  ;;  %v2619_v36 = vld [vmem:[#allocation6 + $0x110] sm:$0xff]  }
  0x7f   : > { %v344_v53 = vrot.slane %v342_v48, 4  ;;  %v347_v56 = vrot.slane %v345_v49, 5  ;;  %v2611_v59 = vld [vmem:[#allocation6 + $0x100] sm:$0xff]   ;;  %v2616_v11 = vld [vmem:[#allocation6 + $0x188] sm:$0xff]   ;;  %v2620_v39 = vld [vmem:[#allocation6 + $0x190] sm:$0xff]  }
  0x80   : > { %2282 = vmatpush3.bf16.msra.mxu0 %v2595_v18  ;;  %v334_v57 = vor.u32 %v333_v52, %v330_v51  ;;  %v2612_v2 = vld [vmem:[#allocation6 + $0x180] sm:$0xff]   ;;  %v462_v13 = vld [vmem:[%s3076_s5 + $0x68] sm:$0xf]  ;;  %v2621_v41 = vld [vmem:[#allocation6 + $0x158] sm:$0xff]  }
  0x81   : > { %2322 = vmatpush3.bf16.msra.mxu1 %v2596_v19  ;;  %2283 = vmatprep.subr.bf16.mxu0 %v2597_v20  ;;  %v348_v61 = vor.u32 %v347_v56, %v344_v53  ;;  %v275_v9 = vld [vmem:[%s3076_s5 + $0x64] sm:$0xf]  ;;  %v238_v14 = vld [vmem:[%s3076_s5 + $0x40] sm:$0xf]  ;;  %v2092_v16 = vcombine.low %v461_v10, %v462_v13  ;;  %v313_v19 = vld [vmem:[%s3076_s5 + $0x50] sm:$0x1] }
  0x82   : > { %2323 = vmatprep.subr.bf16.mxu1 %v2598_v21  ;;  %v335_v63 = vrot.slane %v334_v57, 4  ;;  %v2084_v12 = vcombine.low %v274_v8, %v275_v9  ;;  %v239_v15 = vld [vmem:[%s3076_s5 + $0x60] sm:$0xf]  ;;  %v315_v21 = vld [vmem:[%s3076_s5 + $0x70] sm:$0x1]  ;;  %v2622_v43 = vld [vmem:[#allocation6 + $0x1d8] sm:$0xff]  }
  0x83   : > { %v349_v1 = vrot.slane %v348_v61, 4  ;;  %v2080_v17 = vcombine.low %v238_v14, %v239_v15  ;;  %v312_v18 = vld [vmem:[%s3076_s5 + $0x40] sm:$0xf]  ;;  %v2623_v45 = vld [vmem:[#allocation6 + $0x118] sm:$0xff]   ;;  %v276_v49 = vld [vmem:[%s3076_s5 + $0x84] sm:$0xf] }
  0x84   : > { %2284 = vmatpush3.bf16.msra.mxu0 %v2599_v22  ;;  %v340_v3 = vsel %vm3098_vm2, %v335_v63, %v339_v58  ;;  %v314_v20 = vld [vmem:[%s3076_s5 + $0x60] sm:$0xf]  ;;  %v356_v22 = vshrl.u32 %v312_v18, 16  ;;  %v2624_v47 = vld [vmem:[#allocation6 + $0x198] sm:$0xff]   ;;  %v277_v50 = vld [vmem:[%s3076_s5 + $0xa4] sm:$0xf] }
  0x85   : > { %2324 = vmatpush3.bf16.msra.mxu1 %v2600_v23  ;;  %2285 = vmatprep.subr.bf16.mxu0 %v2601_v24  ;;  %v354_v5 = vsel %vm3098_vm2, %v349_v1, %v353_v62  ;;  %v359_v23 = vshll.u32 %v312_v18, 16  ;;  %v365_v24 = vshll.u32 %v313_v19, 16  ;;  %v463_v51 = vld [vmem:[%s3076_s5 + $0x88] sm:$0xf]  ;;  %v2085_v52 = vcombine.low %v276_v49, %v277_v50  ;;  %v316_v58 = vld [vmem:[%s3076_s5 + $0x80] sm:$0xf] }
  0x86   : > { %2325 = vmatprep.subr.bf16.mxu1 %v2602_v25  ;;  %v2087_v7 = vcombine.low %v340_v3, %v354_v5  ;;  %v370_v25 = vshrl.u32 %v314_v20, 16  ;;  %v464_v53 = vld [vmem:[%s3076_s5 + $0xa8] sm:$0xf]  ;;  %v318_v61 = vld [vmem:[%s3076_s5 + $0xa0] sm:$0xf]  ;;  %v384_v63 = vshrl.u32 %v316_v58, 16 }
  0x87   : > { %v367_v35 = vrot.slane %v365_v24, 5  ;;  %v2093_v56 = vcombine.low %v463_v51, %v464_v53  ;;  %v319_v62 = vld [vmem:[%s3076_s5 + $0xb0] sm:$0x1]  ;;  %v401_v3 = vshll.u32 %v318_v61, 16  ;;  %v2625_v8 = vld [vmem:[#allocation6 + $0x160] sm:$0xff]   ;;  %v2629_v18 = vld [vmem:[#allocation6 + $0x168] sm:$0xff]  }
  0x88   : > { %2286 = vmatpush3.bf16.msra.mxu0 %v2603_v26  ;;  %v373_v26 = vshll.u32 %v314_v20, 16  ;;  %v386_v5 = vrot.slane %v384_v63, 4  ;;  %v2626_v9 = vld [vmem:[#allocation6 + $0x1e0] sm:$0xff]   ;;  %v2630_v20 = vld [vmem:[#allocation6 + $0x1e8] sm:$0xff]   ;;  %v2634_v49 = vld [vmem:[#allocation6 + $0x1f0] sm:$0xff]  }
  0x89   : > { %2326 = vmatpush3.bf16.msra.mxu1 %v2604_v27  ;;  %2287 = vmatprep.subr.bf16.mxu0 %v2605_v28  ;;  %v379_v27 = vshll.u32 %v315_v21, 16  ;;  %v358_v28 = vrot.slane %v356_v22, 4  ;;  %v403_v10 = vrot.slane %v401_v3, 5  ;;  %v2627_v13 = vld [vmem:[#allocation6 + $0x120] sm:$0xff]   ;;  %v2631_v22 = vld [vmem:[#allocation6 + $0x128] sm:$0xff]   ;;  %v2635_v53 = vld [vmem:[#allocation6 + $0x130] sm:$0xff]  }
  0x8a   : > { %2327 = vmatprep.subr.bf16.mxu1 %v2606_v29  ;;  %v361_v29 = vrot.slane %v359_v23, 5  ;;  %v375_v33 = vrot.slane %v373_v26, 5  ;;  %v2632_v24 = vld [vmem:[#allocation6 + $0x1a8] sm:$0xff]   ;;  %v278_v26 = vld [vmem:[%s3076_s5 + $0xc4] sm:$0xf]  ;;  %v2639_v63 = vld [vmem:[#allocation6 + $0x138] sm:$0xff]  }
  0x8b   : > { %v381_v38 = vrot.slane %v379_v27, 5  ;;  %v279_v27 = vld [vmem:[%s3076_s5 + $0xe4] sm:$0xf]  ;;  %v531_v3 = vld [vmem:[%s3076_s5 + $0x8] sm:$0xf] }
  0x8c   : > { %2288 = vmatpush3.bf16.msra.mxu0 %v2607_v30  ;;  %v372_v30 = vrot.slane %v370_v25, 4  ;;  %v362_v34 = vor.u32 %v361_v29, %v358_v28  ;;  %v465_v28 = vld [vmem:[%s3076_s5 + $0xc8] sm:$0xf]  ;;  %v2086_v29 = vcombine.low %v278_v26, %v279_v27 }
  0x8d   : > { %2328 = vmatpush3.bf16.msra.mxu1 %v2608_v31  ;;  %2353 = vmatprep.subr.bf16.mxu0 %v2609_v54  ;;  %v2617_v31 = vld [vmem:[#allocation6 + $0x150] sm:$0xff]   ;;  %v240_v54 = vld [vmem:[%s3076_s5 + $0x80] sm:$0xf] }
  0x8e   : > { %2393 = vmatprep.subr.bf16.mxu1 %v2610_v55  ;;  %v376_v37 = vor.u32 %v375_v33, %v372_v30  ;;  %v241_v55 = vld [vmem:[%s3076_s5 + $0xa0] sm:$0xf]  ;;  %v466_v30 = vld [vmem:[%s3076_s5 + $0xe8] sm:$0xf] }
  0x8f   : > { %1555 = vmatmul.mubr.bf16.vlgmr.msra.gmra.mrb[0].mxu0 %v2079_v40  ;;  %v363_v40 = vrot.slane %v362_v34, 4  ;;  %v2081_v57 = vcombine.low %v240_v54, %v241_v55  ;;  %v2094_v33 = vcombine.low %v465_v28, %v466_v30 }
  0x90   : > { %2354 = vmatpush3.bf16.msra.mxu0 %v2611_v59  ;;  %1620 = vmatmul.mubr.bf16.vlgmr.msra.gmra.mrb[0].mxu1 %v2087_v7  ;;  %v377_v42 = vrot.slane %v376_v37, 4  ;;  %v317_v59 = vld [vmem:[%s3076_s5 + $0x90] sm:$0x1]  ;;  %v322_v37 = vld [vmem:[%s3076_s5 + $0xe0] sm:$0xf] }
  0x91   : > { %2355 = vmatprep.subr.bf16.mxu0 %v2613_v0  ;;  %2394 = vmatpush3.bf16.msra.mxu1 %v2612_v2  ;;  %v368_v44 = vsel %vm3098_vm2, %v363_v40, %v367_v35  ;;  %v387_v0 = vshll.u32 %v316_v58, 16  ;;  %v393_v1 = vshll.u32 %v317_v59, 16  ;;  %v398_v2 = vshrl.u32 %v318_v61, 16  ;;  %v320_v35 = vld [vmem:[%s3076_s5 + $0xc0] sm:$0xf]  ;;  %v2637_v58 = vld [vmem:[#allocation6 + $0x178] sm:$0xff]  }
  0x92   : > { %1562 = vmatprep.mubr.bf16.mxu0 %v2084_v12  ;;  %2395 = vmatprep.subr.bf16.mxu1 %v2614_v6  ;;  %v382_v46 = vsel %vm3098_vm2, %v377_v42, %v381_v38  ;;  %v323_v38 = vld [vmem:[%s3076_s5 + $0xf0] sm:$0x1]  ;;  %v415_v40 = vshll.u32 %v320_v35, 16  ;;  %v426_v42 = vshrl.u32 %v322_v37, 16  ;;  %v2638_v61 = vld [vmem:[#allocation6 + $0x1f8] sm:$0xff]  }
  0x93   : > { %1627 = vmatprep.mubr.bf16.mxu1 %v2092_v16  ;;  %v2088_v48 = vcombine.low %v368_v44, %v382_v46  ;;  %v389_v6 = vrot.slane %v387_v0, 5  ;;  %v400_v7 = vrot.slane %v398_v2, 4  ;;  %v395_v12 = vrot.slane %v393_v1, 5  ;;  %v2628_v16 = vld [vmem:[#allocation6 + $0x1a0] sm:$0xff]   ;;  %v2640_v1 = vld [vmem:[#allocation6 + $0x1b8] sm:$0xff]  }
  0x94   : > { %2356 = vmatpush3.bf16.msra.mxu0 %v2615_v4  ;;  %v407_v4 = vshll.u32 %v319_v62, 16  ;;  %v435_v44 = vshll.u32 %v323_v38, 16  ;;  %v417_v46 = vrot.slane %v415_v40, 5 }
  0x95   : > { %2396 = vmatpush3.bf16.msra.mxu1 %v2616_v11  ;;  %2357 = vmatprep.subr.bf16.mxu0 %v2617_v31  ;;  %v390_v11 = vor.u32 %v389_v6, %v386_v5  ;;  %v404_v14 = vor.u32 %v403_v10, %v400_v7  ;;  %v242_v31 = vld [vmem:[%s3076_s5 + $0xc0] sm:$0xf]  ;;  %v533_v5 = vld [vmem:[%s3076_s5 + $0x28] sm:$0xf]  ;;  %v534_v6 = vld [vmem:[%s3076_s5 + $0x38] sm:$0x1] }
  0x96   : > { %2397 = vmatprep.subr.bf16.mxu1 %v2618_v32  ;;  %v409_v15 = vrot.slane %v407_v4, 5  ;;  %v243_v32 = vld [vmem:[%s3076_s5 + $0xe0] sm:$0xf]  ;;  %v437_v55 = vrot.slane %v435_v44, 5  ;;  %v532_v4 = vld [vmem:[%s3076_s5 + $0x18] sm:$0x1] }
  0x97   : > { %1563 = vmatmul.mubr.bf16.gmra.mrb[4].mxu0 %v2080_v17  ;;  %v391_v17 = vrot.slane %v390_v11, 4  ;;  %v405_v19 = vrot.slane %v404_v14, 4  ;;  %v2082_v34 = vcombine.low %v242_v31, %v243_v32  ;;  %v548_v7 = vshrl.u32 %v531_v3, 16  ;;  %v2116_v14 = vld [vmem:[%s3076_s5 + $0x44] sm:$0xf]  ;;  %v3158_v31 = vld [vmem:[#allocation6 + $0x208] sm:$0xff]  }
  0x98   : > { %2358 = vmatpush3.bf16.msra.mxu0 %v2619_v36  ;;  %1628 = vmatmul.mubr.bf16.gmra.mrb[4].mxu1 %v2088_v48  ;;  %v321_v36 = vld [vmem:[%s3076_s5 + $0xd0] sm:$0x1]  ;;  %v562_v10 = vshrl.u32 %v533_v5, 16  ;;  %v565_v11 = vshll.u32 %v533_v5, 16  ;;  %v535_v32 = vld [vmem:[%s3076_s5 + $0x48] sm:$0xf] }
  0x99   : > { %2398 = vmatpush3.bf16.msra.mxu1 %v2620_v39  ;;  %2359 = vmatprep.subr.bf16.mxu0 %v2621_v41  ;;  %v396_v21 = vsel %vm3098_vm2, %v391_v17, %v395_v12  ;;  %v410_v23 = vsel %vm3098_vm2, %v405_v19, %v409_v15  ;;  %v412_v39 = vshrl.u32 %v320_v35, 16  ;;  %v421_v41 = vshll.u32 %v321_v36, 16  ;;  %v2633_v48 = vld [vmem:[#allocation6 + $0x170] sm:$0xff]   ;;  %v537_v36 = vld [vmem:[%s3076_s5 + $0x68] sm:$0xf] }
  0x9a   : > { %2399 = vmatprep.subr.bf16.mxu1 %v2622_v43  ;;  %1570 = vmatprep.mubr.bf16.mxu0 %v2085_v52  ;;  %v2089_v25 = vcombine.low %v396_v21, %v410_v23  ;;  %v429_v43 = vshll.u32 %v322_v37, 16  ;;  %v571_v12 = vshll.u32 %v534_v6, 16  ;;  %v550_v15 = vrot.slane %v548_v7, 4  ;;  %v2103_v23 = vld [vmem:[%s3076_s5 + $0x20] sm:$0xf] }
  0x9b   : > { %1635 = vmatprep.mubr.bf16.mxu1 %v2093_v56  ;;  %v423_v52 = vrot.slane %v421_v41, 5  ;;  %v2636_v56 = vld [vmem:[#allocation6 + $0x1b0] sm:$0xff]   ;;  %v564_v17 = vrot.slane %v562_v10, 4  ;;  %v538_v37 = vld [vmem:[%s3076_s5 + $0x78] sm:$0x1]  ;;  %v576_v38 = vshrl.u32 %v535_v32, 16 }
  0x9c   : > { %2360 = vmatpush3.bf16.msra.mxu0 %v2623_v45  ;;  %v414_v45 = vrot.slane %v412_v39, 4  ;;  %v431_v50 = vrot.slane %v429_v43, 5  ;;  %v573_v27 = vrot.slane %v571_v12, 5  ;;  %v579_v40 = vshll.u32 %v535_v32, 16  ;;  %v2117_v43 = vld [vmem:[%s3076_s5 + $0x64] sm:$0xf] }
  0x9d   : > { %2400 = vmatpush3.bf16.msra.mxu1 %v2624_v47  ;;  %2361 = vmatprep.subr.bf16.mxu0 %v2625_v8  ;;  %v428_v47 = vrot.slane %v426_v42, 4  ;;  %v551_v8 = vshll.u32 %v531_v3, 16  ;;  %v590_v42 = vshrl.u32 %v537_v36, 16  ;;  %v540_v5 = vld [vmem:[%s3076_s5 + $0x98] sm:$0x1] }
  0x9e   : > { %2401 = vmatprep.subr.bf16.mxu1 %v2626_v9  ;;  %v418_v51 = vor.u32 %v417_v46, %v414_v45  ;;  %v557_v9 = vshll.u32 %v532_v4, 16  ;;  %v578_v45 = vrot.slane %v576_v38, 4  ;;  %v593_v46 = vshll.u32 %v537_v36, 16  ;;  %v541_v6 = vld [vmem:[%s3076_s5 + $0xa8] sm:$0xf] }
  0x9f   : > { %1571 = vmatmul.mubr.bf16.gmra.mrb[8].mxu0 %v2081_v57  ;;  %v432_v54 = vor.u32 %v431_v50, %v428_v47  ;;  %v599_v47 = vshll.u32 %v538_v37, 16  ;;  %v581_v50 = vrot.slane %v579_v40, 5  ;;  %v618_v12 = vshrl.u32 %v541_v6, 16  ;;  %v499_v32 = vld [vmem:[%s3076_s5 + $0x8c] sm:$0xf] }
  0xa0   : > { %2362 = vmatpush3.bf16.msra.mxu0 %v2627_v13  ;;  %1636 = vmatmul.mubr.bf16.gmra.mrb[8].mxu1 %v2089_v25  ;;  %v419_v57 = vrot.slane %v418_v51, 4  ;;  %v2115_v13 = vld [vmem:[%s3076_s5 + $0x24] sm:$0xf]  ;;  %v559_v19 = vrot.slane %v557_v9, 5  ;;  %v2104_v25 = vld [vmem:[%s3076_s5 + $0x40] sm:$0xf] }
  0xa1   : > { %2402 = vmatpush3.bf16.msra.mxu1 %v2628_v16  ;;  %2363 = vmatprep.subr.bf16.mxu0 %v2629_v18  ;;  %v433_v59 = vrot.slane %v432_v54, 4  ;;  %v553_v16 = vrot.slane %v551_v8, 5  ;;  %v495_v18 = vld [vmem:[%s3076_s5 + $0xc] sm:$0xf]  ;;  %v2123_v21 = vcombine.low %v2115_v13, %v2116_v14  ;;  %v2111_v28 = vcombine.low %v2103_v23, %v2104_v25  ;;  %v2643_v54 = vld [vmem:[#allocation6 + $0x210] sm:$0xff]  }
  0xa2   : > { %2403 = vmatprep.subr.bf16.mxu1 %v2630_v20  ;;  %1578 = vmatprep.mubr.bf16.mxu0 %v2086_v29  ;;  %v424_v62 = vsel %vm3098_vm2, %v419_v57, %v423_v52  ;;  %v567_v20 = vrot.slane %v565_v11, 5  ;;  %v2641_v29 = vld [vmem:[#allocation6 + $0x200] sm:$0xff]   ;;  %v592_v52 = vrot.slane %v590_v42, 4  ;;  %v542_v9 = vld [vmem:[%s3076_s5 + $0xb8] sm:$0x1]  ;;  %v613_v11 = vshll.u32 %v540_v5, 16 }
  0xa3   : > { %1643 = vmatprep.mubr.bf16.mxu1 %v2094_v33  ;;  %v438_v0 = vsel %vm3098_vm2, %v433_v59, %v437_v55  ;;  %v536_v33 = vld [vmem:[%s3076_s5 + $0x58] sm:$0x1]  ;;  %v595_v55 = vrot.slane %v593_v46, 5  ;;  %v2105_v59 = vld [vmem:[%s3076_s5 + $0x60] sm:$0xf] }
  0xa4   : > { %2364 = vmatpush3.bf16.msra.mxu0 %v2631_v22  ;;  %v2090_v2 = vcombine.low %v424_v62, %v438_v0  ;;  %v496_v22 = vld [vmem:[%s3076_s5 + $0x2c] sm:$0xf]  ;;  %v568_v26 = vor.u32 %v567_v20, %v564_v17  ;;  %v585_v41 = vshll.u32 %v536_v33, 16  ;;  %v2106_v62 = vld [vmem:[%s3076_s5 + $0x80] sm:$0xf]  ;;  %v615_v20 = vrot.slane %v613_v11, 5 }
  0xa5   : > { %2404 = vmatpush3.bf16.msra.mxu1 %v2632_v24  ;;  %2365 = vmatprep.subr.bf16.mxu0 %v2633_v48  ;;  %v554_v24 = vor.u32 %v553_v16, %v550_v15  ;;  %v2095_v35 = vcombine.low %v495_v18, %v496_v22  ;;  %v2118_v48 = vld [vmem:[%s3076_s5 + $0x84] sm:$0xf]  ;;  %v2112_v0 = vcombine.low %v2105_v59, %v2106_v62  ;;  %v621_v15 = vshll.u32 %v541_v6, 16  ;;  %v500_v33 = vld [vmem:[%s3076_s5 + $0xac] sm:$0xf] }
  0xa6   : > { %2405 = vmatprep.subr.bf16.mxu1 %v2634_v49  ;;  %v587_v51 = vrot.slane %v585_v41, 5  ;;  %v2124_v57 = vcombine.low %v2117_v43, %v2118_v48  ;;  %v627_v16 = vshll.u32 %v542_v9, 16  ;;  %v2119_v17 = vld [vmem:[%s3076_s5 + $0xa4] sm:$0xf]  ;;  %v543_v36 = vld [vmem:[%s3076_s5 + $0xc8] sm:$0xf] }
  0xa7   : > { %1579 = vmatmul.mubr.bf16.gmra.mrb[12].mxu0 %v2082_v34  ;;  %v555_v30 = vrot.slane %v554_v24, 4  ;;  %v569_v34 = vrot.slane %v568_v26, 4  ;;  %v2120_v22 = vld [vmem:[%s3076_s5 + $0xc4] sm:$0xf]  ;;  %v623_v24 = vrot.slane %v621_v15, 5  ;;  %v632_v41 = vshrl.u32 %v543_v36, 16 }
  0xa8   : > { %2366 = vmatpush3.bf16.msra.mxu0 %v2635_v53  ;;  %1644 = vmatmul.mubr.bf16.gmra.mrb[12].mxu1 %v2090_v2  ;;  %v497_v53 = vld [vmem:[%s3076_s5 + $0x4c] sm:$0xf]  ;;  %v539_v2 = vld [vmem:[%s3076_s5 + $0x88] sm:$0xf]  ;;  %v629_v25 = vrot.slane %v627_v16, 5  ;;  %v2125_v26 = vcombine.low %v2119_v17, %v2120_v22  ;;  %v635_v43 = vshll.u32 %v543_v36, 16 }
  0xa9   : > { %2406 = vmatpush3.bf16.msra.mxu1 %v2636_v56  ;;  %2367 = vmatprep.subr.bf16.mxu0 %v2637_v58  ;;  %v560_v39 = vsel %vm3098_vm2, %v555_v30, %v559_v19  ;;  %v574_v44 = vsel %vm3098_vm2, %v569_v34, %v573_v27  ;;  %v601_v56 = vrot.slane %v599_v47, 5  ;;  %v498_v58 = vld [vmem:[%s3076_s5 + $0x6c] sm:$0xf]  ;;  %v604_v7 = vshrl.u32 %v539_v2, 16  ;;  %v3190_v27 = vld [vmem:[#allocation6 + $0x220] sm:$0xff]   ;;  %v2648_v22 = vld [vmem:[#allocation6 + $0x238] sm:$0xff]  }
  0xaa   : > { %2407 = vmatprep.subr.bf16.mxu1 %v2638_v61  ;;  %1749 = vmatprep.mubr.bf16.mxu1 %v2123_v21  ;;  %v2099_v49 = vcombine.low %v560_v39, %v574_v44  ;;  %v582_v61 = vor.u32 %v581_v50, %v578_v45  ;;  %v2096_v4 = vcombine.low %v497_v53, %v498_v58  ;;  %v607_v10 = vshll.u32 %v539_v2, 16  ;;  %v2108_v30 = vld [vmem:[%s3076_s5 + $0xc0] sm:$0xf]  ;;  %v544_v37 = vld [vmem:[%s3076_s5 + $0xd8] sm:$0x1]  ;;  %v2646_v48 = vld [vmem:[#allocation6 + $0x228] sm:$0xff]  }
  0xab   : > { %v606_v14 = vrot.slane %v604_v7, 4  ;;  %v620_v21 = vrot.slane %v618_v12, 4  ;;  %v545_v39 = vld [vmem:[%s3076_s5 + $0xe8] sm:$0xf]  ;;  %v546_v40 = vld [vmem:[%s3076_s5 + $0xf8] sm:$0x1] }
  0xac   : > { %2368 = vmatpush3.bf16.msra.mxu0 %v2639_v63  ;;  %1684 = vmatprep.mubr.bf16.mxu0 %v2099_v49  ;;  %v596_v63 = vor.u32 %v595_v55, %v592_v52  ;;  %v583_v3 = vrot.slane %v582_v61, 4  ;;  %v609_v19 = vrot.slane %v607_v10, 5  ;;  %v641_v44 = vshll.u32 %v544_v37, 16  ;;  %v2121_v46 = vld [vmem:[%s3076_s5 + $0xe4] sm:$0xf] }
  0xad   : > { %2408 = vmatpush3.bf16.msra.mxu1 %v2640_v1  ;;  %2445 = vmatprep.subr.bf16.mxu0 %v2641_v29  ;;  %v3175_v1 = vld [vmem:[#allocation6 + $0x218] sm:$0xff]   ;;  %v646_v45 = vshrl.u32 %v545_v39, 16  ;;  %v634_v49 = vrot.slane %v632_v41, 4  ;;  %v649_v50 = vshll.u32 %v545_v39, 16  ;;  %v2122_v52 = vld [vmem:[%s3076_s5 + $0x104] sm:$0xf] }
  0xae   : > { %2469 = vmatprep.subr.bf16.mxu1 %v2641_v29  ;;  %v597_v8 = vrot.slane %v596_v63, 4  ;;  %v588_v13 = vsel %vm3098_vm2, %v583_v3, %v587_v51  ;;  %v655_v51 = vshll.u32 %v546_v40, 16  ;;  %v637_v55 = vrot.slane %v635_v43, 5  ;;  %v2109_v62 = vld [vmem:[%s3076_s5 + $0xe0] sm:$0xf]  ;;  %v3213_v63 = vld [vmem:[#allocation6 + $0x230] sm:$0xff]  }
  0xaf   : > { %1685 = vmatmul.mubr.bf16.vlgmr.msra.gmra.mrb[16].mxu0 %v2095_v35  ;;  %v651_v58 = vrot.slane %v649_v50, 5  ;;  %v2126_v61 = vcombine.low %v2121_v46, %v2122_v52  ;;  %v2110_v2 = vld [vmem:[%s3076_s5 + $0x100] sm:$0xf]  ;;  %v501_v3 = vld [vmem:[%s3076_s5 + $0xcc] sm:$0xf] }
  0xb0   : > { %1750 = vmatmul.mubr.bf16.vlgmr.msra.gmra.mrb[16].mxu1 %v2111_v28  ;;  %2446 = vmatpush3.bf16.msra.mxu0 %v2641_v29  ;;  %v602_v18 = vsel %vm3098_vm2, %v597_v8, %v601_v56  ;;  %v610_v28 = vor.u32 %v609_v19, %v606_v14  ;;  %v648_v56 = vrot.slane %v646_v45, 4  ;;  %v657_v59 = vrot.slane %v655_v51, 5  ;;  %v2127_v5 = vld [vmem:[%s3076_s5 + $0x20] sm:$0xf]  ;;  %v2128_v8 = vld [vmem:[%s3076_s5 + $0x30] sm:$0x1] }
  0xb1   : > { %2477 = vmatpush3.bf16.msra.mxu1 %v2641_v29  ;;  %1757 = vmatprep.mubr.bf16.mxu1 %v2124_v57  ;;  %v2100_v23 = vcombine.low %v588_v13, %v602_v18  ;;  %v2107_v29 = vld [vmem:[%s3076_s5 + $0xa0] sm:$0xf]  ;;  %v643_v57 = vrot.slane %v641_v44, 5  ;;  %v2114_v7 = vcombine.low %v2109_v62, %v2110_v2  ;;  %v772_v10 = vshrl.u32 %v2127_v5, 16  ;;  %v2130_v12 = vld [vmem:[%s3076_s5 + $0x50] sm:$0x1] }
  0xb2   : > { %2470 = vmatprep.subr.bf16.mxu1 %v3158_v31  ;;  %2447 = vmatprep.subr.bf16.mxu0 %v3158_v31  ;;  %v611_v34 = vrot.slane %v610_v28, 4  ;;  %v2113_v35 = vcombine.low %v2107_v29, %v2108_v30  ;;  %v2129_v9 = vld [vmem:[%s3076_s5 + $0x40] sm:$0xf]  ;;  %v775_v13 = vshll.u32 %v2127_v5, 16  ;;  %v781_v14 = vshll.u32 %v2128_v8, 16 }
  0xb3   : > { %1692 = vmatprep.mubr.bf16.mxu0 %v2100_v23  ;;  %v786_v15 = vshrl.u32 %v2129_v9, 16  ;;  %v774_v17 = vrot.slane %v772_v10, 4  ;;  %v789_v18 = vshll.u32 %v2129_v9, 16  ;;  %v795_v19 = vshll.u32 %v2130_v12, 16  ;;  %v2131_v37 = vld [vmem:[%s3076_s5 + $0x60] sm:$0xf] }
  0xb4   : > { %2448 = vmatpush3.bf16.msra.mxu0 %v3158_v31  ;;  %v616_v42 = vsel %vm3098_vm2, %v611_v34, %v615_v20  ;;  %v2135_v20 = vld [vmem:[%s3076_s5 + $0xa0] sm:$0xf]  ;;  %v777_v23 = vrot.slane %v775_v13, 5 }
  0xb5   : > { %2478 = vmatpush3.bf16.msra.mxu1 %v3158_v31  ;;  %2449 = vmatprep.subr.bf16.mxu0 %v2643_v54  ;;  %v624_v31 = vor.u32 %v623_v24, %v620_v21  ;;  %v783_v24 = vrot.slane %v781_v14, 5  ;;  %v791_v29 = vrot.slane %v789_v18, 5  ;;  %v797_v30 = vrot.slane %v795_v19, 5  ;;  %v2139_v62 = vld [vmem:[%s3076_s5 + $0xe0] sm:$0xf] }
  0xb6   : > { %2471 = vmatprep.subr.bf16.mxu1 %v2643_v54  ;;  %v828_v34 = vshrl.u32 %v2135_v20, 16  ;;  %v2141_v10 = vld [vmem:[%s3076_s5 + $0x100] sm:$0xf] }
  0xb7   : > { %1693 = vmatmul.mubr.bf16.gmra.mrb[20].mxu0 %v2096_v4  ;;  %v625_v38 = vrot.slane %v624_v31, 4  ;;  %v502_v4 = vld [vmem:[%s3076_s5 + $0xec] sm:$0xf]  ;;  %v2137_v31 = vld [vmem:[%s3076_s5 + $0xc0] sm:$0xf] }
  0xb8   : > { %1758 = vmatmul.mubr.bf16.gmra.mrb[20].mxu1 %v2112_v0  ;;  %2450 = vmatpush3.bf16.msra.mxu0 %v2643_v54  ;;  %v638_v0 = vor.u32 %v637_v55, %v634_v49  ;;  %v2098_v28 = vcombine.low %v501_v3, %v502_v4  ;;  %v842_v39 = vshrl.u32 %v2137_v31, 16  ;;  %v845_v40 = vshll.u32 %v2137_v31, 16 }
  0xb9   : > { %2479 = vmatpush3.bf16.msra.mxu1 %v2643_v54  ;;  %1765 = vmatprep.mubr.bf16.mxu1 %v2125_v26  ;;  %v630_v47 = vsel %vm3098_vm2, %v625_v38, %v629_v25  ;;  %v2097_v54 = vcombine.low %v499_v32, %v500_v33  ;;  %v788_v25 = vrot.slane %v786_v15, 4  ;;  %v2136_v26 = vld [vmem:[%s3076_s5 + $0xb0] sm:$0x1]  ;;  %v778_v33 = vor.u32 %v777_v23, %v774_v17 }
  0xba   : > { %2472 = vmatprep.subr.bf16.mxu1 %v3175_v1  ;;  %2451 = vmatprep.subr.bf16.mxu0 %v3175_v1  ;;  %v2101_v53 = vcombine.low %v616_v42, %v630_v47  ;;  %v639_v6 = vrot.slane %v638_v0, 4  ;;  %v2138_v32 = vld [vmem:[%s3076_s5 + $0xd0] sm:$0x1]  ;;  %v837_v36 = vshll.u32 %v2136_v26, 16  ;;  %v830_v44 = vrot.slane %v828_v34, 4 }
  0xbb   : > { %v792_v38 = vor.u32 %v791_v29, %v788_v25  ;;  %v851_v41 = vshll.u32 %v2138_v32, 16  ;;  %v2132_v42 = vld [vmem:[%s3076_s5 + $0x70] sm:$0x1]  ;;  %v779_v43 = vrot.slane %v778_v33, 4  ;;  %v2133_v47 = vld [vmem:[%s3076_s5 + $0x80] sm:$0xf] }
  0xbc   : > { %2452 = vmatpush3.bf16.msra.mxu0 %v3175_v1  ;;  %1700 = vmatprep.mubr.bf16.mxu0 %v2101_v53  ;;  %v644_v16 = vsel %vm3098_vm2, %v639_v6, %v643_v57  ;;  %v839_v46 = vrot.slane %v837_v36, 5  ;;  %v844_v49 = vrot.slane %v842_v39, 4  ;;  %v847_v50 = vrot.slane %v845_v40, 5  ;;  %v2140_v6 = vld [vmem:[%s3076_s5 + $0xf0] sm:$0x1] }
  0xbd   : > { %2480 = vmatpush3.bf16.msra.mxu1 %v3175_v1  ;;  %2453 = vmatprep.subr.bf16.mxu0 %v3190_v27  ;;  %v652_v1 = vor.u32 %v651_v58, %v648_v56  ;;  %v853_v51 = vrot.slane %v851_v41, 5  ;;  %v784_v52 = vsel %vm3098_vm2, %v779_v43, %v783_v24  ;;  %v803_v55 = vshll.u32 %v2131_v37, 16  ;;  %v2134_v58 = vld [vmem:[%s3076_s5 + $0x90] sm:$0x1] }
  0xbe   : > { %2473 = vmatprep.subr.bf16.mxu1 %v3190_v27  ;;  %v848_v57 = vor.u32 %v847_v50, %v844_v49  ;;  %v817_v5 = vshll.u32 %v2133_v47, 16  ;;  %v823_v9 = vshll.u32 %v2134_v58, 16  ;;  %v2142_v15 = vld [vmem:[%s3076_s5 + $0x110] sm:$0x1]  ;;  %v870_v24 = vshrl.u32 %v2141_v10, 16 }
  0xbf   : > { %1701 = vmatmul.mubr.bf16.gmra.mrb[24].mxu0 %v2097_v54  ;;  %v653_v11 = vrot.slane %v652_v1, 4  ;;  %v800_v54 = vshrl.u32 %v2131_v37, 16  ;;  %v805_v1 = vrot.slane %v803_v55, 5  ;;  %v873_v25 = vshll.u32 %v2141_v10, 16 }
  0xc0   : > { %1766 = vmatmul.mubr.bf16.gmra.mrb[24].mxu1 %v2113_v35  ;;  %2454 = vmatpush3.bf16.msra.mxu0 %v3190_v27  ;;  %v831_v35 = vshll.u32 %v2135_v20, 16  ;;  %v849_v3 = vrot.slane %v848_v57, 4  ;;  %v819_v14 = vrot.slane %v817_v5, 5  ;;  %v865_v20 = vshll.u32 %v2140_v6, 16 }
  0xc1   : > { %2481 = vmatpush3.bf16.msra.mxu1 %v3190_v27  ;;  %1773 = vmatprep.mubr.bf16.mxu1 %v2126_v61  ;;  %v658_v21 = vsel %vm3098_vm2, %v653_v11, %v657_v59  ;;  %v809_v59 = vshll.u32 %v2132_v42, 16  ;;  %v814_v61 = vshrl.u32 %v2133_v47, 16  ;;  %v802_v2 = vrot.slane %v800_v54, 4 }
  0xc2   : > { %2474 = vmatprep.subr.bf16.mxu1 %v2646_v48  ;;  %2455 = vmatprep.subr.bf16.mxu0 %v2646_v48  ;;  %v2102_v27 = vcombine.low %v644_v16, %v658_v21  ;;  %v833_v45 = vrot.slane %v831_v35, 5  ;;  %v856_v11 = vshrl.u32 %v2139_v62, 16  ;;  %v854_v12 = vsel %vm3098_vm2, %v849_v3, %v853_v51 }
  0xc3   : > { %v816_v4 = vrot.slane %v814_v61, 4  ;;  %v806_v8 = vor.u32 %v805_v1, %v802_v2  ;;  %v811_v13 = vrot.slane %v809_v59, 5  ;;  %v859_v16 = vshll.u32 %v2139_v62, 16 }
  0xc4   : > { %2456 = vmatpush3.bf16.msra.mxu0 %v2646_v48  ;;  %1708 = vmatprep.mubr.bf16.mxu0 %v2102_v27  ;;  %v834_v53 = vor.u32 %v833_v45, %v830_v44  ;;  %v858_v19 = vrot.slane %v856_v11, 4  ;;  %v879_v26 = vshll.u32 %v2142_v15, 16  ;;  %v867_v31 = vrot.slane %v865_v20, 5 }
  0xc5   : > { %2482 = vmatpush3.bf16.msra.mxu1 %v2646_v48  ;;  %2457 = vmatprep.subr.bf16.mxu0 %v3213_v63  ;;  %v793_v48 = vrot.slane %v792_v38, 4  ;;  %v807_v18 = vrot.slane %v806_v8, 4  ;;  %v820_v21 = vor.u32 %v819_v14, %v816_v4  ;;  %v861_v23 = vrot.slane %v859_v16, 5 }
  0xc6   : > { %2475 = vmatprep.subr.bf16.mxu1 %v3213_v63  ;;  %v875_v32 = vrot.slane %v873_v25, 5  ;;  %v881_v37 = vrot.slane %v879_v26, 5 }
  0xc7   : > { %1709 = vmatmul.mubr.bf16.gmra.mrb[28].mxu0 %v2098_v28  ;;  %v798_v56 = vsel %vm3098_vm2, %v793_v48, %v797_v30  ;;  %v812_v27 = vsel %vm3098_vm2, %v807_v18, %v811_v13  ;;  %v821_v28 = vrot.slane %v820_v21, 4  ;;  %v862_v29 = vor.u32 %v861_v23, %v858_v19  ;;  %v2147_v48 = vld [vmem:[#allocation8] ss:$0 sm:$0xff] }
  0xc8   : > { %1774 = vmatmul.mubr.bf16.gmra.mrb[28].mxu1 %v2114_v7  ;;  %2458 = vmatpush3.bf16.msra.mxu0 %v3213_v63  ;;  %v2143_v0 = vcombine.low %v784_v52, %v798_v56  ;;  %v872_v30 = vrot.slane %v870_v24, 4 }
  0xc9   : > { %2483 = vmatpush3.bf16.msra.mxu1 %v3213_v63  ;;  %2459 = vmatprep.subr.bf16.mxu0 %v2648_v22  ;;  %v835_v63 = vrot.slane %v834_v53, 4  ;;  %v863_v34 = vrot.slane %v862_v29, 4 }
  0xca   : > { %2476 = vmatprep.subr.bf16.mxu1 %v2648_v22  ;;  %2461 = vmatprep.mubr.bf16.mxu0 %v2143_v0  ;;  %v876_v36 = vor.u32 %v875_v32, %v872_v30 }
  0xcb   : > { %v840_v7 = vsel %vm3098_vm2, %v835_v63, %v839_v46  ;;  %v868_v38 = vsel %vm3098_vm2, %v863_v34, %v867_v31 }
  0xcc   : > { %2460 = vmatpush3.bf16.msra.mxu0 %v2648_v22  ;;  %v2145_v17 = vcombine.low %v840_v7, %v854_v12  ;;  %v877_v39 = vrot.slane %v876_v36, 4 }
  0xcd   : > { %2484 = vmatpush3.bf16.msra.mxu1 %v2648_v22  ;;  %v825_v22 = vrot.slane %v823_v9, 5 }
  0xce   : > { %2465 = vmatprep.mubr.bf16.mxu1 %v2145_v17  ;;  %v882_v40 = vsel %vm3098_vm2, %v877_v39, %v881_v37 }
  0xcf   : > { %v826_v33 = vsel %vm3098_vm2, %v821_v28, %v825_v22  ;;  %v2146_v41 = vcombine.low %v868_v38, %v882_v40 }
  0xd0   : > { %v2144_v35 = vcombine.low %v812_v27, %v826_v33 }
  0xd1   : > { %2466 = vmatmul.mubr.bf16.vlgmr.msra.gmra.mrb[32].mxu1 %v2146_v41 }
  0xd2   : > { %2462 = vmatmul.mubr.bf16.vlgmr.msra.gmra.mrb[32].mxu0 %v2144_v35 }
 0x162   : > { %v2289_v42 = vpop.f32.mrb[0].mxu0 }
 0x163   : > { %v2290_v43 = vpop.f32.mrb[1].mxu0  ;;  %v2329_v49 = vpop.f32.mrb[0].mxu1 }
 0x164   : > { %v2291_v44 = vadd.f32 %v2290_v43, %v2289_v42  ;;  %v2292_v45 = vpop.f32.mrb[2].mxu0  ;;  %v2330_v51 = vpop.f32.mrb[1].mxu1 }
 0x165   : > { %v2293_v46 = vpop.f32.mrb[3].mxu0  ;;  %v2331_v52 = vadd.f32 %v2330_v51, %v2329_v49  ;;  %v2332_v53 = vpop.f32.mrb[2].mxu1 }
 0x166   : > { %v2294_v47 = vadd.f32 %v2293_v46, %v2292_v45  ;;  %v1557_v50 = vadd.f32 %v2291_v44, %v2147_v48  ;;  %v2333_v55 = vpop.f32.mrb[3].mxu1 }
 0x167   : > { %v2334_v60 = vadd.f32 %v2333_v55, %v2332_v53 }
 0x168   : > { %v1560_v54 = vadd.f32 %v2294_v47, %v2147_v48  ;;  %v1622_v57 = vadd.f32 %v2331_v52, %v1557_v50 }
 0x16a   : > { %v2295_v56 = vpop.f32.mrb[4].mxu0  ;;  %v1625_v62 = vadd.f32 %v2334_v60, %v1560_v54 }
 0x16b   : > { %v2296_v58 = vpop.f32.mrb[5].mxu0  ;;  %v2335_v2 = vpop.f32.mrb[4].mxu1 }
 0x16c   : > { %v2297_v59 = vadd.f32 %v2296_v58, %v2295_v56  ;;  %v2298_v61 = vpop.f32.mrb[6].mxu0  ;;  %v2336_v3 = vpop.f32.mrb[5].mxu1 }
 0x16d   : > { %v2299_v0 = vpop.f32.mrb[7].mxu0  ;;  %v2337_v4 = vadd.f32 %v2336_v3, %v2335_v2  ;;  %v2338_v5 = vpop.f32.mrb[6].mxu1 }
 0x16e   : > { %v2300_v63 = vadd.f32 %v2299_v0, %v2298_v61  ;;  %v1565_v1 = vadd.f32 %v2297_v59, %v2147_v48  ;;  %v2339_v8 = vpop.f32.mrb[7].mxu1 }
 0x16f   : > { %v2340_v11 = vadd.f32 %v2339_v8, %v2338_v5 }
 0x170   : > { %v1568_v6 = vadd.f32 %v2300_v63, %v2147_v48  ;;  %v1630_v10 = vadd.f32 %v2337_v4, %v1565_v1 }
 0x172   : > { %v2301_v7 = vpop.f32.mrb[8].mxu0  ;;  %v1633_v15 = vadd.f32 %v2340_v11, %v1568_v6 }
 0x173   : > { %v2302_v9 = vpop.f32.mrb[9].mxu0  ;;  %v2341_v17 = vpop.f32.mrb[8].mxu1 }
 0x174   : > { %v2303_v12 = vadd.f32 %v2302_v9, %v2301_v7  ;;  %v2304_v13 = vpop.f32.mrb[10].mxu0  ;;  %v2342_v19 = vpop.f32.mrb[9].mxu1 }
 0x175   : > { %v2305_v14 = vpop.f32.mrb[11].mxu0  ;;  %v2343_v20 = vadd.f32 %v2342_v19, %v2341_v17  ;;  %v2344_v21 = vpop.f32.mrb[10].mxu1 }
 0x176   : > { %v2306_v16 = vadd.f32 %v2305_v14, %v2304_v13  ;;  %v1573_v18 = vadd.f32 %v2303_v12, %v2147_v48  ;;  %v2345_v24 = vpop.f32.mrb[11].mxu1 }
 0x177   : > { %v2346_v27 = vadd.f32 %v2345_v24, %v2344_v21 }
 0x178   : > { %v1576_v22 = vadd.f32 %v2306_v16, %v2147_v48  ;;  %v1638_v26 = vadd.f32 %v2343_v20, %v1573_v18 }
 0x17a   : > { %v2307_v23 = vpop.f32.mrb[12].mxu0  ;;  %v1641_v31 = vadd.f32 %v2346_v27, %v1576_v22 }
 0x17b   : > { %v2308_v25 = vpop.f32.mrb[13].mxu0  ;;  %v2347_v33 = vpop.f32.mrb[12].mxu1 }
 0x17c   : > { %v2309_v28 = vadd.f32 %v2308_v25, %v2307_v23  ;;  %v2310_v29 = vpop.f32.mrb[14].mxu0  ;;  %v2348_v35 = vpop.f32.mrb[13].mxu1 }
 0x17d   : > { %v2311_v30 = vpop.f32.mrb[15].mxu0  ;;  %v2349_v36 = vadd.f32 %v2348_v35, %v2347_v33  ;;  %v2350_v37 = vpop.f32.mrb[14].mxu1 }
 0x17e   : > { %v2312_v32 = vadd.f32 %v2311_v30, %v2310_v29  ;;  %v1581_v34 = vadd.f32 %v2309_v28, %v2147_v48  ;;  %v2351_v39 = vpop.f32.mrb[15].mxu1 }
 0x17f   : > { %v2352_v41 = vadd.f32 %v2351_v39, %v2350_v37 }
 0x180   : > { %v1584_v38 = vadd.f32 %v2312_v32, %v2147_v48  ;;  %v1646_v40 = vadd.f32 %v2349_v36, %v1581_v34 }
 0x182   : > { %v1649_v42 = vadd.f32 %v2352_v41, %v1584_v38  ;;  %v2369_v49 = vpop.f32.mrb[16].mxu0 }
 0x183   : > { %v2409_v43 = vpop.f32.mrb[16].mxu1  ;;  %v2370_v51 = vpop.f32.mrb[17].mxu0 }
 0x184   : > { %v2410_v44 = vpop.f32.mrb[17].mxu1  ;;  %v2371_v52 = vadd.f32 %v2370_v51, %v2369_v49  ;;  %v2372_v53 = vpop.f32.mrb[18].mxu0 }
 0x185   : > { %v2411_v45 = vadd.f32 %v2410_v44, %v2409_v43  ;;  %v2412_v46 = vpop.f32.mrb[18].mxu1  ;;  %v2373_v54 = vpop.f32.mrb[19].mxu0 }
 0x186   : > { %v2413_v47 = vpop.f32.mrb[19].mxu1  ;;  %v1687_v55 = vadd.f32 %v2371_v52, %v1622_v57  ;;  %v2374_v56 = vadd.f32 %v2373_v54, %v2372_v53 }
 0x187   : > { %v2414_v50 = vadd.f32 %v2413_v47, %v2412_v46 }
 0x188   : > { %v1690_v48 = vadd.f32 %v2374_v56, %v1625_v62  ;;  %v1752_v0 = vadd.f32 %v2411_v45, %v1687_v55 }
 0x18a   : > { %v2375_v2 = vpop.f32.mrb[20].mxu0  ;;  %v1755_v3 = vadd.f32 %v2414_v50, %v1690_v48 }
 0x18b   : > { %v2415_v60 = vpop.f32.mrb[20].mxu1  ;;  %v2376_v4 = vpop.f32.mrb[21].mxu0 }
 0x18c   : > { %v2416_v58 = vpop.f32.mrb[21].mxu1  ;;  %v2377_v5 = vadd.f32 %v2376_v4, %v2375_v2  ;;  %v2378_v6 = vpop.f32.mrb[22].mxu0 }
 0x18d   : > { %v2417_v59 = vadd.f32 %v2416_v58, %v2415_v60  ;;  %v2418_v61 = vpop.f32.mrb[22].mxu1  ;;  %v2379_v7 = vpop.f32.mrb[23].mxu0 }
 0x18e   : > { %v2419_v63 = vpop.f32.mrb[23].mxu1  ;;  %v1695_v8 = vadd.f32 %v2377_v5, %v1630_v10  ;;  %v2380_v9 = vadd.f32 %v2379_v7, %v2378_v6 }
 0x18f   : > { %v2420_v1 = vadd.f32 %v2419_v63, %v2418_v61 }
 0x190   : > { %v1698_v57 = vadd.f32 %v2380_v9, %v1633_v15  ;;  %v1760_v16 = vadd.f32 %v2417_v59, %v1695_v8 }
 0x192   : > { %v2381_v17 = vpop.f32.mrb[24].mxu0  ;;  %v1763_v19 = vadd.f32 %v2420_v1, %v1698_v57 }
 0x193   : > { %v2421_v11 = vpop.f32.mrb[24].mxu1  ;;  %v2382_v20 = vpop.f32.mrb[25].mxu0 }
 0x194   : > { %v2422_v12 = vpop.f32.mrb[25].mxu1  ;;  %v2383_v21 = vadd.f32 %v2382_v20, %v2381_v17  ;;  %v2384_v22 = vpop.f32.mrb[26].mxu0 }
 0x195   : > { %v2423_v13 = vadd.f32 %v2422_v12, %v2421_v11  ;;  %v2424_v14 = vpop.f32.mrb[26].mxu1  ;;  %v2385_v23 = vpop.f32.mrb[27].mxu0 }
 0x196   : > { %v2425_v62 = vpop.f32.mrb[27].mxu1  ;;  %v1703_v24 = vadd.f32 %v2383_v21, %v1638_v26  ;;  %v2386_v25 = vadd.f32 %v2385_v23, %v2384_v22 }
 0x197   : > { %v2426_v18 = vadd.f32 %v2425_v62, %v2424_v14 }
 0x198   : > { %v1706_v10 = vadd.f32 %v2386_v25, %v1641_v31  ;;  %v1768_v32 = vadd.f32 %v2423_v13, %v1703_v24 }
 0x19a   : > { %v2387_v33 = vpop.f32.mrb[28].mxu0  ;;  %v1771_v35 = vadd.f32 %v2426_v18, %v1706_v10 }
 0x19b   : > { %v2427_v27 = vpop.f32.mrb[28].mxu1  ;;  %v2388_v36 = vpop.f32.mrb[29].mxu0 }
 0x19c   : > { %v2428_v28 = vpop.f32.mrb[29].mxu1  ;;  %v2389_v37 = vadd.f32 %v2388_v36, %v2387_v33  ;;  %v2390_v38 = vpop.f32.mrb[30].mxu0 }
 0x19d   : > { %v2429_v29 = vadd.f32 %v2428_v28, %v2427_v27  ;;  %v2430_v30 = vpop.f32.mrb[30].mxu1  ;;  %v2391_v39 = vpop.f32.mrb[31].mxu0 }
 0x19e   : > { %v2431_v15 = vpop.f32.mrb[31].mxu1  ;;  %v1711_v41 = vadd.f32 %v2389_v37, %v1646_v40  ;;  %v2392_v43 = vadd.f32 %v2391_v39, %v2390_v38 }
 0x19f   : > { %v2432_v34 = vadd.f32 %v2431_v15, %v2430_v30 }
 0x1a0   : > { %v1714_v44 = vadd.f32 %v2392_v43, %v1649_v42  ;;  %v1776_v45 = vadd.f32 %v2429_v29, %v1711_v41 }
 0x1a2   : > { %v1779_v26 = vadd.f32 %v2432_v34, %v1714_v44 }
 0x1a4   : > { %v2467_v56 = vpop.f32.mrb[32].mxu1 }
 0x1a5   : > { %v2463_v46 = vpop.f32.mrb[32].mxu0  ;;  %v1841_v58 = vadd.f32 %v2467_v56, %v1776_v45  ;;  %v1832_v40 = vpop.f32.mrb[33].mxu1 }
 0x1a6   : > { %v1825_v47 = vadd.f32 %v2463_v46, %v1760_v16  ;;  %v1816_v49 = vpop.f32.mrb[33].mxu0  ;;  %v1833_v42 = vadd.f32 %v1832_v40, %v1768_v32  ;;  %v2468_v59 = vpop.f32.mrb[34].mxu1 }
 0x1a7   : > { %v1817_v31 = vadd.f32 %v1816_v49, %v1752_v0  ;;  %v2464_v50 = vpop.f32.mrb[34].mxu0  ;;  %v2226_v61 = vmul.f32 -1.442695, %v1841_v58  ;;  %v1844_v63 = vadd.f32 %v2468_v59, %v1779_v26  ;;  %v1835_v0 = vpop.f32.mrb[35].mxu1 }
 0x1a8   : > { %v2222_v51 = vmul.f32 -1.442695, %v1825_v47  ;;  %v1828_v52 = vadd.f32 %v2464_v50, %v1763_v19  ;;  %v1819_v53 = vpop.f32.mrb[35].mxu0  ;;  %v2224_v2 = vmul.f32 -1.442695, %v1833_v42  ;;  %v1836_v1 = vadd.f32 %v1835_v0, %v1771_v35 }
 0x1a9   : > { %v2220_v54 = vmul.f32 -1.442695, %v1817_v31  ;;  %v1820_v55 = vadd.f32 %v1819_v53, %v1755_v3  ;;  %v2227_v4 = vmul.f32 -1.442695, %v1844_v63 }
 0x1aa   : > { %2649 = vpow2.f32 %v2222_v51  ;;  %v2223_v60 = vmul.f32 -1.442695, %v1828_v52  ;;  %v2225_v3 = vmul.f32 -1.442695, %v1836_v1 }
 0x1ab   : > { %2651 = vpow2.f32 %v2220_v54  ;;  %v2221_v48 = vmul.f32 -1.442695, %v1820_v55 }
 0x1ac   : > { %2653 = vpow2.f32 %v2223_v60 }
 0x1ad   : > { %2655 = vpow2.f32 %v2221_v48 }
 0x1ae   : > { %2657 = vpow2.f32 %v2226_v61 }
 0x1af   : > { %2659 = vpow2.f32 %v2224_v2 }
 0x1b0   : > { %2661 = vpow2.f32 %v2227_v4 }
 0x1b1   : > { %2663 = vpow2.f32 %v2225_v3 }
 0x1b4   : > { %v2650_v5 = vpop.eup %2649 }
 0x1b5   : > { %v2652_v6 = vpop.eup %2651  ;;  %v1873_v7 = vadd.f32 1.0, %v2650_v5 }
 0x1b6   : > { %v2654_v8 = vpop.eup %2653  ;;  %v1871_v9 = vadd.f32 1.0, %v2652_v6 }
 0x1b7   : > { %v2656_v11 = vpop.eup %2655  ;;  %2665 = vrcp.f32 %v1873_v7  ;;  %v1874_v12 = vadd.f32 1.0, %v2654_v8 }
 0x1b8   : > { %2667 = vrcp.f32 %v1871_v9  ;;  %v1872_v57 = vadd.f32 1.0, %v2656_v11  ;;  %v2658_v13 = vpop.eup %2657 }
 0x1b9   : > { %2669 = vrcp.f32 %v1874_v12  ;;  %v2660_v14 = vpop.eup %2659  ;;  %v1877_v16 = vadd.f32 1.0, %v2658_v13 }
 0x1ba   : > { %2671 = vrcp.f32 %v1872_v57  ;;  %v2662_v62 = vpop.eup %2661  ;;  %v1875_v17 = vadd.f32 1.0, %v2660_v14 }
 0x1bb   : > { %v2664_v18 = vpop.eup %2663  ;;  %2673 = vrcp.f32 %v1877_v16  ;;  %v1878_v19 = vadd.f32 1.0, %v2662_v62 }
 0x1bc   : > { %2675 = vrcp.f32 %v1875_v17  ;;  %v1876_v20 = vadd.f32 1.0, %v2664_v18 }
 0x1bd   : > { %2677 = vrcp.f32 %v1878_v19 }
 0x1be   : > { %2679 = vrcp.f32 %v1876_v20 }
 0x1c1   : > { %v2666_v21 = vpop.eup %2665 }
 0x1c2   : > { %v2668_v22 = vpop.eup %2667  ;;  %v1897_v25 = vmul.f32 %v2666_v21, %v1825_v47 }
 0x1c3   : > { %v2670_v23 = vpop.eup %2669  ;;  %v1895_v28 = vmul.f32 %v2668_v22, %v1817_v31 }
 0x1c4   : > { %v2672_v24 = vpop.eup %2671  ;;  %v1898_v27 = vmul.f32 %v2670_v23, %v1828_v52 }
 0x1c5   : > { %v1896_v10 = vmul.f32 %v2672_v24, %v1820_v55  ;;  %v2674_v29 = vpop.eup %2673 }
 0x1c6   : > { %v2258_v30 = vpack.c.bf16 %v1898_v27, %v1897_v25  ;;  %v2676_v32 = vpop.eup %2675  ;;  %v1901_v35 = vmul.f32 %v2674_v29, %v1841_v58 }
 0x1c7   : > { %v2253_v15 = vpack.c.bf16 %v1896_v10, %v1895_v28  ;;  %v2678_v33 = vpop.eup %2677  ;;  %v1899_v37 = vmul.f32 %v2676_v32, %v1833_v42 }
 0x1c8   : > { %2270 = vst [vmem:[%s229_s22 + $0x8] sm:$0xff] %v2258_v30   ;;  %v2680_v34 = vpop.eup %2679  ;;  %v1902_v36 = vmul.f32 %v2678_v33, %v1844_v63 }
 0x1c9   : > { %2254 = vst [vmem:[%s229_s22] sm:$0xff] %v2253_v15   ;;  %v1900_v38 = vmul.f32 %v2680_v34, %v1836_v1 }
 0x1ca   : > { %v2268_v39 = vpack.c.bf16 %v1902_v36, %v1901_v35 }
 0x1cb   : > { %v2263_v41 = vpack.c.bf16 %v1900_v38, %v1899_v37 }
 0x1cc   : > { %2272 = vst [vmem:[%s229_s22 + $0x18] sm:$0xff] %v2268_v39  }
 0x1cd   : > { %2271 = vst [vmem:[%s229_s22 + $0x10] sm:$0xff] %v2263_v41  }
 0x1ce   : > { %2780 = shalt.err (!%p2777_p2)
}
 0x1cf   : > { %s2781_s10 = scalar_lea.hbm %s3267_s9, 512  ;;  %s2785_s29 = scalar_lea.hbm %s3319_s3, 1024 }
 0x1d0   : > { %p2782_p0 = scmp.ne.s32.totalorder %s3267_s9, %s2781_s10  ;;  %p2786_p6 = scmp.lt.u32.totalorder %s3267_s9, %s3319_s3 }
 0x1d1   : > { %p2787_p7 = scmp.lt.u32.totalorder %s2785_s29, %s2781_s10  ;;  %p2789_p8 = scmp.lt.u32.totalorder %s2781_s10, %s3267_s9 }
 0x1d2   : > { %p2783_p4 = pnand %p2782_p0, %p3336_p12 }
 0x1d3   : > { %p2788_p11 = por %p2787_p7, %p2786_p6 }
 0x1d4   : > { %p2784_p13 = pneg %p2783_p4 }
 0x1d5   : > { %p2790_p1 = por %p2789_p8, %p2788_p11 }
 0x1d7   : > { %p2791_p10 = pnand %p2790_p1, %p2784_p13 }
 0x1d9   : > { %2794 = shalt.err (!%p2791_p10)
}
 0x1da   : > { %s2863_s22 = smov 64   ;;  %s2864_s30 = smov 4  }
 0x1db   : > { %2498 = dma.vmem_to_hbm [thread:$0]  (%p3336_p12), %s3262_s24, 512, %s3267_s9, %s1944_s15, %s2863_s22, %s2863_s22, %s2864_s30  }
 0x1dc PF: > { %s1974_s7 = sand.u32 1, %s2833_s12   ;;  %p3337_p3 = scmp.ne.s32.totalorder %s3327_s23, 0 }
 0x1dd   : > { %p3338_p5 = scmp.ge.s32.totalorder %s2853_s17, 2  ;;  %s1975_s26 = scalar_lea.sflag [#allocation5], %s1974_s7 }
 0x1df   : > { %p2512_p9 = pnand %p3338_p5, %p3337_p3 }
 0x1e1   : > { %2828 = dma.done.wait (!%p2512_p9), %s1975_s26, 512  }
 0x1e2   : > { %2830 = vsyncadd (!%p2512_p9), %s1975_s26, 4294966784  ;;  %s20_s17 = sadd.s32 1, %s2853_s17   ;;  %s3339_s12 = smov %s2837_s13 }
 0x1e3   : > { %p17_p2 = scmp.ge.s32.totalorder %s20_s17, 4   ;;  %s3340_s13 = smov %s2841_s14 }
 0x1e4   : > { %s3341_s14 = smov %s3031_s4  ;;  %s3342_s15 = smov %s2849_s16 }
 0x1e5   : > { %s3343_s16 = smov %s3345_s18  ;;  %19 = sbr.rel (!%p17_p2) target bundleno = 7 (0x7), region = 87 }
 0x1ec   :  { %1980 = vsyncpa [#allocation4], 1 }
 0x1ed   :  { %1982 = vsyncpa [#allocation4 + $0x1], 1 }
 0x1ee   :  { %1983 = vsyncpa [#allocation7], 1 }
 0x1ef   :  { %1984 = vsyncpa [#allocation5], 1 }
 0x1f0   :  { %1986 = vsyncpa [#allocation5 + $0x1], 1 }

// kernel: yolo_feature_extractor.5
= control target key start
LH: loop header
LB: loop body
LE: loop exit
PB: predicated region body
PF: predicated region fallthrough
CT: control target
= control target key end

     0   :  { %10 = vsyncpa [#allocation5], 0  ;;  %s3834_s0 = inlined_call_operand.hbm [shape: bf16[2,6,6,128], index: 0, kind: input, shape index: {}]   ;;  %s3835_s1 = inlined_call_operand.hbm [shape: bf16[128,128], index: 1, kind: input, shape index: {}]   ;;  %s3836_s2 = inlined_call_operand.hbm [shape: f32[1,128], index: 2, kind: input, shape index: {}]   ;;  %s3837_s3 = inlined_call_operand.hbm [shape: bf16[1152,128], index: 3, kind: input, shape index: {}]   ;;  %s3838_s4 = inlined_call_operand.hbm [shape: f32[1,128], index: 4, kind: input, shape index: {}]   ;;  %s3839_s5 = inlined_call_operand.hbm [shape: bf16[2,4,4,128], index: 5, kind: output, shape index: {}]  }
   0x1   :  { %12 = vsyncpa [#allocation5 + $0x1], 0 }
   0x2   :  { %13 = vsyncpa [#allocation8], 0 }
   0x3   :  { %14 = vsyncpa [#allocation11], 0 }
   0x4   :  { %15 = vsyncpa [#allocation6], 0 }
   0x5   :  { %17 = vsyncpa [#allocation6 + $0x1], 0  ;;  %s3320_s18 = smov 0   ;;  %s3322_s19 = smov 0  }
   0x6   :  { %s3324_s20 = smov 0   ;;  %s3326_s21 = smov 0  }
   0x7   :  { %s3328_s22 = smov 0   ;;  %s3330_s23 = smov 0  }
   0x8 LB: > { %3846 = sst [smem:[#allocation18_spill]] %s3254_s18  ;;  %s2507_s24 = sadd.s32 4294967295, %s3274_s23   ;;  %s3274_s23 = sphi %s3330_s23, %s23_s23   ;;  %s3270_s22 = sphi %s3328_s22, %s3883_s22   ;;  %s3266_s21 = sphi %s3326_s21, %s3882_s21   ;;  %s3262_s20 = sphi %s3324_s20, %s3881_s20   ;;  %s3258_s19 = sphi %s3322_s19, %s3880_s19   ;;  %s3254_s18 = sphi %s3320_s18, %s3879_s18  }
   0x9   : > { %s2508_s25 = sadd.s32 4294967294, %s3274_s23   ;;  %p55_p0 = scmp.ne.s32.totalorder %s3258_s19, %s3254_s18 }
   0xa   : > { %p3354_p1 = scmp.eq.s32.totalorder %s2507_s24, 0  ;;  %p3358_p2 = scmp.eq.s32.totalorder %s2507_s24, 1 }
   0xb   : > { %p171_p3 = scmp.eq.s32.totalorder %s2508_s25, 1  ;;  %p2509_p5 = scmp.ge.s32.totalorder %s3274_s23, 1 }
   0xc   : > { %s3847_s26 = scalar_select %p3354_p1, 1, 0 }
   0xd   : > { %s3848_s27 = scalar_select %p3358_p2, 1, 0 }
   0xe   : > { %p3364_p4 = por %p3354_p1, %p55_p0  ;;  %p3369_p6 = por %p171_p3, %p55_p0 }
   0xf   : > { %p178_p7 = scmp.lt.s32.totalorder %s3274_s23, 3  ;;  %s3276_s6 = smov [#allocation7]  }
  0x10   : > { %s3849_s28 = scalar_select %p3364_p4, 1, 0 }
  0x11   : > { %s3850_s29 = scalar_select %p3369_p6, 1, 0 }
  0x12   : > { %p3374_p8 = pnand %p2509_p5, %p178_p7  ;;  %s190_s7 = sshll.u32 %s3276_s6, 4  ;;  %s3378_s7 = int_to_ptr.vmem [resolvable:$true] %s190_s7 }
  0x13   : > { %3851 = sst [smem:[#allocation19_spill]] %s3850_s29  ;;  %s3277_s9 = smov [#allocation10]  }
  0x14   : > { %s3852_s30 = scalar_select %p3374_p8, 1, 0 }
  0x15   : > { %p2839_p9 = pneg %p3374_p8  ;;  %s214_s10 = sshll.u32 %s3277_s9, 4  ;;  %s3389_s10 = int_to_ptr.vmem [resolvable:$true] %s214_s10 }
  0x16   : > { %s3278_s11 = smov [#allocation9]   ;;  %s3042_s15 = scalar_lea.hbm %s3835_s1, 1024 }
  0x17   : > { %p3385_p11 = pnand %p2839_p9, %p3354_p1  ;;  %s3391_s12 = sshll.u32 %s3278_s11, 4  ;;  %s205_s12 = int_to_ptr.vmem [resolvable:$true] %s3391_s12 }
  0x18   : > { %p3043_p12 = scmp.ne.s32.totalorder %s3835_s1, %s3042_s15  ;;  %p3049_p5 = scmp.lt.u32.totalorder %s3042_s15, %s3835_s1 }
  0x19   : > { %p3401_p13 = pneg %p3385_p11 }
  0x1b   : > { %p3045_p0 = pnand %p3401_p13, %p3043_p12 }
  0x1d   : > { %p3046_p3 = pneg %p3045_p0 }
  0x1f   : > { %p3051_p7 = pnand %p3049_p5, %p3046_p3 }
  0x21   : > { %3054 = shalt.err (!%p3051_p7)
}
  0x22   : > { %s3055_s9 = scalar_lea.vmem %s3378_s7, 1024  ;;  %p3063_p1 = scmp.lt.s32.totalorder %s3378_s7, %s3378_s7 }
  0x23   : > { %p3056_p9 = scmp.ne.s32.totalorder %s3378_s7, %s3055_s9  ;;  %p3064_p4 = scmp.lt.s32.totalorder %s3055_s9, %s3055_s9 }
  0x25   : > { %p3058_p10 = pnand %p3056_p9, %p3401_p13  ;;  %p3065_p12 = por %p3064_p4, %p3063_p1 }
  0x27   : > { %p3059_p6 = pneg %p3058_p10 }
  0x29   : > { %p3066_p0 = pnand %p3065_p12, %p3059_p6 }
  0x2b   : > { %3069 = shalt.err (!%p3066_p0)
}
  0x2c   : > { %s3279_s11 = smov 64   ;;  %s3280_s13 = smov 4  }
  0x2d   : > { %2842 = dma.hbm_to_vmem [thread:$0]  (!%p3385_p11), %s3835_s1, 1024, %s3378_s7, [#allocation8], %s3279_s11, %s3279_s11, %s3280_s13  }
  0x2e   : > { %s3070_s25 = scalar_lea.hbm %s3837_s3, 9216 }
  0x2f   : > { %p3071_p1 = scmp.ne.s32.totalorder %s3837_s3, %s3070_s25  ;;  %p3077_p10 = scmp.lt.u32.totalorder %s3070_s25, %s3837_s3 }
  0x31   : > { %p3073_p4 = pnand %p3071_p1, %p3401_p13 }
  0x33   : > { %p3074_p6 = pneg %p3073_p4 }
  0x35   : > { %p3079_p3 = pnand %p3077_p10, %p3074_p6 }
  0x37   : > { %3082 = shalt.err (!%p3079_p3)
}
  0x38   : > { %s3083_s7 = scalar_lea.vmem %s3389_s10, 9216  ;;  %p3091_p12 = scmp.lt.s32.totalorder %s3389_s10, %s3389_s10 }
  0x39   : > { %p3084_p5 = scmp.ne.s32.totalorder %s3389_s10, %s3083_s7  ;;  %p3092_p0 = scmp.lt.s32.totalorder %s3083_s7, %s3083_s7 }
  0x3b   : > { %p3086_p7 = pnand %p3084_p5, %p3401_p13  ;;  %p3093_p1 = por %p3092_p0, %p3091_p12 }
  0x3d   : > { %p3087_p9 = pneg %p3086_p7 }
  0x3f   : > { %p3094_p4 = pnand %p3093_p1, %p3087_p9 }
  0x41   : > { %3097 = shalt.err (!%p3094_p4)
}
  0x42   : > { %2848 = dma.hbm_to_vmem [thread:$0]  (!%p3385_p11), %s3837_s3, 9216, %s3389_s10, [#allocation11], %s3279_s11, %s3279_s11, %s3280_s13  }
  0x43   : > { %s3098_s16 = scalar_lea.hbm %s3836_s2, 16 }
  0x44   : > { %p3099_p6 = scmp.ne.s32.totalorder %s3836_s2, %s3098_s16  ;;  %p3105_p5 = scmp.lt.u32.totalorder %s3098_s16, %s3836_s2 }
  0x46   : > { %p3101_p10 = pnand %p3099_p6, %p3401_p13 }
  0x48   : > { %p3102_p3 = pneg %p3101_p10 }
  0x4a   : > { %p3107_p7 = pnand %p3105_p5, %p3102_p3 }
  0x4c   : > { %3110 = shalt.err (!%p3107_p7)
}
  0x4d   : > { %s3111_s7 = scalar_lea.vmem %s205_s12, 16  ;;  %s3118_s10 = scalar_lea.vmem %s205_s12, 32 }
  0x4e   : > { %p3112_p9 = scmp.ne.s32.totalorder %s205_s12, %s3111_s7  ;;  %p3119_p1 = scmp.lt.s32.totalorder %s205_s12, %s205_s12 }
  0x4f   : > { %p3120_p4 = scmp.lt.s32.totalorder %s3118_s10, %s3111_s7 }
  0x50   : > { %p3114_p12 = pnand %p3112_p9, %p3401_p13 }
  0x51   : > { %p3121_p8 = por %p3120_p4, %p3119_p1 }
  0x52   : > { %p3115_p0 = pneg %p3114_p12 }
  0x54   : > { %p3122_p2 = pnand %p3121_p8, %p3115_p0 }
  0x56   : > { %3125 = shalt.err (!%p3122_p2)
}
  0x57   : > { %2845 = dma.hbm_to_vmem [thread:$0]  (!%p3385_p11), %s3836_s2, 16, %s205_s12, [#allocation8]  }
  0x58   : > { %s3281_s14 = smov [#allocation12]   ;;  %s3126_s25 = scalar_lea.hbm %s3838_s4, 16 }
  0x59   : > { %s228_s15 = sshll.u32 %s3281_s14, 4  ;;  %p3127_p6 = scmp.ne.s32.totalorder %s3838_s4, %s3126_s25  ;;  %s229_s15 = int_to_ptr.vmem [resolvable:$true] %s228_s15 }
  0x5a   : > { %p3133_p10 = scmp.lt.u32.totalorder %s3126_s25, %s3838_s4 }
  0x5b   : > { %p3129_p2 = pnand %p3127_p6, %p3401_p13 }
  0x5d   : > { %p3130_p8 = pneg %p3129_p2 }
  0x5f   : > { %p3135_p3 = pnand %p3133_p10, %p3130_p8 }
  0x61   : > { %3138 = shalt.err (!%p3135_p3)
}
  0x62   : > { %s3139_s12 = scalar_lea.vmem %s229_s15, 16  ;;  %s3146_s18 = scalar_lea.vmem %s229_s15, 32 }
  0x63   : > { %p3140_p5 = scmp.ne.s32.totalorder %s229_s15, %s3139_s12  ;;  %p3147_p12 = scmp.lt.s32.totalorder %s229_s15, %s229_s15 }
  0x64   : > { %p3148_p0 = scmp.lt.s32.totalorder %s3146_s18, %s3139_s12 }
  0x65   : > { %p3142_p7 = pnand %p3140_p5, %p3401_p13 }
  0x66   : > { %p3149_p1 = por %p3148_p0, %p3147_p12 }
  0x67   : > { %p3143_p9 = pneg %p3142_p7 }
  0x69   : > { %p3150_p4 = pnand %p3149_p1, %p3143_p9 }
  0x6b   : > { %3153 = shalt.err (!%p3150_p4)
}
  0x6c   : > { %2851 = dma.hbm_to_vmem [thread:$0]  (!%p3385_p11), %s3838_s4, 16, %s229_s15, [#allocation11]  }
  0x6d   : > { %s35_s24 = sadd.s32 1, %s3270_s22  ;;  %s42_s16 = sadd.s32 1, %s3262_s20 }
  0x6e   : > { %p37_p13 = scmp.ge.s32.totalorder %s35_s24, 2  ;;  %p49_p6 = scmp.ne.s32.totalorder %s3262_s20, %s3258_s19 }
  0x6f   : > { %p50_p2 = scmp.eq.s32.totalorder %s3274_s23, 0  ;;  %p2864_p8 = scmp.lt.s32.totalorder %s3274_s23, 2 }
  0x70   : > { %s3885_s24 = smov (%p37_p13, %s35_s24), 0  ;;  %p3855_p3 = scmp.ne.s32.totalorder %s3848_s27, 0 }
  0x71   : > { %p51_p10 = por %p50_p2, %p49_p6  ;;  %s39_s17 = ssub.s32 %s3270_s22, %s3885_s24 }
  0x72   : > { %p3498_p5 = por %p3855_p3, %p49_p6  ;;  %s239_s25 = sand.u32 1, %s3262_s20  }
  0x73   : > { %p40_p7 = scmp.eq.s32.totalorder %s39_s17, 0  ;;  %s2816_s15 = smul.u32 24, %s239_s25 }
  0x74   : > { %p3505_p11 = pnand %p2864_p8, %p51_p10  ;;  %s2817_s7 = smul.u32 384, %s3270_s22 }
  0x75   : > { %s3510_s9 = scalar_select %p40_p7, %s3262_s20, %s42_s16  }
  0x76   : > { %s243_s10 = scalar_lea.vmem [#allocation4], %s2816_s15  ;;  %s3516_s29 = scalar_lea.hbm %s3834_s0, %s2817_s7 }
  0x77   : > { %s250_s12 = sshll.u32 %s243_s10, 4  ;;  %s3520_s14 = scalar_lea.sflag [#allocation5], %s239_s25  ;;  %s3518_s12 = int_to_ptr.vmem [resolvable:$true] %s250_s12 }
  0x78   : > { %s3154_s17 = scalar_lea.hbm %s3516_s29, 384  ;;  %p3156_p12 = pneg %p3505_p11 }
  0x79   : > { %p3155_p9 = scmp.ne.s32.totalorder %s3516_s29, %s3154_s17  ;;  %s3159_s7 = scalar_lea.hbm %s3834_s0, 768 }
  0x7a   : > { %p3160_p4 = scmp.lt.u32.totalorder %s3516_s29, %s3834_s0  ;;  %p3161_p13 = scmp.lt.u32.totalorder %s3159_s7, %s3154_s17 }
  0x7b   : > { %p3157_p0 = pnand %p3156_p12, %p3155_p9  ;;  %p3163_p2 = scmp.lt.u32.totalorder %s3154_s17, %s3516_s29 }
  0x7c   : > { %p3162_p6 = por %p3161_p13, %p3160_p4 }
  0x7d   : > { %p3158_p1 = pneg %p3157_p0 }
  0x7e   : > { %p3164_p8 = por %p3163_p2, %p3162_p6 }
  0x80   : > { %p3165_p10 = pnand %p3164_p8, %p3158_p1 }
  0x82   : > { %3168 = shalt.err (!%p3165_p10)
}
  0x83   : > { %s3169_s25 = scalar_lea.vmem %s3518_s12, 384  ;;  %s3282_s18 = smov [#allocation4]  }
  0x84   : > { %p3170_p3 = scmp.ne.s32.totalorder %s3518_s12, %s3169_s25  ;;  %s3174_s16 = sshll.u32 %s3282_s18, 4  ;;  %s3175_s16 = int_to_ptr.vmem [resolvable:$false] %s3174_s16 }
  0x85   : > { %s3176_s15 = scalar_lea.vmem %s3175_s16, 768  ;;  %p3177_p0 = scmp.lt.s32.totalorder %s3518_s12, %s3175_s16 }
  0x86   : > { %p3172_p7 = pnand %p3170_p3, %p3156_p12  ;;  %p3178_p4 = scmp.lt.s32.totalorder %s3176_s15, %s3169_s25 }
  0x88   : > { %p3173_p9 = pneg %p3172_p7  ;;  %p3179_p13 = por %p3178_p4, %p3177_p0 }
  0x8a   : > { %p3180_p6 = pnand %p3179_p13, %p3173_p9 }
  0x8c   : > { %3183 = shalt.err (!%p3180_p6)
}
  0x8d   : > { %2855 = dma.hbm_to_vmem [thread:$0]  (!%p3505_p11), %s3516_s29, 384, %s3518_s12, %s3520_s14, %s3279_s11, %s3279_s11, %s3280_s13  }
  0x8e   : > { %p3858_p12 = scmp.ne.s32.totalorder %s3852_s30, 0 }
  0x8f   : > { %s3554_s17 = sand.u32 (!%p3858_p12), 1, %s3258_s19   ;;  %p3859_p1 = scmp.ne.s32.totalorder (!%p3858_p12), %s3849_s28, 0 }
  0x90   : > { %262 = sbr.rel (%p3858_p12) target bundleno = 818 (0x332), region = 40  ;;  %s265_s10 = scalar_lea.sflag (!%p3858_p12), [#allocation5], %s3554_s17 }
  0x91   : > { %s2818_s7 = smul.u32 (!%p3858_p12), 24, %s3554_s17 }
  0x93   : > { %s3558_s27 = scalar_lea.vmem (!%p3858_p12), [#allocation4], %s2818_s7 }
  0x97   : > { %3237 = dma.done.wait (%p3859_p1), %s265_s10, 384  }
  0x98   : > { %3239 = vsyncadd (%p3859_p1), %s265_s10, 4294966912  ;;  %p3860_p11 = scmp.ne.s32.totalorder %s3847_s26, 0 }
  0x9a   : > { %3241 = dma.done.wait (%p3860_p11), [#allocation8], 1040  }
  0x9b   : > { %3243 = vsyncadd (%p3860_p11), [#allocation8], 4294966256 }
  0x9c   : > { %3245 = dma.done.wait (%p3860_p11), [#allocation11], 9232  }
  0x9d   : > { %3247 = vsyncadd (%p3860_p11), [#allocation11], 4294958064  ;;  %vm376_vm0 = vsmask.f32 1280  ;;  %v2930_v0 = vld [vmem:[#allocation7] sm:$0xff]   ;;  %v2931_v1 = vld [vmem:[#allocation7 + $0x8] sm:$0xff]   ;;  %v495_v2 = vlaneseq }
  0x9e   : > { %2776 = vmatprep.subr.bf16.mxu0 %v2930_v0  ;;  %vm377_vm1 = vsmask.f32 3336  ;;  %vm379_vm2 = vsmask.f32 5392  ;;  %v2932_v3 = vld [vmem:[#allocation7 + $0x10] sm:$0xff]   ;;  %v2933_v4 = vld [vmem:[#allocation7 + $0x18] sm:$0xff]  }
  0x9f   : > { %2777 = vmatpush3.bf16.msra.mxu0 %v2930_v0  ;;  %vm381_vm3 = vsmask.f32 7448  ;;  %v3572_v5 = vshrl.u32 %v495_v2, 7  ;;  %vm378_vm4 = vmor %vm376_vm0, %vm377_vm1  ;;  %v3283_v20 = vmov 1983009808   ;;  %v2934_v22 = vld [vmem:[#allocation7 + $0x20] sm:$0xff]  }
  0xa0   : > { %2778 = vmatprep.subr.bf16.mxu0 %v2931_v1  ;;  %v2522_v6 = vld.sshfl [vmem:[%s3558_s27] sm:$0x13 pattern:$0x76325410]  ;;  %vm3580_vm5 = vmor %vm378_vm4, %vm379_vm2  ;;  %v493_v21 = vunpack.c.l.s4 %v3283_v20  ;;  %vm634_vm7 = vcmask 1040384   ;;  %vm655_vm9 = vcmask 1042434  }
  0xa1   : > { %v2523_v7 = vld.sshfl [vmem:[%s3558_s27 + $0x4] sm:$0x13 pattern:$0x76325410]  ;;  %v335_v8 = vcombine.high %v2522_v6, %v2522_v6  ;;  %v384_v9 = vshrl.u32 %v2522_v6, 16  ;;  %v387_v10 = vshll.u32 %v2522_v6, 16  ;;  %vm3587_vm6 = vmor %vm3580_vm5, %vm381_vm3 }
  0xa2   : > { %v2524_v11 = vld.sshfl [vmem:[%s3558_s27 + $0x8] sm:$0x13 pattern:$0x76325410]  ;;  %v343_v12 = vcombine.high %v2523_v7, %v2523_v7  ;;  %v398_v13 = vshrl.u32 %v2523_v7, 16  ;;  %v401_v14 = vshll.u32 %v2523_v7, 16  ;;  %v494_v44 = vunpack.c.0.s8 %v493_v21  ;;  %vm3647_vm13 = vmor %vm634_vm7, %vm655_vm9 }
  0xa3   : > { %2779 = vmatpush3.bf16.msra.mxu0 %v2931_v1  ;;  %v2525_v15 = vld.sshfl [vmem:[%s3558_s27 + $0xc] sm:$0x13 pattern:$0x76325410]  ;;  %v351_v16 = vcombine.high %v2524_v11, %v2524_v11  ;;  %v386_v18 = vrot.slane %v384_v9, 6  ;;  %v389_v19 = vrot.slane %v387_v10, 7 }
  0xa4   : > { %2780 = vmatprep.subr.bf16.mxu0 %v2932_v3  ;;  %v359_v23 = vcombine.high %v2525_v15, %v2525_v15  ;;  %v393_v24 = vshll.u32 %v335_v8, 16  ;;  %v400_v25 = vrot.slane %v398_v13, 6  ;;  %v403_v26 = vrot.slane %v401_v14, 7  ;;  %v2935_v40 = vld [vmem:[#allocation7 + $0x28] sm:$0xff]   ;;  %v2936_v58 = vld [vmem:[#allocation7 + $0x30] sm:$0xff]   ;;  %s2521_s26 = sshll.u32 %s3554_s17, 3 }
  0xa5   : > { %v390_v27 = vor.u32 %v389_v19, %v386_v18  ;;  %v407_v28 = vshll.u32 %v343_v12, 16  ;;  %v412_v29 = vshrl.u32 %v2524_v11, 16  ;;  %v415_v30 = vshll.u32 %v2524_v11, 16  ;;  %v2990_v31 = vld [vmem:[#allocation10 + $0x1a0] sm:$0xff]   ;;  %s310_s28 = scalar_lea.vmem [#allocation13], %s2521_s26  ;;  %s2668_s11 = sshll.u32 %s3266_s21, 7 }
  0xa6   : > { %v395_v32 = vrot.slane %v393_v24, 7  ;;  %v404_v33 = vor.u32 %v403_v26, %v400_v25  ;;  %v421_v34 = vshll.u32 %v351_v16, 16  ;;  %v426_v35 = vshrl.u32 %v2525_v15, 16  ;;  %v649_v25 = vld [vmem:[#allocation2 + $0x10] sm:$0x1]  ;;  %s2379_s30 = sshll.u32 %s310_s28, 4  ;;  %s3785_s12 = scalar_lea.hbm %s3839_s5, %s2668_s11  ;;  %s3780_s30 = int_to_ptr.vmem [resolvable:$true] %s2379_s30 }
  0xa7   : > { %2781 = vmatpush3.bf16.msra.mxu0 %v2932_v3  ;;  %v391_v36 = vrot.slane %v390_v27, 2  ;;  %v409_v37 = vrot.slane %v407_v28, 7  ;;  %v414_v38 = vrot.slane %v412_v29, 6  ;;  %v417_v39 = vrot.slane %v415_v30, 7  ;;  %v2937_v3 = vld [vmem:[#allocation7 + $0x38] sm:$0xff]   ;;  %s2364_s21 = scalar_lea.sflag [#allocation6], %s3554_s17 }
  0xa8   : > { %2782 = vmatprep.subr.bf16.mxu0 %v2933_v4  ;;  %v405_v41 = vrot.slane %v404_v33, 2  ;;  %v428_v42 = vrot.slane %v426_v35, 6  ;;  %v429_v43 = vshll.u32 %v2525_v15, 16  ;;  %v423_v47 = vrot.slane %v421_v34, 7  ;;  %v652_v27 = vld [vmem:[#allocation2 + $0x14] sm:$0x1] }
  0xa9   : > { %v396_v45 = vsel %vm3587_vm6, %v391_v36, %v395_v32  ;;  %v418_v46 = vor.u32 %v417_v39, %v414_v38  ;;  %v435_v48 = vshll.u32 %v359_v23, 16  ;;  %v2526_v49 = vld.sshfl [vmem:[%s3558_s27 + $0x10] sm:$0x13 pattern:$0x76325410]  ;;  %v3598_v0 = vsub.s32 %v494_v44, %v3572_v5  ;;  %s3184_s29 = scalar_lea.vmem %s3780_s30, 128 }
  0xaa   : > { %v410_v50 = vsel %vm3587_vm6, %v405_v41, %v409_v37  ;;  %v431_v51 = vrot.slane %v429_v43, 7  ;;  %v2527_v52 = vld.sshfl [vmem:[%s3558_s27 + $0x14] sm:$0x13 pattern:$0x76325410]  ;;  %v367_v53 = vcombine.high %v2526_v49, %v2526_v49  ;;  %v440_v54 = vshrl.u32 %v2526_v49, 16  ;;  %p3185_p2 = scmp.ne.s32.totalorder %s3780_s30, %s3184_s29 }
  0xab   : > { %2783 = vmatpush3.bf16.msra.mxu0 %v2933_v4  ;;  %v419_v55 = vrot.slane %v418_v46, 2  ;;  %v437_v56 = vrot.slane %v435_v48, 7  ;;  %v375_v57 = vcombine.high %v2527_v52, %v2527_v52  ;;  %v443_v61 = vshll.u32 %v2526_v49, 16  ;;  %v670_v28 = vld [vmem:[#allocation2 + $0x10] sm:$0x4]  ;;  %v2938_v36 = vld [vmem:[#allocation10 + $0xc0] sm:$0xff]  }
  0xac   : > { %2784 = vmatprep.subr.bf16.mxu0 %v2934_v22  ;;  %v432_v59 = vor.u32 %v431_v51, %v428_v42  ;;  %v442_v60 = vrot.slane %v440_v54, 6  ;;  %v449_v62 = vshll.u32 %v367_v53, 16  ;;  %v490_v63 = vcombine.low %v396_v45, %v410_v50  ;;  %v673_v33 = vld [vmem:[#allocation2 + $0x14] sm:$0x4]  ;;  %v2939_v37 = vld [vmem:[#allocation10 + $0x80] sm:$0xff]   ;;  %p3186_p8 = pnand %p3185_p2, %p3498_p5  ;;  %s3287_s14 = smov [#allocation13]  }
  0xad   : > { %v454_v1 = vshrl.u32 %v2527_v52, 16  ;;  %v457_v2 = vshll.u32 %v2527_v52, 16  ;;  %v424_v4 = vsel %vm3587_vm6, %v419_v55, %v423_v47  ;;  %v445_v7 = vrot.slane %v443_v61, 7  ;;  %v637_v38 = vld [vmem:[#allocation2] sm:$0x1]  ;;  %v2940_v54 = vld [vmem:[#allocation10 + $0xc8] sm:$0xff]  }
  0xae   : > { %v433_v6 = vrot.slane %v432_v59, 2  ;;  %v463_v8 = vshll.u32 %v375_v57, 16  ;;  %v451_v13 = vrot.slane %v449_v62, 7  ;;  %v498_v15 = vrot.slane %v490_v63, %v3598_v0  ;;  %v643_v39 = vld [vmem:[#allocation2 + $0x8] sm:$0x1]  ;;  %v2941_v55 = vld [vmem:[#allocation10 + $0x40] sm:$0xff]   ;;  %p3187_p10 = pneg %p3186_p8 }
  0xaf   : > { %2785 = vmatpush3.bf16.msra.mxu0 %v2934_v22  ;;  %v456_v9 = vrot.slane %v454_v1, 6  ;;  %v459_v10 = vrot.slane %v457_v2, 7  ;;  %v446_v12 = vor.u32 %v445_v7, %v442_v60  ;;  %vm635_vm8 = vsmask.f32 256  ;;  %v664_v44 = vld [vmem:[#allocation2 + $0x8] sm:$0x4]  ;;  %2679 = vmatprep.subr.bf16.mxu1 %v2941_v55 }
  0xb0   : > { %2786 = vmatprep.subr.bf16.mxu0 %v2935_v40  ;;  %v438_v11 = vsel %vm3587_vm6, %v433_v6, %v437_v56  ;;  %v465_v5 = vrot.slane %v463_v8, 7  ;;  %vm3612_vm10 = vmand %vm634_vm7, %vm635_vm8  ;;  %vm656_vm11 = vsmask.f32 7946  ;;  %v640_v45 = vld [vmem:[#allocation2 + $0x4] sm:$0x1]  ;;  %v2942_v56 = vld [vmem:[#allocation10 + $0x88] sm:$0xff]  }
  0xb1   : > { %v491_v14 = vcombine.low %v424_v4, %v438_v11  ;;  %v460_v16 = vor.u32 %v459_v10, %v456_v9  ;;  %v447_v17 = vrot.slane %v446_v12, 2  ;;  %v650_v29 = vsel %vm3612_vm10, 0, %v649_v25  ;;  %vm3621_vm12 = vmand %vm655_vm9, %vm656_vm11  ;;  %v646_v46 = vld [vmem:[#allocation2 + $0xc] sm:$0x1]  ;;  %v661_v47 = vld [vmem:[#allocation2 + $0x4] sm:$0x4] }
  0xb2   : > { %v653_v30 = vsel %vm3612_vm10, 0, %v652_v27  ;;  %651 = vst [vmem:[#allocation2 + $0x10] sm:$0x1] %v650_v29  ;;  %v671_v34 = vsel %vm3621_vm12, 0, %v670_v28  ;;  %v674_v35 = vsel %vm3621_vm12, 0, %v673_v33  ;;  %v638_v41 = vsel %vm3612_vm10, 0, %v637_v38 }
  0xb3   : > { %2787 = vmatpush3.bf16.msra.mxu0 %v2935_v40  ;;  %v505_v18 = vrot.slane %v491_v14, %v3598_v0  ;;  %v461_v19 = vrot.slane %v460_v16, 2  ;;  %v452_v20 = vsel %vm3587_vm6, %v447_v17, %v451_v13  ;;  %654 = vst [vmem:[#allocation2 + $0x14] sm:$0x1] %v653_v30  ;;  %672 = vst [vmem:[#allocation2 + $0x10] sm:$0x4] %v671_v34  ;;  %v644_v42 = vsel %vm3612_vm10, 0, %v643_v39 }
  0xb4   : > { %2788 = vmatprep.subr.bf16.mxu0 %v2936_v58  ;;  %675 = vst [vmem:[#allocation2 + $0x14] sm:$0x4] %v674_v35  ;;  %v658_v40 = vld [vmem:[#allocation2] sm:$0x4]  ;;  %639 = vst [vmem:[#allocation2] sm:$0x1] %v638_v41 }
  0xb5   : > { %v506_v21 = vcombine.low %v498_v15, %v505_v18  ;;  %v466_v22 = vsel %vm3587_vm6, %v461_v19, %v465_v5  ;;  %v659_v43 = vsel %vm3621_vm12, 0, %v658_v40  ;;  %645 = vst [vmem:[#allocation2 + $0x8] sm:$0x1] %v644_v42  ;;  %v641_v48 = vsel %vm3612_vm10, 0, %v640_v45  ;;  %v667_v52 = vld [vmem:[#allocation2 + $0xc] sm:$0x4] }
  0xb6   : > { %v507_v23 = vcombine.low %v452_v20, %v466_v22  ;;  %660 = vst [vmem:[#allocation2] sm:$0x4] %v659_v43  ;;  %v647_v49 = vsel %vm3612_vm10, 0, %v646_v46  ;;  %v662_v50 = vsel %vm3621_vm12, 0, %v661_v47  ;;  %v665_v51 = vsel %vm3621_vm12, 0, %v664_v44  ;;  %v2943_v57 = vld [vmem:[#allocation10] sm:$0xff]  }
  0xb7   : > { %2789 = vmatpush3.bf16.msra.mxu0 %v2936_v58  ;;  %2792 = vmatprep.mubr.bf16.mxu0 %v506_v21  ;;  %642 = vst [vmem:[#allocation2 + $0x4] sm:$0x1] %v641_v48  ;;  %648 = vst [vmem:[#allocation2 + $0xc] sm:$0x1] %v647_v49  ;;  %v668_v53 = vsel %vm3621_vm12, 0, %v667_v52  ;;  %v2944_v58 = vld [vmem:[#allocation10 + $0xd0] sm:$0xff]  }
  0xb8   : > { %2790 = vmatprep.subr.bf16.mxu0 %v2937_v3  ;;  %v514_v24 = vrot.slane %v507_v23, %v3598_v0  ;;  %663 = vst [vmem:[#allocation2 + $0x4] sm:$0x4] %v662_v50  ;;  %666 = vst [vmem:[#allocation2 + $0x8] sm:$0x4] %v665_v51  ;;  %2680 = vmatpush3.bf16.msra.mxu1 %v2943_v57  ;;  %v2945_v59 = vld [vmem:[#allocation10 + $0x48] sm:$0xff]   ;;  %v2946_v60 = vld [vmem:[#allocation10 + $0x90] sm:$0xff]  }
  0xb9   : > { %669 = vst [vmem:[#allocation2 + $0xc] sm:$0x4] %v668_v53  ;;  %v2947_v61 = vld [vmem:[#allocation10 + $0x8] sm:$0xff]   ;;  %2681 = vmatprep.subr.bf16.mxu1 %v2945_v59  ;;  %v2948_v62 = vld [vmem:[#allocation10 + $0xd8] sm:$0xff]   ;;  %v2949_v63 = vld [vmem:[#allocation10 + $0x50] sm:$0xff]   ;;  %vm795_vm14 = vcmask 1042432  }
  0xba   : > { %v2950_v1 = vld [vmem:[#allocation10 + $0x98] sm:$0xff]   ;;  %v2951_v2 = vld [vmem:[#allocation10 + $0x10] sm:$0xff]   ;;  %v2954_v6 = vld [vmem:[#allocation10 + $0xa0] sm:$0xff]   ;;  %vm796_vm15 = vsmask.f32 2306  ;;  %vm1006_vm1 = vcmask 1044484  }
  0xbb   : > { %2791 = vmatpush3.bf16.msra.mxu0 %v2937_v3  ;;  %v2952_v3 = vld [vmem:[#allocation10 + $0xe0] sm:$0xff]   ;;  %v2953_v4 = vld [vmem:[#allocation10 + $0x58] sm:$0xff]   ;;  %v2956_v8 = vld [vmem:[#allocation10 + $0xe8] sm:$0xff]   ;;  %vm1008_vm2 = vcmask 1046534   ;;  %vm3286_vm5 = vmmov 0   ;;  %s3188_s25 = sshll.u32 %s3287_s14, 4  ;;  %s3189_s25 = int_to_ptr.vmem [resolvable:$false] %s3188_s25 }
  0xbc   : > { %2701 = vmatprep.subr.bf16.mxu0 %v2938_v36  ;;  %2682 = vmatpush3.bf16.msra.mxu1 %v2947_v61  ;;  %v2955_v7 = vld [vmem:[#allocation10 + $0x18] sm:$0xff]   ;;  %v2957_v9 = vld [vmem:[#allocation10 + $0x60] sm:$0xff]   ;;  %v2958_v10 = vld [vmem:[#allocation10 + $0xa8] sm:$0xff]   ;;  %s3190_s18 = scalar_lea.vmem %s3189_s25, 256  ;;  %p3191_p3 = scmp.lt.s32.totalorder %s3780_s30, %s3189_s25 }
  0xbd   : > { %2683 = vmatprep.subr.bf16.mxu1 %v2949_v63  ;;  %v2959_v11 = vld [vmem:[#allocation10 + $0x20] sm:$0xff]   ;;  %v2960_v12 = vld [vmem:[#allocation10 + $0xf0] sm:$0xff]   ;;  %v2961_v13 = vld [vmem:[#allocation10 + $0x68] sm:$0xff]   ;;  %p3192_p7 = scmp.lt.s32.totalorder %s3190_s18, %s3184_s29 }
  0xbe   : > { %2793 = vmatmul.mubr.bf16.vlgmr.msra.gmra.mrb[0].mxu0 %v514_v24  ;;  %v2962_v14 = vld [vmem:[#allocation10 + $0xb0] sm:$0xff]   ;;  %v2963_v15 = vld [vmem:[#allocation10 + $0x28] sm:$0xff]   ;;  %v2964_v16 = vld [vmem:[#allocation10 + $0xf8] sm:$0xff]  }
  0xbf   : > { %2702 = vmatpush3.bf16.msra.mxu0 %v2939_v37  ;;  %v2967_v17 = vld [vmem:[#allocation10 + $0x70] sm:$0xff]   ;;  %v2968_v18 = vld [vmem:[#allocation10 + $0xb8] sm:$0xff]   ;;  %v2970_v20 = vld [vmem:[#allocation10 + $0x1c0] sm:$0xff]   ;;  %p3193_p9 = por %p3192_p7, %p3191_p3 }
  0xc0   : > { %2703 = vmatprep.subr.bf16.mxu0 %v2940_v54  ;;  %2684 = vmatpush3.bf16.msra.mxu1 %v2951_v2  ;;  %v2969_v19 = vld [vmem:[#allocation10 + $0x30] sm:$0xff]   ;;  %v2971_v21 = vld [vmem:[#allocation10 + $0x78] sm:$0xff]   ;;  %v2975_v23 = vld [vmem:[#allocation10 + $0x140] sm:$0xff]  }
  0xc1   : > { %2685 = vmatprep.subr.bf16.mxu1 %v2953_v4  ;;  %v2973_v22 = vld [vmem:[#allocation10 + $0x38] sm:$0xff]   ;;  %vm3659_vm0 = vmand %vm795_vm14, %vm796_vm15  ;;  %v810_v4 = vld [vmem:[#allocation2 + $0x10] sm:$0x7]  ;;  %p3194_p0 = pnand %p3193_p9, %p3187_p10 }
  0xc2   : > { %v2528_v24 = vld [vmem:[#allocation9] ss:$0 sm:$0xff]  ;;  %vm1007_vm3 = vmor %vm3647_vm13, %vm1006_vm1 }
  0xc3   : > { %2704 = vmatpush3.bf16.msra.mxu0 %v2942_v56  ;;  %vm3686_vm4 = vmor %vm1007_vm3, %vm1008_vm2 }
  0xc4   : > { %2705 = vmatprep.subr.bf16.mxu0 %v2944_v58  ;;  %2686 = vmatpush3.bf16.msra.mxu1 %v2955_v7 }
  0xc5   : > { %2687 = vmatprep.subr.bf16.mxu1 %v2957_v9 }
  0xc7   : > { %2706 = vmatpush3.bf16.msra.mxu0 %v2946_v60 }
  0xc8   : > { %2707 = vmatprep.subr.bf16.mxu0 %v2948_v62  ;;  %2688 = vmatpush3.bf16.msra.mxu1 %v2959_v11 }
  0xc9   : > { %2689 = vmatprep.subr.bf16.mxu1 %v2961_v13  ;;  %v813_v13 = vld [vmem:[#allocation2 + $0x14] sm:$0x7] }
  0xcb   : > { %2708 = vmatpush3.bf16.msra.mxu0 %v2950_v1 }
  0xcc   : > { %2709 = vmatprep.subr.bf16.mxu0 %v2952_v3  ;;  %2690 = vmatpush3.bf16.msra.mxu1 %v2963_v15 }
  0xcd   : > { %2691 = vmatprep.subr.bf16.mxu1 %v2967_v17 }
  0xcf   : > { %2710 = vmatpush3.bf16.msra.mxu0 %v2954_v6 }
  0xd0   : > { %2711 = vmatprep.subr.bf16.mxu0 %v2956_v8  ;;  %2692 = vmatpush3.bf16.msra.mxu1 %v2969_v19 }
  0xd1   : > { %2693 = vmatprep.subr.bf16.mxu1 %v2971_v21 }
  0xd3   : > { %2712 = vmatpush3.bf16.msra.mxu0 %v2958_v10 }
  0xd4   : > { %2713 = vmatprep.subr.bf16.mxu0 %v2960_v12  ;;  %2694 = vmatpush3.bf16.msra.mxu1 %v2973_v22  ;;  %v798_v22 = vld [vmem:[#allocation2] sm:$0x7] }
  0xd5   : > { %2723 = vmatprep.subr.bf16.mxu1 %v2975_v23 }
  0xd7   : > { %2714 = vmatpush3.bf16.msra.mxu0 %v2962_v14 }
  0xd8   : > { %2715 = vmatprep.subr.bf16.mxu0 %v2964_v16 }
  0xdb   : > { %2716 = vmatpush3.bf16.msra.mxu0 %v2968_v18 }
  0xdc   : > { %2745 = vmatprep.subr.bf16.mxu0 %v2970_v20 }
 0x191   : > { %v2794_v25 = vpop.f32.mrb[0].mxu0 }
 0x192   : > { %v608_v26 = vadd.f32 %v2794_v25, %v2528_v24  ;;  %v599_v27 = vpop.f32.mrb[1].mxu0 }
 0x193   : > { %v600_v28 = vadd.f32 %v2528_v24, %v599_v27  ;;  %v2795_v29 = vpop.f32.mrb[2].mxu0  ;;  %v804_v27 = vld [vmem:[#allocation2 + $0x8] sm:$0x7] }
 0x194   : > { %v2539_v30 = vmul.f32 -1.442695, %v608_v26  ;;  %v602_v32 = vpop.f32.mrb[3].mxu0 }
 0x195   : > { %v2537_v33 = vmul.f32 -1.442695, %v600_v28  ;;  %v603_v34 = vadd.f32 %v2528_v24, %v602_v32  ;;  %v807_v32 = vld [vmem:[#allocation2 + $0xc] sm:$0x7] }
 0x196   : > { %3016 = vpow2.f32 %v2539_v30  ;;  %v801_v30 = vld [vmem:[#allocation2 + $0x4] sm:$0x7] }
 0x197   : > { %3018 = vpow2.f32 %v2537_v33  ;;  %v2538_v35 = vmul.f32 -1.442695, %v603_v34 }
 0x199   : > { %3020 = vpow2.f32 %v2538_v35 }
 0x1a0   : > { %v3017_v36 = vpop.eup %3016 }
 0x1a1   : > { %v3019_v37 = vpop.eup %3018  ;;  %v624_v38 = vadd.f32 1.0, %v3017_v36  ;;  %v3284_v36 = vmov 0  }
 0x1a2   : > { %v622_v39 = vadd.f32 1.0, %v3019_v37 }
 0x1a3   : > { %v3021_v40 = vpop.eup %3020  ;;  %3022 = vrcp.f32 %v624_v38 }
 0x1a4   : > { %3024 = vrcp.f32 %v622_v39  ;;  %v623_v41 = vadd.f32 1.0, %v3021_v40 }
 0x1a6   : > { %3026 = vrcp.f32 %v623_v41 }
 0x1ad   : > { %v3023_v42 = vpop.eup %3022 }
 0x1ae   : > { %v3025_v43 = vpop.eup %3024  ;;  %v633_v44 = vmul.f32 %v3023_v42, %v608_v26 }
 0x1af   : > { %v631_v47 = vmul.f32 %v3025_v43, %v600_v28 }
 0x1b0   : > { %v3027_v45 = vpop.eup %3026  ;;  %v677_v46 = vpack.c.bf16 %v633_v44, %v633_v44 }
 0x1b1   : > { %v632_v48 = vmul.f32 %v3027_v45, %v603_v34 }
 0x1b2   : > { %v703_v49 = vrot.slane %v677_v46, %v3598_v0 }
 0x1b3   : > { %v676_v50 = vpack.c.bf16 %v632_v48, %v631_v47  ;;  %v2540_v51 = vpack.c.bf16 %v632_v48, %v632_v48 }
 0x1b4   : > { %v704_v52 = vcombine.high %v703_v49, %v703_v49  ;;  %v739_v53 = vrot.slane %v703_v49, %v3598_v0 }
 0x1b5   : > { %v687_v54 = vrot.slane %v676_v50, %v3598_v0  ;;  %v694_v55 = vrot.slane %v2540_v51, %v3598_v0 }
 0x1b6   : > { %v746_v56 = vrot.slane %v704_v52, %v3598_v0  ;;  %v776_v57 = vshrl.u32 %v739_v53, 16  ;;  %v779_v63 = vshll.u32 %v739_v53, 16 }
 0x1b7   : > { %v695_v58 = vcombine.high %v687_v54, %v687_v54  ;;  %v696_v59 = vcombine.high %v694_v55, %v694_v55  ;;  %v711_v60 = vrot.slane %v687_v54, %v3598_v0  ;;  %v725_v61 = vrot.slane %v694_v55, %v3598_v0 }
 0x1b8   : > { %v778_v62 = vrot.slane %v776_v57, 7  ;;  %v783_v1 = vshrl.u32 %v746_v56, 16  ;;  %v786_v2 = vshll.u32 %v746_v56, 16 }
 0x1b9   : > { %v718_v6 = vrot.slane %v695_v58, %v3598_v0  ;;  %v732_v7 = vrot.slane %v696_v59, %v3598_v0  ;;  %v748_v8 = vshrl.u32 %v711_v60, 16  ;;  %v751_v11 = vshll.u32 %v711_v60, 16 }
 0x1ba   : > { %v781_v9 = vor.u32 %v779_v63, %v778_v62  ;;  %v785_v10 = vrot.slane %v783_v1, 7  ;;  %v762_v12 = vshrl.u32 %v725_v61, 16  ;;  %v765_v16 = vshll.u32 %v725_v61, 16 }
 0x1bb   : > { %v750_v14 = vrot.slane %v748_v8, 7  ;;  %v755_v15 = vshrl.u32 %v718_v6, 16  ;;  %v769_v17 = vshrl.u32 %v732_v7, 16  ;;  %v758_v20 = vshll.u32 %v718_v6, 16 }
 0x1bc   : > { %v788_v18 = vor.u32 %v786_v2, %v785_v10  ;;  %v811_v19 = vsel %vm3659_vm0, %v781_v9, %v810_v4  ;;  %v764_v21 = vrot.slane %v762_v12, 7  ;;  %v772_v26 = vshll.u32 %v732_v7, 16 }
 0x1bd   : > { %812 = vst [vmem:[#allocation2 + $0x10] sm:$0x7] %v811_v19  ;;  %v753_v23 = vor.u32 %v751_v11, %v750_v14  ;;  %v757_v24 = vrot.slane %v755_v15, 7  ;;  %v771_v25 = vrot.slane %v769_v17, 7 }
 0x1be   : > { %v814_v28 = vsel %vm3659_vm0, %v788_v18, %v813_v13  ;;  %v767_v29 = vor.u32 %v765_v16, %v764_v21 }
 0x1bf   : > { %815 = vst [vmem:[#allocation2 + $0x14] sm:$0x7] %v814_v28  ;;  %v760_v33 = vor.u32 %v758_v20, %v757_v24  ;;  %v774_v34 = vor.u32 %v772_v26, %v771_v25  ;;  %v799_v35 = vsel %vm3659_vm0, %v753_v23, %v798_v22 }
 0x1c0   : > { %822 = vst [vmem:[#allocation2 + $0x14] sm:$0x7] %v3284_v36  ;;  %800 = vst [vmem:[#allocation2] sm:$0x7] %v799_v35  ;;  %v805_v37 = vsel %vm3659_vm0, %v767_v29, %v804_v27  ;;  %v2972_v29 = vld [vmem:[#allocation10 + $0x180] sm:$0xff]  }
 0x1c1   : > { %v802_v38 = vsel %vm3659_vm0, %v760_v33, %v801_v30  ;;  %806 = vst [vmem:[#allocation2 + $0x8] sm:$0x7] %v805_v37  ;;  %v808_v39 = vsel %vm3659_vm0, %v774_v34, %v807_v32  ;;  %820 = vst [vmem:[#allocation2] sm:$0x7] %v3284_v36  ;;  %v2974_v34 = vld [vmem:[#allocation10 + $0x1c8] sm:$0xff]  }
 0x1c2   : > { %803 = vst [vmem:[#allocation2 + $0x4] sm:$0x7] %v802_v38  ;;  %809 = vst [vmem:[#allocation2 + $0xc] sm:$0x7] %v808_v39 }
 0x1c4   : > { %v3677_v40 = vld.sshfl [vmem:[#allocation2 + $0x10] sm:$0x13 pattern:$0x76325410] }
 0x1c5   : > { %v1360_v41 = vshrl.u32 %v3677_v40, 16  ;;  %v1363_v43 = vshll.u32 %v3677_v40, 16 }
 0x1c7   : > { %v3680_v42 = vrot.slane %v1360_v41, 6  ;;  %v3692_v62 = vld.sshfl [vmem:[#allocation2 + $0x14] sm:$0x13 pattern:$0x76325410]  ;;  %v1365_v15 = vrot.slane %v1363_v43, 7 }
 0x1c8   : > { %v2545_v44 = vld.sshfl [vmem:[#allocation2] sm:$0x12 pattern:$0x76325410]  ;;  %v1330_v14 = vcombine.high %v3692_v62, %v3692_v62 }
 0x1c9   : > { %v3036_v45 = vld.sshfl [vmem:[#allocation2 + $0x4] sm:$0xf pattern:$0x76325410]  ;;  %v980_v46 = vcombine.high %v2545_v44, %v2545_v44  ;;  %v2549_v51 = vrot.slane %v2545_v44, 9 }
 0x1ca   : > { %v3037_v47 = vld.sshfl [vmem:[#allocation2 + $0xc] sm:$0xf pattern:$0x76325410] }
 0x1cb   : > { %v2546_v48 = vld.sshfl [vmem:[#allocation2 + $0x4] sm:$0x12 pattern:$0x76325410]  ;;  %v1012_v52 = vrot.slane %v980_v46, 7  ;;  %v1070_v63 = vcombine.low %v3036_v45, %v3037_v47  ;;  %v1322_v47 = vcombine.high %v3677_v40, %v3677_v40 }
 0x1cc   : > { %v2547_v49 = vld.sshfl [vmem:[#allocation2 + $0x8] sm:$0x12 pattern:$0x76325410]  ;;  %v988_v50 = vcombine.high %v2546_v48, %v2546_v48  ;;  %v2550_v56 = vrot.slane %v2546_v48, 9  ;;  %v1366_v48 = vor.u32 %v1365_v15, %v3680_v42  ;;  %v1377_v42 = vshll.u32 %v3692_v62, 16 }
 0x1cd   : > { %v2548_v53 = vld.sshfl [vmem:[#allocation2 + $0xc] sm:$0x12 pattern:$0x76325410]  ;;  %v996_v54 = vcombine.high %v2547_v49, %v2547_v49  ;;  %v2551_v57 = vrot.slane %v2547_v49, 9  ;;  %v1013_v5 = vsel %vm3686_vm4, %v2549_v51, %v1012_v52  ;;  %2146 = vmatprep.mubr.bf16.mxu0 %v1070_v63 }
 0x1ce   : > { %v1004_v58 = vcombine.high %v2548_v53, %v2548_v53  ;;  %v1016_v59 = vrot.slane %v988_v50, 7  ;;  %v2552_v60 = vrot.slane %v2548_v53, 9  ;;  %v2541_v61 = vld.sshfl [vmem:[#allocation2] sm:$0x13 pattern:$0x76325410] }
 0x1cf   : > { %v1020_v1 = vrot.slane %v996_v54, 7  ;;  %v2542_v2 = vld.sshfl [vmem:[#allocation2 + $0x4] sm:$0x13 pattern:$0x76325410]  ;;  %v865_v3 = vcombine.high %v2541_v61, %v2541_v61  ;;  %v891_v4 = vshrl.u32 %v2541_v61, 16 }
 0x1d0   : > { %v3696_v6 = vsel %vm3686_vm4, %v2550_v56, %v1016_v59  ;;  %v1024_v7 = vrot.slane %v1004_v58, 7  ;;  %v2543_v8 = vld.sshfl [vmem:[#allocation2 + $0x8] sm:$0x13 pattern:$0x76325410]  ;;  %v873_v9 = vcombine.high %v2542_v2, %v2542_v2  ;;  %v894_v10 = vshll.u32 %v2541_v61, 16 }
 0x1d1   : > { %v1026_v11 = vcombine.low %v1013_v5, %v3696_v6  ;;  %v2544_v12 = vld.sshfl [vmem:[#allocation2 + $0xc] sm:$0x13 pattern:$0x76325410]  ;;  %v893_v13 = vrot.slane %v891_v4, 6  ;;  %v3703_v16 = vsel %vm3686_vm4, %v2551_v57, %v1020_v1  ;;  %v900_v19 = vshll.u32 %v865_v3, 16 }
 0x1d2   : > { %v3707_v17 = vsel %vm3686_vm4, %v2552_v60, %v1024_v7  ;;  %v896_v18 = vrot.slane %v894_v10, 7  ;;  %v905_v22 = vshrl.u32 %v2542_v2, 16  ;;  %v908_v23 = vshll.u32 %v2542_v2, 16  ;;  %v2976_v58 = vld [vmem:[#allocation10 + $0x188] sm:$0xff]   ;;  %v2980_v61 = vld [vmem:[#allocation10 + $0x1d0] sm:$0xff]  }
 0x1d3   : > { %v1027_v20 = vcombine.low %v3703_v16, %v3707_v17  ;;  %v1034_v21 = vrot.slane %v1026_v11, %v3598_v0  ;;  %v881_v24 = vcombine.high %v2543_v8, %v2543_v8  ;;  %v914_v26 = vshll.u32 %v873_v9, 16  ;;  %v2560_v49 = vld.sshfl [vmem:[#allocation2 + $0x10] sm:$0x12 pattern:$0x76325410]  ;;  %v2982_v10 = vld [vmem:[#allocation10 + $0x190] sm:$0xff]  }
 0x1d4   : > { %v897_v25 = vor.u32 %v896_v18, %v893_v13  ;;  %v919_v27 = vshrl.u32 %v2543_v8, 16  ;;  %v907_v30 = vrot.slane %v905_v22, 6  ;;  %v910_v32 = vrot.slane %v908_v23, 7 }
 0x1d5   : > { %v3713_v28 = vrot.slane %v1027_v20, %v3598_v0  ;;  %v922_v33 = vshll.u32 %v2543_v8, 16  ;;  %v889_v35 = vcombine.high %v2544_v12, %v2544_v12  ;;  %v902_v37 = vrot.slane %v900_v19, 7  ;;  %v3038_v4 = vld.sshfl [vmem:[#allocation2] sm:$0xf pattern:$0x76325410] }
 0x1d6   : > { %v898_v36 = vrot.slane %v897_v25, 2  ;;  %v921_v38 = vrot.slane %v919_v27, 6  ;;  %v911_v41 = vor.u32 %v910_v32, %v907_v30  ;;  %v933_v44 = vshrl.u32 %v2544_v12, 16 }
 0x1d7   : > { %v1042_v39 = vcombine.low %v1034_v21, %v3713_v28  ;;  %v924_v43 = vrot.slane %v922_v33, 7  ;;  %v916_v45 = vrot.slane %v914_v26, 7  ;;  %v936_v46 = vshll.u32 %v2544_v12, 16  ;;  %v2984_v21 = vld [vmem:[#allocation10 + $0x1d8] sm:$0xff]  }
 0x1d8   : > { %v912_v50 = vrot.slane %v911_v41, 2  ;;  %v928_v52 = vshll.u32 %v881_v24, 16  ;;  %v935_v53 = vrot.slane %v933_v44, 6  ;;  %v903_v54 = vsel %vm3587_vm6, %v898_v36, %v902_v37  ;;  %v2986_v33 = vld [vmem:[#allocation10 + $0x198] sm:$0xff]   ;;  %v2988_v36 = vld [vmem:[#allocation10 + $0x1e0] sm:$0xff]  }
 0x1d9   : > { %2147 = vmatmul.mubr.bf16.vlgmr.msra.gmra.mrb[4].mxu0 %v1042_v39  ;;  %v925_v51 = vor.u32 %v924_v43, %v921_v38  ;;  %v938_v56 = vrot.slane %v936_v46, 7  ;;  %v942_v57 = vshll.u32 %v889_v35, 16  ;;  %v1374_v5 = vshrl.u32 %v3692_v62, 16  ;;  %v2979_v44 = vld [vmem:[#allocation10 + $0x100] sm:$0xff]  }
 0x1da   : > { %2746 = vmatpush3.bf16.msra.mxu0 %v2972_v29  ;;  %v3724_v40 = vsel %vm3587_vm6, %v912_v50, %v916_v45  ;;  %v1383_v59 = vshll.u32 %v1330_v14, 16  ;;  %v1227_v60 = vcombine.high %v2560_v49, %v2560_v49  ;;  %v1369_v2 = vshll.u32 %v1322_v47, 16  ;;  %v3039_v18 = vld.sshfl [vmem:[#allocation2 + $0x8] sm:$0xf pattern:$0x76325410] }
 0x1db   : > { %2747 = vmatprep.subr.bf16.mxu0 %v2974_v34  ;;  %v926_v63 = vrot.slane %v925_v51, 2  ;;  %v939_v1 = vor.u32 %v938_v56, %v935_v53  ;;  %v1376_v3 = vrot.slane %v1374_v5, 6  ;;  %v946_v7 = vcombine.low %v903_v54, %v3724_v40  ;;  %v2572_v25 = vld.sshfl [vmem:[#allocation2 + $0x14] sm:$0x12 pattern:$0x76325410] }
 0x1dc   : > { %v1379_v8 = vrot.slane %v1377_v42, 7  ;;  %v2564_v9 = vrot.slane %v2560_v49, 9  ;;  %v930_v11 = vrot.slane %v928_v52, 7  ;;  %v944_v13 = vrot.slane %v942_v57, 7  ;;  %v2981_v47 = vld [vmem:[#allocation10 + $0x148] sm:$0xff]   ;;  %v2985_v54 = vld [vmem:[#allocation10 + $0x150] sm:$0xff]  }
 0x1dd   : > { %v940_v12 = vrot.slane %v939_v1, 2  ;;  %v1367_v15 = vrot.slane %v1366_v48, 2  ;;  %v1385_v14 = vrot.slane %v1383_v59, 7  ;;  %v1242_v19 = vrot.slane %v1227_v60, 7  ;;  %v2992_v51 = vld [vmem:[#allocation10 + $0x1e8] sm:$0xff]   ;;  %v2987_v5 = vld [vmem:[#allocation10 + $0x110] sm:$0xff]  }
 0x1de   : > { %2748 = vmatpush3.bf16.msra.mxu0 %v2976_v58  ;;  %v1380_v62 = vor.u32 %v1379_v8, %v1376_v3  ;;  %v1244_v20 = vcombine.low %v3696_v6, %v3703_v16  ;;  %v3732_v22 = vsel %vm3587_vm6, %v926_v63, %v930_v11  ;;  %v1371_v24 = vrot.slane %v1369_v2, 7  ;;  %v2983_v53 = vld [vmem:[#allocation10 + $0x108] sm:$0xff]   ;;  %v2996_v58 = vld [vmem:[#allocation10 + $0x1f0] sm:$0xff]   ;;  %v2989_v42 = vld [vmem:[#allocation10 + $0x158] sm:$0xff]  }
 0x1df   : > { %2749 = vmatprep.subr.bf16.mxu0 %v2980_v61  ;;  %v3736_v23 = vsel %vm3587_vm6, %v940_v12, %v944_v13  ;;  %v954_v27 = vrot.slane %v946_v7, %v3598_v0  ;;  %v1243_v6 = vsel %vm3686_vm4, %v2564_v9, %v1242_v19  ;;  %v1445_v37 = vcombine.high %v2572_v25, %v2572_v25  ;;  %v2994_v57 = vld [vmem:[#allocation10 + $0x1a8] sm:$0xff]   ;;  %v2998_v59 = vld [vmem:[#allocation10 + $0x1b0] sm:$0xff]   ;;  %v3000_v60 = vld [vmem:[#allocation10 + $0x1f8] sm:$0xff]  }
 0x1e0   : > { %v947_v26 = vcombine.low %v3732_v22, %v3736_v23  ;;  %v1381_v29 = vrot.slane %v1380_v62, 2  ;;  %v3745_v16 = vsel %vm3587_vm6, %v1367_v15, %v1371_v24  ;;  %v1245_v30 = vcombine.low %v3707_v17, %v1243_v6  ;;  %v3040_v61 = vld.sshfl [vmem:[#allocation2 + $0x8] sm:$0xf pattern:$0x76325410]  ;;  %v2997_v7 = vld [vmem:[#allocation10 + $0x168] sm:$0xff]  }
 0x1e1   : > { %v1252_v32 = vrot.slane %v1244_v20, %v3598_v0  ;;  %v2576_v38 = vrot.slane %v2572_v25, 9  ;;  %v1460_v17 = vrot.slane %v1445_v37, 7  ;;  %v847_v46 = vcombine.low %v3038_v4, %v3039_v18  ;;  %v2991_v63 = vld [vmem:[#allocation10 + $0x118] sm:$0xff]   ;;  %v2993_v1 = vld [vmem:[#allocation10 + $0x160] sm:$0xff]   ;;  %v2999_v9 = vld [vmem:[#allocation10 + $0x128] sm:$0xff]  }
 0x1e2   : > { %2750 = vmatpush3.bf16.msra.mxu0 %v2982_v10  ;;  %v961_v34 = vrot.slane %v947_v26, %v3598_v0  ;;  %v1386_v35 = vsel %vm3587_vm6, %v1381_v29, %v1385_v14  ;;  %v1259_v41 = vrot.slane %v1245_v30, %v3598_v0  ;;  %v3041_v2 = vld.sshfl [vmem:[#allocation2 + $0x10] sm:$0xf pattern:$0x76325410]  ;;  %v3002_v3 = vld [vmem:[#allocation10 + $0x1b8] sm:$0xff]   ;;  %v3001_v10 = vld [vmem:[#allocation10 + $0x170] sm:$0xff]   ;;  %v1169_v13 = vcombine.low %v3724_v40, %v3732_v22 }
 0x1e3   : > { %2751 = vmatprep.subr.bf16.mxu0 %v2984_v21  ;;  %v1388_v39 = vcombine.low %v3745_v16, %v1386_v35  ;;  %v1461_v49 = vsel %vm3686_vm4, %v2576_v38, %v1460_v17  ;;  %v2995_v4 = vld [vmem:[#allocation10 + $0x120] sm:$0xff]   ;;  %v1288_v8 = vcombine.low %v3040_v61, %v3041_v2  ;;  %v3003_v11 = vld [vmem:[#allocation10 + $0x130] sm:$0xff]   ;;  %v3006_v12 = vld [vmem:[#allocation10 + $0x178] sm:$0xff]   ;;  %v1170_v15 = vcombine.low %v3736_v23, %v3745_v16 }
 0x1e4   : > { %v962_v43 = vcombine.low %v954_v27, %v961_v34  ;;  %v1260_v48 = vcombine.low %v1252_v32, %v1259_v41  ;;  %v1463_v52 = vcombine.low %v1243_v6, %v1461_v49  ;;  %v3007_v18 = vld [vmem:[#allocation10 + $0x138] sm:$0xff]   ;;  %v1177_v62 = vrot.slane %v1169_v13, %v3598_v0  ;;  %v3008_v19 = vld [vmem:[#allocation10 + $0x200] sm:$0xff]   ;;  %v3009_v24 = vld [vmem:[#allocation10 + $0x208] sm:$0xff]  }
 0x1e5   : > { %v1402_v45 = vrot.slane %v1388_v39, %v3598_v0  ;;  %v1184_v14 = vrot.slane %v1170_v15, %v3598_v0  ;;  %v3285_v21 = vmov 0.0   ;;  %v3010_v40 = vld [vmem:[#allocation10 + $0x210] sm:$0xff]   ;;  %v3011_v22 = vld [vmem:[#allocation10 + $0x218] sm:$0xff]   ;;  %v3012_v23 = vld [vmem:[#allocation10 + $0x220] sm:$0xff]   ;;  %vm2312_vm6 = vcmask 1046532  }
 0x1e6   : > { %2752 = vmatpush3.bf16.msra.mxu0 %v2986_v33  ;;  %2105 = vmatprep.mubr.bf16.mxu1 %v962_v43  ;;  %v3758_v56 = vrot.slane %v1463_v52, %v3598_v0  ;;  %v3013_v25 = vld [vmem:[#allocation10 + $0x228] sm:$0xff]   ;;  %v3014_v26 = vld [vmem:[#allocation10 + $0x230] sm:$0xff]   ;;  %v3015_v27 = vld [vmem:[#allocation10 + $0x238] sm:$0xff]  }
 0x1e7   : > { %2753 = vmatprep.subr.bf16.mxu0 %v2988_v36  ;;  %v1403_v50 = vcombine.low %v961_v34, %v1402_v45  ;;  %2106 = vmatmul.mubr.bf16.vlgmr.msra.gmra.mrb[0].mxu1 %v847_v46  ;;  %v1185_v20 = vcombine.low %v1177_v62, %v1184_v14  ;;  %v2577_v35 = vld [vmem:[#allocation12] ss:$0 sm:$0xff]  ;;  %vm2313_vm7 = vmor %vm795_vm14, %vm2312_vm6 }
 0x1e8   : > { %2724 = vmatpush3.bf16.msra.mxu1 %v2979_v44  ;;  %2187 = vmatprep.mubr.bf16.mxu1 %v1260_v48  ;;  %v1478_v55 = vcombine.low %v3713_v28, %v3758_v56 }
 0x1e9   : > { %2228 = vmatprep.mubr.bf16.mxu0 %v1403_v50  ;;  %2725 = vmatprep.subr.bf16.mxu1 %v2981_v47 }
 0x1ea   : > { %2754 = vmatpush3.bf16.msra.mxu0 %v2990_v31 }
 0x1eb   : > { %2755 = vmatprep.subr.bf16.mxu0 %v2992_v51 }
 0x1ec   : > { %2726 = vmatpush3.bf16.msra.mxu1 %v2983_v53 }
 0x1ed   : > { %2727 = vmatprep.subr.bf16.mxu1 %v2985_v54 }
 0x1ee   : > { %2756 = vmatpush3.bf16.msra.mxu0 %v2994_v57 }
 0x1ef   : > { %2757 = vmatprep.subr.bf16.mxu0 %v2996_v58 }
 0x1f0   : > { %2728 = vmatpush3.bf16.msra.mxu1 %v2987_v5 }
 0x1f1   : > { %2729 = vmatprep.subr.bf16.mxu1 %v2989_v42 }
 0x1f2   : > { %2758 = vmatpush3.bf16.msra.mxu0 %v2998_v59 }
 0x1f3   : > { %2759 = vmatprep.subr.bf16.mxu0 %v3000_v60 }
 0x1f4   : > { %2730 = vmatpush3.bf16.msra.mxu1 %v2991_v63 }
 0x1f5   : > { %2731 = vmatprep.subr.bf16.mxu1 %v2993_v1 }
 0x1f6   : > { %2760 = vmatpush3.bf16.msra.mxu0 %v3002_v3 }
 0x1f8   : > { %2732 = vmatpush3.bf16.msra.mxu1 %v2995_v4  ;;  %v2652_v4 = vld [vmem:[%s3558_s27 + $0x4] sm:$0x7] }
 0x1f9   : > { %2733 = vmatprep.subr.bf16.mxu1 %v2997_v7  ;;  %2229 = vmatmul.mubr.bf16.vlgmr.msra.gmra.mrb[8].mxu0 %v1288_v8  ;;  %v2653_v7 = vld [vmem:[%s3558_s27 + $0x8] sm:$0x7]  ;;  %v2654_v8 = vld [vmem:[%s3558_s27 + $0xc] sm:$0x7] }
 0x1fc   : > { %2734 = vmatpush3.bf16.msra.mxu1 %v2999_v9  ;;  %v2655_v9 = vld [vmem:[%s3558_s27 + $0x10] sm:$0x7] }
 0x1fd   : > { %2735 = vmatprep.subr.bf16.mxu1 %v3001_v10  ;;  %v2299_v10 = vunpack.c.l.bf16 %v2652_v4  ;;  %v2302_v13 = vunpack.c.l.bf16 %v2655_v9 }
 0x1ff   : > { %v2307_v14 = vcombine.high %v2299_v10, %v2299_v10 }
 0x200   : > { %2736 = vmatpush3.bf16.msra.mxu1 %v3003_v11  ;;  %v2300_v11 = vunpack.c.l.bf16 %v2653_v7 }
 0x201   : > { %2737 = vmatprep.subr.bf16.mxu1 %v3006_v12  ;;  %v2301_v12 = vunpack.c.l.bf16 %v2654_v8 }
 0x204   : > { %2738 = vmatpush3.bf16.msra.mxu1 %v3007_v18 }
 0x205   : > { %2796 = vmatprep.subr.bf16.mxu1 %v3285_v21 }
 0x207   : > { %2188 = vmatmul.mubr.bf16.vlgmr.msra.gmra.mrb[4].mxu1 %v1185_v20 }
 0x208   : > { %2797 = vmatpush3.bf16.msra.mxu1 %v3008_v19  ;;  %2812 = vmatprep.mubr.msk.bf16.mxu1 %vm3286_vm5, %v3285_v21  ;;  %v2308_v19 = vcombine.high %v2300_v11, %v2300_v11 }
 0x209   : > { %2798 = vmatprep.subr.bf16.mxu1 %v3285_v21 }
 0x20c   : > { %2799 = vmatpush3.bf16.msra.mxu1 %v3009_v24  ;;  %v2310_v24 = vcombine.high %v2302_v13, %v2302_v13 }
 0x20d   : > { %2800 = vmatprep.subr.bf16.mxu1 %v3285_v21 }
 0x210   : > { %2801 = vmatpush3.bf16.msra.mxu1 %v3010_v40  ;;  %v2656_v40 = vrot.slane %v2299_v10, 9 }
 0x211   : > { %2802 = vmatprep.subr.bf16.mxu1 %v3285_v21 }
 0x214   : > { %2803 = vmatpush3.bf16.msra.mxu1 %v3011_v22  ;;  %v2316_v22 = vrot.slane %v2307_v14, 5 }
 0x215   : > { %2804 = vmatprep.subr.bf16.mxu1 %v3285_v21 }
 0x218   : > { %2805 = vmatpush3.bf16.msra.mxu1 %v3012_v23  ;;  %v2657_v23 = vrot.slane %v2300_v11, 9 }
 0x219   : > { %2806 = vmatprep.subr.bf16.mxu1 %v3285_v21 }
 0x21c   : > { %2807 = vmatpush3.bf16.msra.mxu1 %v3013_v25  ;;  %v2320_v25 = vrot.slane %v2308_v19, 5 }
 0x21d   : > { %2808 = vmatprep.subr.bf16.mxu1 %v3285_v21 }
 0x220   : > { %2809 = vmatpush3.bf16.msra.mxu1 %v3014_v26  ;;  %v2658_v26 = vrot.slane %v2301_v12, 9 }
 0x221   : > { %2810 = vmatprep.subr.bf16.mxu1 %v3285_v21  ;;  %v2309_v21 = vcombine.high %v2301_v12, %v2301_v12 }
 0x224   : > { %2811 = vmatpush3.bf16.msra.mxu1 %v3015_v27  ;;  %v2324_v27 = vrot.slane %v2309_v21, 5 }
 0x227   : > { %2813 = vmatmul.mubr.bf16.vlgmr.msra.gmra.mrb[8].mxu1 %v1478_v55 }
 0x2ac   : > { %v2717_v29 = vpop.f32.mrb[4].mxu0 }
 0x2ad   : > { %v2718_v6 = vpop.f32.mrb[5].mxu0 }
 0x2ae   : > { %v2719_v16 = vadd.f32 %v2718_v6, %v2717_v29  ;;  %v2720_v30 = vpop.f32.mrb[6].mxu0  ;;  %v2659_v29 = vrot.slane %v2302_v13, 9  ;;  %v2328_v6 = vrot.slane %v2310_v24, 5 }
 0x2af   : > { %v2721_v32 = vpop.f32.mrb[7].mxu0 }
 0x2b0   : > { %v2722_v33 = vadd.f32 %v2721_v32, %v2720_v30  ;;  %v2321_v30 = vsel %vm2313_vm7, %v2657_v23, %v2320_v25  ;;  %v2325_v32 = vsel %vm2313_vm7, %v2658_v26, %v2324_v27 }
 0x2ba   : > { %v2695_v34 = vpop.f32.mrb[0].mxu1 }
 0x2bb   : > { %v2696_v36 = vpop.f32.mrb[1].mxu1 }
 0x2bc   : > { %v2697_v37 = vadd.f32 %v2696_v36, %v2695_v34  ;;  %v2698_v38 = vpop.f32.mrb[2].mxu1 }
 0x2bd   : > { %v2699_v39 = vpop.f32.mrb[3].mxu1 }
 0x2be   : > { %v2108_v41 = vadd.f32 %v2697_v37, %v2577_v35  ;;  %v2700_v43 = vadd.f32 %v2699_v39, %v2698_v38 }
 0x2c0   : > { %v2111_v44 = vadd.f32 %v2700_v43, %v2577_v35  ;;  %v2149_v17 = vadd.f32 %v2719_v16, %v2108_v41  ;;  %v2317_v16 = vsel %vm2313_vm7, %v2656_v40, %v2316_v22 }
 0x2c1   : > { %v2330_v36 = vcombine.low %v2317_v16, %v2321_v30 }
 0x2c2   : > { %v2152_v45 = vadd.f32 %v2722_v33, %v2111_v44  ;;  %v2329_v33 = vsel %vm2313_vm7, %v2659_v29, %v2328_v6 }
 0x2c3   : > { %v2331_v37 = vcombine.low %v2325_v32, %v2329_v33 }
 0x2cc   : > { %v2761_v46 = vpop.f32.mrb[8].mxu0 }
 0x2cd   : > { %v2762_v28 = vpop.f32.mrb[9].mxu0 }
 0x2ce   : > { %v2763_v47 = vadd.f32 %v2762_v28, %v2761_v46  ;;  %v2764_v48 = vpop.f32.mrb[10].mxu0 }
 0x2cf   : > { %v2765_v31 = vpop.f32.mrb[11].mxu0 }
 0x2d0   : > { %v2766_v49 = vadd.f32 %v2765_v31, %v2764_v48 }
 0x2da   : > { %v2739_v50 = vpop.f32.mrb[4].mxu1 }
 0x2db   : > { %v2740_v51 = vpop.f32.mrb[5].mxu1 }
 0x2dc   : > { %v2741_v52 = vadd.f32 %v2740_v51, %v2739_v50  ;;  %v2742_v53 = vpop.f32.mrb[6].mxu1 }
 0x2dd   : > { %v2743_v54 = vpop.f32.mrb[7].mxu1 }
 0x2de   : > { %v2190_v56 = vadd.f32 %v2741_v52, %v2149_v17  ;;  %v2744_v57 = vadd.f32 %v2743_v54, %v2742_v53 }
 0x2e0   : > { %v2193_v58 = vadd.f32 %v2744_v57, %v2152_v45  ;;  %v2231_v55 = vadd.f32 %v2763_v47, %v2190_v56 }
 0x2e2   : > { %v2234_v5 = vadd.f32 %v2766_v49, %v2193_v58 }
 0x2fa   : > { %v2271_v42 = vpop.f32.mrb[8].mxu1 }
 0x2fb   : > { %v2272_v59 = vadd.f32 %v2271_v42, %v2231_v55  ;;  %v2814_v60 = vpop.f32.mrb[9].mxu1 }
 0x2fc   : > { %v2274_v61 = vpop.f32.mrb[10].mxu1 }
 0x2fd   : > { %v2650_v63 = vmul.f32 -1.442695, %v2272_v59  ;;  %v2275_v1 = vadd.f32 %v2274_v61, %v2234_v5  ;;  %v2815_v2 = vpop.f32.mrb[11].mxu1 }
 0x2ff   : > { %3028 = vpow2.f32 %v2650_v63  ;;  %v2651_v3 = vmul.f32 -1.442695, %v2275_v1 }
 0x301   : > { %3030 = vpow2.f32 %v2651_v3 }
 0x309   : > { %v3029_v15 = vpop.eup %3028 }
 0x30a   : > { %v2284_v18 = vadd.f32 1.0, %v3029_v15 }
 0x30b   : > { %v3031_v62 = vpop.eup %3030 }
 0x30c   : > { %3032 = vrcp.f32 %v2284_v18  ;;  %v2285_v20 = vadd.f32 1.0, %v3031_v62 }
 0x30e   : > { %3034 = vrcp.f32 %v2285_v20 }
 0x316   : > { %v3033_v34 = vpop.eup %3032 }
 0x317   : > { %v2290_v35 = vmul.f32 %v3033_v34, %v2272_v59 }
 0x318   : > { %v3035_v38 = vpop.eup %3034 }
 0x319   : > { %v2291_v39 = vmul.f32 %v3035_v38, %v2275_v1  ;;  %v2334_v41 = vadd.f32 %v2330_v36, %v2290_v35 }
 0x31b   : > { %v2335_v43 = vadd.f32 %v2331_v37, %v2291_v39 }
 0x31d   : > { %v2336_v44 = vpack.c.bf16 %v2335_v43, %v2334_v41  ;;  %v2660_v17 = vpack.c.bf16 %v2335_v43, %v2335_v43 }
 0x31f   : > { %v2345_v45 = vrot.slane %v2336_v44, %v3598_v0  ;;  %v2352_v46 = vrot.slane %v2660_v17, %v3598_v0  ;;  %2661 = vst.sshfl [vmem:[%s310_s28] sm:$0x3 pattern:$0x76325410] %v2336_v44 }
 0x320   : > { %2662 = vst.sshfl [vmem:[%s310_s28 + $0x4] sm:$0x3 pattern:$0x76325410] %v2660_v17 }
 0x321   : > { %v2353_v28 = vcombine.high %v2345_v45, %v2345_v45  ;;  %v2354_v47 = vcombine.high %v2352_v46, %v2352_v46 }
 0x323   : > { %2360 = vst [vmem:[%s310_s28 + $0x2] sm:$0x3] %v2353_v28  ;;  %2362 = vst [vmem:[%s310_s28 + $0x6] sm:$0x3] %v2354_v47 }
 0x324   : > { %3197 = shalt.err (!%p3194_p0)
}
 0x325   : > { %s3198_s16 = scalar_lea.hbm %s3785_s12, 128  ;;  %s3202_s10 = scalar_lea.hbm %s3839_s5, 256 }
 0x326   : > { %p3199_p4 = scmp.ne.s32.totalorder %s3785_s12, %s3198_s16  ;;  %p3203_p12 = scmp.lt.u32.totalorder %s3785_s12, %s3839_s5 }
 0x327   : > { %p3204_p1 = scmp.lt.u32.totalorder %s3202_s10, %s3198_s16  ;;  %p3206_p2 = scmp.lt.u32.totalorder %s3198_s16, %s3785_s12 }
 0x328   : > { %p3200_p13 = pnand %p3199_p4, %p3498_p5 }
 0x329   : > { %p3205_p11 = por %p3204_p1, %p3203_p12 }
 0x32a   : > { %p3201_p6 = pneg %p3200_p13 }
 0x32b   : > { %p3207_p8 = por %p3206_p2, %p3205_p11 }
 0x32d   : > { %p3208_p10 = pnand %p3207_p8, %p3201_p6 }
 0x32f   : > { %3211 = shalt.err (!%p3208_p10)
}
 0x330   : > { %s3288_s28 = smov 32   ;;  %s3289_s11 = smov 2  }
 0x331   : > { %2837 = dma.vmem_to_hbm [thread:$0]  (%p3498_p5), %s3780_s30, 128, %s3785_s12, %s2364_s21, %s3288_s28, %s3288_s28, %s3289_s11  }
 0x332 PF: > { %s3875_s13 = sld [smem:[#allocation18_spill]]  ;;  %s3876_s6 = sld [smem:[#allocation19_spill]] }
 0x333   : > { %p3878_p7 = scmp.ge.s32.totalorder %s3274_s23, 2 }
 0x338   : > { %s2394_s29 = sand.u32 1, %s3875_s13   ;;  %p3877_p3 = scmp.ne.s32.totalorder %s3876_s6, 0 }
 0x339   : > { %s2395_s14 = scalar_lea.sflag [#allocation6], %s2394_s29 }
 0x33a   : > { %p2857_p9 = pnand %p3878_p7, %p3877_p3 }
 0x33c   : > { %3249 = dma.done.wait (!%p2857_p9), %s2395_s14, 128  }
 0x33d   : > { %3251 = vsyncadd (!%p2857_p9), %s2395_s14, 4294967168  ;;  %s23_s23 = sadd.s32 1, %s3274_s23   ;;  %s3879_s18 = smov %s3258_s19 }
 0x33e   : > { %p20_p0 = scmp.ge.s32.totalorder %s23_s23, 4   ;;  %s3880_s19 = smov %s3262_s20 }
 0x33f   : > { %s3881_s20 = smov %s3510_s9  ;;  %s3882_s21 = smov %s3270_s22 }
 0x340   : > { %s3883_s22 = smov %s3885_s24  ;;  %22 = sbr.rel (!%p20_p0) target bundleno = 8 (0x8), region = 110 }
 0x347   :  { %2400 = vsyncpa [#allocation5], 1 }
 0x348   :  { %2402 = vsyncpa [#allocation5 + $0x1], 1 }
 0x349   :  { %2403 = vsyncpa [#allocation8], 1 }
 0x34a   :  { %2404 = vsyncpa [#allocation11], 1 }
 0x34b   :  { %2405 = vsyncpa [#allocation6], 1 }
 0x34c   :  { %2407 = vsyncpa [#allocation6 + $0x1], 1 }

</bundles_post_ra>
